<compile_context>
chip_gen: v7x
topology: tpu7x:2x2x1
jax: 0.10.0
libtpu: 0.0.40
codegen_flags: <defaults>
</compile_context>

<pallas_src>
import jax
import jax.numpy as jnp
from jax.experimental import pallas as pl
from jax.experimental.pallas import tpu as pltpu

EPS = 1e-5          # PyTorch BatchNorm2d default eps
POLICY_OUT = 73
LANE = 128          # TPU lane width / padding target


# ---------------------------------------------------------------------------
# Fused stem + residual tower kernel
# ---------------------------------------------------------------------------

def _tower_kernel(x_ref, sw_ref, ssc_ref, ssh_ref, rw_ref, rsc_ref, rsh_ref,
                  out_ref, act_ref, tmp_ref, xpad_ref):
    """grid = (1 + num_res_blocks,).  step 0: stem conv; step s>0: res block s-1."""
    step = pl.program_id(0)
    N, Hp, Wp, F = act_ref.shape
    H, W = Hp - 2, Wp - 2
    NHW = N * H * W

    def conv3x3_bn(src_ref, w_bf16, scale, shift):
        # src_ref: zero-bordered (N, H+2, W+2, C) f32 scratch; w_bf16: (9*C, F)
        x = src_ref[...]
        C = x.shape[-1]
        cols = [x[:, dy:dy + H, dx:dx + W, :].reshape(NHW, C)
                for dy in range(3) for dx in range(3)]
        patches = jnp.concatenate(cols, axis=-1).astype(jnp.bfloat16)  # (NHW, 9C)
        acc = jnp.dot(patches, w_bf16, preferred_element_type=jnp.float32)
        return acc * scale + shift                                     # folded BN, f32

    @pl.when(step == 0)
    def _stem():
        # zero-init padded scratches once; borders stay zero forever ("same" pad)
        act_ref[...] = jnp.zeros_like(act_ref)
        tmp_ref[...] = jnp.zeros_like(tmp_ref)
        xpad_ref[...] = jnp.zeros_like(xpad_ref)
        xpad_ref[:, 1:1 + H, 1:1 + W, :] = x_ref[...]
        y = conv3x3_bn(xpad_ref, sw_ref[...], ssc_ref[...], ssh_ref[...])
        y = jnp.maximum(y, 0.0)
        act_ref[:, 1:1 + H, 1:1 + W, :] = y.reshape(N, H, W, F)

    @pl.when(step > 0)
    def _res_block():
        scale = rsc_ref[...]                                   # (2, F)
        shift = rsh_ref[...]
        resid = act_ref[:, 1:1 + H, 1:1 + W, :].reshape(NHW, F)
        y1 = conv3x3_bn(act_ref, rw_ref[0], scale[0:1, :], shift[0:1, :])
        y1 = jnp.maximum(y1, 0.0)
        tmp_ref[:, 1:1 + H, 1:1 + W, :] = y1.reshape(N, H, W, F)
        y2 = conv3x3_bn(tmp_ref, rw_ref[1], scale[1:2, :], shift[1:2, :])
        y2 = jnp.maximum(y2 + resid, 0.0)
        act_ref[:, 1:1 + H, 1:1 + W, :] = y2.reshape(N, H, W, F)

    @pl.when(step == pl.num_programs(0) - 1)
    def _emit():
        out_ref[...] = act_ref[:, 1:1 + H, 1:1 + W, :].reshape(NHW, F)


def residual_tower(x_nhwc, params):
    """x_nhwc: (N, H, W, Cin_pad) f32 -> features (N*H*W, F) f32."""
    N, H, W, Cin = x_nhwc.shape
    F = params["stem_w"].shape[-1]
    R = params["res_w"].shape[0]
    assert R >= 1
    nine_cin = params["stem_w"].shape[0]

    return pl.pallas_call(
        _tower_kernel,
        out_shape=jax.ShapeDtypeStruct((N * H * W, F), jnp.float32),
        grid=(1 + R,),
        in_specs=[
            pl.BlockSpec((N, H, W, Cin), lambda s: (0, 0, 0, 0)),
            pl.BlockSpec((nine_cin, F), lambda s: (0, 0)),
            pl.BlockSpec((1, F), lambda s: (0, 0)),
            pl.BlockSpec((1, F), lambda s: (0, 0)),
            # per-res-block weights streamed (double-buffered) across the grid
            pl.BlockSpec((None, 2, 9 * F, F),
                         lambda s: (jnp.maximum(s - 1, 0), 0, 0, 0)),
            pl.BlockSpec((None, 2, F), lambda s: (jnp.maximum(s - 1, 0), 0, 0)),
            pl.BlockSpec((None, 2, F), lambda s: (jnp.maximum(s - 1, 0), 0, 0)),
        ],
        out_specs=pl.BlockSpec((N * H * W, F), lambda s: (0, 0)),
        scratch_shapes=[
            pltpu.VMEM((N, H + 2, W + 2, F), jnp.float32),      # resident activation
            pltpu.VMEM((N, H + 2, W + 2, F), jnp.float32),      # block intermediate
            pltpu.VMEM((N, H + 2, W + 2, Cin), jnp.float32),    # padded stem input
        ],
        compiler_params=pltpu.CompilerParams(
            dimension_semantics=("arbitrary",),                 # sequential over layers
            vmem_limit_bytes=48 * 1024 * 1024,
        ),
    )(x_nhwc, params["stem_w"], params["stem_scale"], params["stem_shift"],
      params["res_w"], params["res_scale"], params["res_shift"])


# ---------------------------------------------------------------------------
# Fused policy + value heads kernel (lane-dense 128-wide outputs)
# ---------------------------------------------------------------------------

def _heads_kernel(feat_ref, pw_ref, pb_ref, pfcw_ref, pfcb_ref,
                  vw_ref, vb_ref, v1w_ref, v1b_ref, v2w_ref, v2b_ref,
                  pi_ref, val_ref):
    NHW, _ = feat_ref.shape
    N, PAD = pi_ref.shape
    HW = NHW // N
    feat = feat_ref[...]                                              # (NHW, F) f32

    # ---- policy head: 1x1 conv (BN folded) + ReLU, FC (NCHW order folded), softmax
    q = jnp.dot(feat, pw_ref[...], preferred_element_type=jnp.float32) + pb_ref[...]
    q = jnp.maximum(q, 0.0).reshape(N, HW, 2)                         # (N, HW, 2)
    acc = jnp.zeros((N, PAD), jnp.float32)
    for c in range(2):                                                # channel-major flatten
        acc = acc + jnp.sum(q[:, :, c:c + 1] * pfcw_ref[c][None, :, :], axis=1)
    logits = acc + pfcb_ref[...]                                      # padded lanes = -1e30
    m = jnp.max(logits, axis=-1, keepdims=True)
    e = jnp.exp(logits - m)
    pi_ref[...] = e / jnp.sum(e, axis=-1, keepdims=True)

    # ---- value head: 1x1 conv + ReLU, FC+ReLU, FC+tanh -----------------------
    u = jnp.dot(feat, vw_ref[...], preferred_element_type=jnp.float32) + vb_ref[...]
    u = jnp.maximum(u, 0.0).reshape(N, HW, 1)
    h = jnp.sum(u * v1w_ref[...][None, :, :], axis=1) + v1b_ref[...]  # (N, VH)
    h = jnp.maximum(h, 0.0)
    val = jnp.tanh(jnp.dot(h, v2w_ref[...], preferred_element_type=jnp.float32)
                   + v2b_ref[...])                                    # (N, 128)
    val_ref[...] = val


def policy_value_heads(feat, params, batch):
    NHW, F = feat.shape
    HW = NHW // batch
    VH = params["val_fc1_w"].shape[-1]
    PAD = params["pol_fc_w"].shape[-1]
    return pl.pallas_call(
        _heads_kernel,
        out_shape=(jax.ShapeDtypeStruct((batch, PAD), jnp.float32),
                   jax.ShapeDtypeStruct((batch, PAD), jnp.float32)),
        in_specs=[
            pl.BlockSpec((NHW, F), lambda: (0, 0)),
            pl.BlockSpec((F, 2), lambda: (0, 0)),
            pl.BlockSpec((1, 2), lambda: (0, 0)),
            pl.BlockSpec((2, HW, PAD), lambda: (0, 0, 0)),
            pl.BlockSpec((1, PAD), lambda: (0, 0)),
            pl.BlockSpec((F, 1), lambda: (0, 0)),
            pl.BlockSpec((1, 1), lambda: (0, 0)),
            pl.BlockSpec((HW, VH), lambda: (0, 0)),
            pl.BlockSpec((1, VH), lambda: (0, 0)),
            pl.BlockSpec((VH, PAD), lambda: (0, 0)),
            pl.BlockSpec((1, PAD), lambda: (0, 0)),
        ],
        out_specs=(pl.BlockSpec((batch, PAD), lambda: (0, 0)),
                   pl.BlockSpec((batch, PAD), lambda: (0, 0))),
    )(feat, params["pol_w"], params["pol_b"], params["pol_fc_w"], params["pol_fc_b"],
      params["val_w"], params["val_b"], params["val_fc1_w"], params["val_fc1_b"],
      params["val_fc2_w"], params["val_fc2_b"])


# ---------------------------------------------------------------------------
# Parameters (deterministic synthetic init, eval-mode BN folded) and forward
# ---------------------------------------------------------------------------

def _round_up(v, m):
    return (v + m - 1) // m * m


def _fold_bn(gamma, beta, mean, var):
    scale = gamma / jnp.sqrt(var + EPS)
    shift = beta - mean * scale
    return scale, shift


def init_params(key, c_in, num_filters, num_res_blocks, h, w,
                policy_out=POLICY_OUT, value_hidden=32):
    assert num_res_blocks >= 1
    hw = h * w
    F = num_filters
    cin_pad = _round_up(c_in, LANE)                 # 486 -> 512 for the real model
    keys = iter(jax.random.split(key, 64 + 12 * num_res_blocks))

    def nrm(shape, s=0.05):
        return (s * jax.random.normal(next(keys), shape)).astype(jnp.float32)

    def bn(c):
        gamma = 1.0 + nrm((c,), 0.1)
        beta = nrm((c,), 0.1)
        mean = nrm((c,), 0.1)
        var = 1.0 + jnp.abs(nrm((c,), 0.1))
        return _fold_bn(gamma, beta, mean, var)

    p = {}
    # stem Conv3x3(c_in -> F, bias=False) + BN + ReLU.  Weight layout
    # (tap=dy*3+dx, cin_padded, cout) flattened to (9*cin_pad, F); a PyTorch
    # (F, c_in, 3, 3) weight would be permute(2, 3, 1, 0) + channel-pad + reshape.
    sw = jnp.pad(nrm((9, c_in, F)), ((0, 0), (0, cin_pad - c_in), (0, 0)))
    p["stem_w"] = sw.reshape(9 * cin_pad, F).astype(jnp.bfloat16)
    ssc, ssh = bn(F)
    p["stem_scale"], p["stem_shift"] = ssc[None, :], ssh[None, :]

    # residual tower: (R, 2, 9F, F) bf16 weights, (R, 2, F) f32 folded BN
    rw, rsc, rsh = [], [], []
    for _ in range(num_res_blocks):
        ws, scs, shs = [], [], []
        for _c in range(2):
            ws.append(nrm((9 * F, F)))
            s_, sh_ = bn(F)
            scs.append(s_)
            shs.append(sh_)
        rw.append(jnp.stack(ws))
        rsc.append(jnp.stack(scs))
        rsh.append(jnp.stack(shs))
    p["res_w"] = jnp.stack(rw).astype(jnp.bfloat16)
    p["res_scale"] = jnp.stack(rsc)
    p["res_shift"] = jnp.stack(rsh)

    # policy head: Conv1x1(F->2)+BN (scale folded into weight), ReLU,
    #              Flatten(NCHW), Linear(2*hw -> 73) consumed per-channel.
    pw = nrm((F, 2))
    psc, psh = bn(2)
    p["pol_w"] = pw * psc[None, :]
    p["pol_b"] = psh[None, :]
    fc = nrm((2 * hw, policy_out)).reshape(2, hw, policy_out)   # rows = c*hw + s
    p["pol_fc_w"] = jnp.pad(fc, ((0, 0), (0, 0), (0, LANE - policy_out)))
    fcb = nrm((policy_out,))
    p["pol_fc_b"] = jnp.pad(fcb, (0, LANE - policy_out),
                            constant_values=-1e30)[None, :]     # padded logits -> exp()=0

    # value head: Conv1x1(F->1)+BN, ReLU, Linear(hw->VH), ReLU, Linear(VH->1), Tanh
    vw = nrm((F, 1))
    vsc, vsh = bn(1)
    p["val_w"] = vw * vsc[None, :]
    p["val_b"] = vsh[None, :]
    p["val_fc1_w"] = nrm((hw, value_hidden))
    p["val_fc1_b"] = nrm((value_hidden,))[None, :]
    p["val_fc2_w"] = jnp.pad(nrm((value_hidden, 1)), ((0, 0), (0, LANE - 1)))
    p["val_fc2_b"] = jnp.pad(nrm((1,)), (0, LANE - 1))[None, :]
    return p


def chess_model_forward(params, x_nchw):
    """x_nchw: (N, C, H, W) float32 — same convention as the PyTorch module."""
    x = jnp.transpose(x_nchw, (0, 2, 3, 1)).astype(jnp.float32)    # NCHW -> NHWC
    N, H, W, Cin = x.shape
    cin_pad = params["stem_w"].shape[0] // 9
    if cin_pad != Cin:                                             # lane-align input channels
        x = jnp.pad(x, ((0, 0), (0, 0), (0, 0), (0, cin_pad - Cin)))

    feat = residual_tower(x, params)                               # (N*H*W, F) f32
    pi_pad, val_pad = policy_value_heads(feat, params, N)          # (N, 128) each
    return pi_pad[:, :POLICY_OUT], val_pad[:, :1]


# ---------------------------------------------------------------------------

if __name__ == "__main__":
    # Small shapes consistent with the module:
    #   input_shape=(C=16, 8, 8)   (module default: (486, 8, 8))
    #   num_filters=32             (module: 256)
    #   res blocks=3               (module: 19)
    #   value hidden=32            (module: 256)
    N, C, H, W = 2, 16, 8, 8
    NUM_FILTERS, NUM_RES_BLOCKS, VALUE_HIDDEN = 32, 3, 32

    k_param, k_x = jax.random.split(jax.random.PRNGKey(0))
    params = init_params(k_param, C, NUM_FILTERS, NUM_RES_BLOCKS, H, W,
                         value_hidden=VALUE_HIDDEN)
    x = jax.random.normal(k_x, (N, C, H, W), dtype=jnp.float32)

    fwd = jax.jit(chess_model_forward)
    pi, value = fwd(params, x)
    jax.block_until_ready((pi, value))

    assert pi.shape == (N, POLICY_OUT) and value.shape == (N, 1)
    assert bool(jnp.all(jnp.abs(jnp.sum(pi, axis=1) - 1.0) < 1e-4))
    assert bool(jnp.all(jnp.abs(value) <= 1.0))
    print("KERNEL_OK")
</pallas_src>

<mosaic_0001>
module attributes {stable_mosaic.version = 11 : i64} {
  func.func @_tower_kernel(%arg0: i32, %arg1: memref<2x8x8x128xf32, #tpu.memory_space<vmem>>, %arg2: memref<1152x32xbf16, #tpu.memory_space<vmem>>, %arg3: memref<1x32xf32, #tpu.memory_space<vmem>>, %arg4: memref<1x32xf32, #tpu.memory_space<vmem>>, %arg5: memref<1x2x288x32xbf16, #tpu.memory_space<vmem>>, %arg6: memref<1x2x32xf32, #tpu.memory_space<vmem>>, %arg7: memref<1x2x32xf32, #tpu.memory_space<vmem>>, %arg8: memref<128x32xf32, #tpu.memory_space<vmem>>, %arg9: memref<2x10x10x32xf32, #tpu.memory_space<vmem>>, %arg10: memref<2x10x10x32xf32, #tpu.memory_space<vmem>>, %arg11: memref<2x10x10x128xf32, #tpu.memory_space<vmem>>) attributes {dimension_semantics = [#tpu.dimension_semantics<arbitrary>], iteration_bounds = array<i64: 4>, scalar_prefetch = 0 : i64, scratch_operands = 3 : i64, tpu.core_type = #tpu.core_type<tc>, window_params = [{pipeline_mode = #tpu.pipeline_mode<synchronous>, transform_indices = @transform_0, window_bounds = array<i64: 2, 8, 8, 128>}, {pipeline_mode = #tpu.pipeline_mode<synchronous>, transform_indices = @transform_1, window_bounds = array<i64: 1152, 32>}, {pipeline_mode = #tpu.pipeline_mode<synchronous>, transform_indices = @transform_2, window_bounds = array<i64: 1, 32>}, {pipeline_mode = #tpu.pipeline_mode<synchronous>, transform_indices = @transform_3, window_bounds = array<i64: 1, 32>}, {transform_indices = @transform_4, window_bounds = array<i64: 1, 2, 288, 32>}, {transform_indices = @transform_5, window_bounds = array<i64: 1, 2, 32>}, {transform_indices = @transform_6, window_bounds = array<i64: 1, 2, 32>}, {pipeline_mode = #tpu.pipeline_mode<synchronous>, transform_indices = @transform_7, window_bounds = array<i64: 128, 32>}]} {
    %c0_i32 = arith.constant 0 : i32
    %0 = arith.cmpi eq, %arg0, %c0_i32 : i32
    %1 = arith.extui %0 : i1 to i32
    %c0_i32_0 = arith.constant 0 : i32
    %2 = arith.cmpi ne, %1, %c0_i32_0 : i32
    scf.if %2 {
      %cst = arith.constant 0.000000e+00 : f32
      %9 = vector.broadcast %cst : f32 to vector<2x10x10x32xf32>
      %c0 = arith.constant 0 : index
      %c0_4 = arith.constant 0 : index
      %c0_5 = arith.constant 0 : index
      %c0_6 = arith.constant 0 : index
      %10 = vector.load %arg9[%c0, %c0_4, %c0_5, %c0_6] : memref<2x10x10x32xf32, #tpu.memory_space<vmem>>, vector<2x10x10x32xf32>
      tpu.vector_store %arg9[%c0, %c0_4, %c0_5, %c0_6], %9 {strides = array<i32>} : memref<2x10x10x32xf32, #tpu.memory_space<vmem>>, vector<2x10x10x32xf32>,
      %cst_7 = arith.constant 0.000000e+00 : f32
      %11 = vector.broadcast %cst_7 : f32 to vector<2x10x10x32xf32>
      %c0_8 = arith.constant 0 : index
      %c0_9 = arith.constant 0 : index
      %c0_10 = arith.constant 0 : index
      %c0_11 = arith.constant 0 : index
      %12 = vector.load %arg10[%c0_8, %c0_9, %c0_10, %c0_11] : memref<2x10x10x32xf32, #tpu.memory_space<vmem>>, vector<2x10x10x32xf32>
      tpu.vector_store %arg10[%c0_8, %c0_9, %c0_10, %c0_11], %11 {strides = array<i32>} : memref<2x10x10x32xf32, #tpu.memory_space<vmem>>, vector<2x10x10x32xf32>,
      %cst_12 = arith.constant 0.000000e+00 : f32
      %13 = vector.broadcast %cst_12 : f32 to vector<2x10x10x128xf32>
      %c0_13 = arith.constant 0 : index
      %c0_14 = arith.constant 0 : index
      %c0_15 = arith.constant 0 : index
      %c0_16 = arith.constant 0 : index
      %14 = vector.load %arg11[%c0_13, %c0_14, %c0_15, %c0_16] : memref<2x10x10x128xf32, #tpu.memory_space<vmem>>, vector<2x10x10x128xf32>
      tpu.vector_store %arg11[%c0_13, %c0_14, %c0_15, %c0_16], %13 {strides = array<i32>} : memref<2x10x10x128xf32, #tpu.memory_space<vmem>>, vector<2x10x10x128xf32>,
      %c0_17 = arith.constant 0 : index
      %c0_18 = arith.constant 0 : index
      %c0_19 = arith.constant 0 : index
      %c0_20 = arith.constant 0 : index
      %15 = vector.load %arg1[%c0_17, %c0_18, %c0_19, %c0_20] : memref<2x8x8x128xf32, #tpu.memory_space<vmem>>, vector<2x8x8x128xf32>
      %c0_21 = arith.constant 0 : index
      %c1 = arith.constant 1 : index
      %c1_22 = arith.constant 1 : index
      %c0_23 = arith.constant 0 : index
      %16 = vector.load %arg11[%c0_21, %c1, %c1_22, %c0_23] : memref<2x10x10x128xf32, #tpu.memory_space<vmem>>, vector<2x8x8x128xf32>
      tpu.vector_store %arg11[%c0_21, %c1, %c1_22, %c0_23], %15 {strides = array<i32>} : memref<2x10x10x128xf32, #tpu.memory_space<vmem>>, vector<2x8x8x128xf32>,
      %c0_24 = arith.constant 0 : index
      %c0_25 = arith.constant 0 : index
      %17 = vector.load %arg2[%c0_24, %c0_25] : memref<1152x32xbf16, #tpu.memory_space<vmem>>, vector<1152x32xbf16>
      %c0_26 = arith.constant 0 : index
      %c0_27 = arith.constant 0 : index
      %18 = vector.load %arg3[%c0_26, %c0_27] : memref<1x32xf32, #tpu.memory_space<vmem>>, vector<1x32xf32>
      %c0_28 = arith.constant 0 : index
      %c0_29 = arith.constant 0 : index
      %19 = vector.load %arg4[%c0_28, %c0_29] : memref<1x32xf32, #tpu.memory_space<vmem>>, vector<1x32xf32>
      %c0_30 = arith.constant 0 : index
      %c0_31 = arith.constant 0 : index
      %c0_32 = arith.constant 0 : index
      %c0_33 = arith.constant 0 : index
      %20 = vector.load %arg11[%c0_30, %c0_31, %c0_32, %c0_33] : memref<2x10x10x128xf32, #tpu.memory_space<vmem>>, vector<2x10x10x128xf32>
      %21 = vector.extract_strided_slice %20 {offsets = [0, 0, 0, 0], sizes = [2, 8, 8, 128], strides = [1, 1, 1, 1]} : vector<2x10x10x128xf32> to vector<2x8x8x128xf32>
      %22 = vector.shape_cast %21 : vector<2x8x8x128xf32> to vector<128x128xf32>
      %23 = vector.extract_strided_slice %20 {offsets = [0, 0, 1, 0], sizes = [2, 8, 8, 128], strides = [1, 1, 1, 1]} : vector<2x10x10x128xf32> to vector<2x8x8x128xf32>
      %24 = vector.shape_cast %23 : vector<2x8x8x128xf32> to vector<128x128xf32>
      %25 = vector.extract_strided_slice %20 {offsets = [0, 0, 2, 0], sizes = [2, 8, 8, 128], strides = [1, 1, 1, 1]} : vector<2x10x10x128xf32> to vector<2x8x8x128xf32>
      %26 = vector.shape_cast %25 : vector<2x8x8x128xf32> to vector<128x128xf32>
      %27 = vector.extract_strided_slice %20 {offsets = [0, 1, 0, 0], sizes = [2, 8, 8, 128], strides = [1, 1, 1, 1]} : vector<2x10x10x128xf32> to vector<2x8x8x128xf32>
      %28 = vector.shape_cast %27 : vector<2x8x8x128xf32> to vector<128x128xf32>
      %29 = vector.extract_strided_slice %20 {offsets = [0, 1, 1, 0], sizes = [2, 8, 8, 128], strides = [1, 1, 1, 1]} : vector<2x10x10x128xf32> to vector<2x8x8x128xf32>
      %30 = vector.shape_cast %29 : vector<2x8x8x128xf32> to vector<128x128xf32>
      %31 = vector.extract_strided_slice %20 {offsets = [0, 1, 2, 0], sizes = [2, 8, 8, 128], strides = [1, 1, 1, 1]} : vector<2x10x10x128xf32> to vector<2x8x8x128xf32>
      %32 = vector.shape_cast %31 : vector<2x8x8x128xf32> to vector<128x128xf32>
      %33 = vector.extract_strided_slice %20 {offsets = [0, 2, 0, 0], sizes = [2, 8, 8, 128], strides = [1, 1, 1, 1]} : vector<2x10x10x128xf32> to vector<2x8x8x128xf32>
      %34 = vector.shape_cast %33 : vector<2x8x8x128xf32> to vector<128x128xf32>
      %35 = vector.extract_strided_slice %20 {offsets = [0, 2, 1, 0], sizes = [2, 8, 8, 128], strides = [1, 1, 1, 1]} : vector<2x10x10x128xf32> to vector<2x8x8x128xf32>
      %36 = vector.shape_cast %35 : vector<2x8x8x128xf32> to vector<128x128xf32>
      %37 = vector.extract_strided_slice %20 {offsets = [0, 2, 2, 0], sizes = [2, 8, 8, 128], strides = [1, 1, 1, 1]} : vector<2x10x10x128xf32> to vector<2x8x8x128xf32>
      %38 = vector.shape_cast %37 : vector<2x8x8x128xf32> to vector<128x128xf32>
      %39 = tpu.concatenate %22, %24, %26, %28, %30, %32, %34, %36, %38 in 1 : vector<128x128xf32>, vector<128x128xf32>, vector<128x128xf32>, vector<128x128xf32>, vector<128x128xf32>, vector<128x128xf32>, vector<128x128xf32>, vector<128x128xf32>, vector<128x128xf32> -> vector<128x1152xf32>
      %40 = arith.truncf %39 : vector<128x1152xf32> to vector<128x1152xbf16>
      %cst_34 = arith.constant dense<0.000000e+00> : vector<128x32xf32>
      %41 = tpu.matmul %40, %17, %cst_34 {dimension_numbers = #tpu.dot_dimension_numbers<[1], [0], [0], [1], [0, 0, 1, 1], [], []>} : vector<128x1152xbf16>, vector<1152x32xbf16>, vector<128x32xf32> -> vector<128x32xf32>
      %42 = vector.broadcast %18 : vector<1x32xf32> to vector<128x32xf32>
      %43 = arith.mulf %41, %42 : vector<128x32xf32>
      %44 = vector.broadcast %19 : vector<1x32xf32> to vector<128x32xf32>
      %45 = arith.addf %43, %44 : vector<128x32xf32>
      %cst_35 = arith.constant 0.000000e+00 : f32
      %46 = vector.broadcast %cst_35 : f32 to vector<128x32xf32>
      %47 = arith.maximumf %45, %46 : vector<128x32xf32>
      %48 = vector.shape_cast %47 : vector<128x32xf32> to vector<2x8x8x32xf32>
      %c0_36 = arith.constant 0 : index
      %c1_37 = arith.constant 1 : index
      %c1_38 = arith.constant 1 : index
      %c0_39 = arith.constant 0 : index
      %49 = vector.load %arg9[%c0_36, %c1_37, %c1_38, %c0_39] : memref<2x10x10x32xf32, #tpu.memory_space<vmem>>, vector<2x8x8x32xf32>
      tpu.vector_store %arg9[%c0_36, %c1_37, %c1_38, %c0_39], %48 {strides = array<i32>} : memref<2x10x10x32xf32, #tpu.memory_space<vmem>>, vector<2x8x8x32xf32>,
    } else {
    }
    %c0_i32_1 = arith.constant 0 : i32
    %3 = arith.cmpi sgt, %arg0, %c0_i32_1 : i32
    %4 = arith.extui %3 : i1 to i32
    %c0_i32_2 = arith.constant 0 : i32
    %5 = arith.cmpi ne, %4, %c0_i32_2 : i32
    scf.if %5 {
      %c0 = arith.constant 0 : index
      %c0_4 = arith.constant 0 : index
      %c0_5 = arith.constant 0 : index
      %9 = vector.load %arg6[%c0, %c0_4, %c0_5] : memref<1x2x32xf32, #tpu.memory_space<vmem>>, vector<1x2x32xf32>
      %10 = vector.shape_cast %9 : vector<1x2x32xf32> to vector<2x32xf32>
      %c0_6 = arith.constant 0 : index
      %c0_7 = arith.constant 0 : index
      %c0_8 = arith.constant 0 : index
      %11 = vector.load %arg7[%c0_6, %c0_7, %c0_8] : memref<1x2x32xf32, #tpu.memory_space<vmem>>, vector<1x2x32xf32>
      %12 = vector.shape_cast %11 : vector<1x2x32xf32> to vector<2x32xf32>
      %c0_9 = arith.constant 0 : index
      %c1 = arith.constant 1 : index
      %c1_10 = arith.constant 1 : index
      %c0_11 = arith.constant 0 : index
      %13 = vector.load %arg9[%c0_9, %c1, %c1_10, %c0_11] : memref<2x10x10x32xf32, #tpu.memory_space<vmem>>, vector<2x8x8x32xf32>
      %14 = vector.shape_cast %13 : vector<2x8x8x32xf32> to vector<128x32xf32>
      %c0_12 = arith.constant 0 : index
      %c0_13 = arith.constant 0 : index
      %c0_14 = arith.constant 0 : index
      %c0_15 = arith.constant 0 : index
      %15 = vector.load %arg5[%c0_12, %c0_13, %c0_14, %c0_15] : memref<1x2x288x32xbf16, #tpu.memory_space<vmem>>, vector<1x1x288x32xbf16>
      %16 = vector.shape_cast %15 : vector<1x1x288x32xbf16> to vector<288x32xbf16>
      %17 = vector.extract_strided_slice %10 {offsets = [0, 0], sizes = [1, 32], strides = [1, 1]} : vector<2x32xf32> to vector<1x32xf32>
      %18 = vector.extract_strided_slice %12 {offsets = [0, 0], sizes = [1, 32], strides = [1, 1]} : vector<2x32xf32> to vector<1x32xf32>
      %c0_16 = arith.constant 0 : index
      %c0_17 = arith.constant 0 : index
      %c0_18 = arith.constant 0 : index
      %c0_19 = arith.constant 0 : index
      %19 = vector.load %arg9[%c0_16, %c0_17, %c0_18, %c0_19] : memref<2x10x10x32xf32, #tpu.memory_space<vmem>>, vector<2x10x10x32xf32>
      %20 = vector.extract_strided_slice %19 {offsets = [0, 0, 0, 0], sizes = [2, 8, 8, 32], strides = [1, 1, 1, 1]} : vector<2x10x10x32xf32> to vector<2x8x8x32xf32>
      %21 = vector.shape_cast %20 : vector<2x8x8x32xf32> to vector<128x32xf32>
      %22 = vector.extract_strided_slice %19 {offsets = [0, 0, 1, 0], sizes = [2, 8, 8, 32], strides = [1, 1, 1, 1]} : vector<2x10x10x32xf32> to vector<2x8x8x32xf32>
      %23 = vector.shape_cast %22 : vector<2x8x8x32xf32> to vector<128x32xf32>
      %24 = vector.extract_strided_slice %19 {offsets = [0, 0, 2, 0], sizes = [2, 8, 8, 32], strides = [1, 1, 1, 1]} : vector<2x10x10x32xf32> to vector<2x8x8x32xf32>
      %25 = vector.shape_cast %24 : vector<2x8x8x32xf32> to vector<128x32xf32>
      %26 = vector.extract_strided_slice %19 {offsets = [0, 1, 0, 0], sizes = [2, 8, 8, 32], strides = [1, 1, 1, 1]} : vector<2x10x10x32xf32> to vector<2x8x8x32xf32>
      %27 = vector.shape_cast %26 : vector<2x8x8x32xf32> to vector<128x32xf32>
      %28 = vector.extract_strided_slice %19 {offsets = [0, 1, 1, 0], sizes = [2, 8, 8, 32], strides = [1, 1, 1, 1]} : vector<2x10x10x32xf32> to vector<2x8x8x32xf32>
      %29 = vector.shape_cast %28 : vector<2x8x8x32xf32> to vector<128x32xf32>
      %30 = vector.extract_strided_slice %19 {offsets = [0, 1, 2, 0], sizes = [2, 8, 8, 32], strides = [1, 1, 1, 1]} : vector<2x10x10x32xf32> to vector<2x8x8x32xf32>
      %31 = vector.shape_cast %30 : vector<2x8x8x32xf32> to vector<128x32xf32>
      %32 = vector.extract_strided_slice %19 {offsets = [0, 2, 0, 0], sizes = [2, 8, 8, 32], strides = [1, 1, 1, 1]} : vector<2x10x10x32xf32> to vector<2x8x8x32xf32>
      %33 = vector.shape_cast %32 : vector<2x8x8x32xf32> to vector<128x32xf32>
      %34 = vector.extract_strided_slice %19 {offsets = [0, 2, 1, 0], sizes = [2, 8, 8, 32], strides = [1, 1, 1, 1]} : vector<2x10x10x32xf32> to vector<2x8x8x32xf32>
      %35 = vector.shape_cast %34 : vector<2x8x8x32xf32> to vector<128x32xf32>
      %36 = vector.extract_strided_slice %19 {offsets = [0, 2, 2, 0], sizes = [2, 8, 8, 32], strides = [1, 1, 1, 1]} : vector<2x10x10x32xf32> to vector<2x8x8x32xf32>
      %37 = vector.shape_cast %36 : vector<2x8x8x32xf32> to vector<128x32xf32>
      %38 = tpu.concatenate %21, %23, %25, %27, %29, %31, %33, %35, %37 in 1 : vector<128x32xf32>, vector<128x32xf32>, vector<128x32xf32>, vector<128x32xf32>, vector<128x32xf32>, vector<128x32xf32>, vector<128x32xf32>, vector<128x32xf32>, vector<128x32xf32> -> vector<128x288xf32>
      %39 = arith.truncf %38 : vector<128x288xf32> to vector<128x288xbf16>
      %cst = arith.constant dense<0.000000e+00> : vector<128x32xf32>
      %40 = tpu.matmul %39, %16, %cst {dimension_numbers = #tpu.dot_dimension_numbers<[1], [0], [0], [1], [0, 0, 1, 1], [], []>} : vector<128x288xbf16>, vector<288x32xbf16>, vector<128x32xf32> -> vector<128x32xf32>
      %41 = vector.broadcast %17 : vector<1x32xf32> to vector<128x32xf32>
      %42 = arith.mulf %40, %41 : vector<128x32xf32>
      %43 = vector.broadcast %18 : vector<1x32xf32> to vector<128x32xf32>
      %44 = arith.addf %42, %43 : vector<128x32xf32>
      %cst_20 = arith.constant 0.000000e+00 : f32
      %45 = vector.broadcast %cst_20 : f32 to vector<128x32xf32>
      %46 = arith.maximumf %44, %45 : vector<128x32xf32>
      %47 = vector.shape_cast %46 : vector<128x32xf32> to vector<2x8x8x32xf32>
      %c0_21 = arith.constant 0 : index
      %c1_22 = arith.constant 1 : index
      %c1_23 = arith.constant 1 : index
      %c0_24 = arith.constant 0 : index
      %48 = vector.load %arg10[%c0_21, %c1_22, %c1_23, %c0_24] : memref<2x10x10x32xf32, #tpu.memory_space<vmem>>, vector<2x8x8x32xf32>
      tpu.vector_store %arg10[%c0_21, %c1_22, %c1_23, %c0_24], %47 {strides = array<i32>} : memref<2x10x10x32xf32, #tpu.memory_space<vmem>>, vector<2x8x8x32xf32>,
      %c0_25 = arith.constant 0 : index
      %c1_26 = arith.constant 1 : index
      %c0_27 = arith.constant 0 : index
      %c0_28 = arith.constant 0 : index
      %49 = vector.load %arg5[%c0_25, %c1_26, %c0_27, %c0_28] : memref<1x2x288x32xbf16, #tpu.memory_space<vmem>>, vector<1x1x288x32xbf16>
      %50 = vector.shape_cast %49 : vector<1x1x288x32xbf16> to vector<288x32xbf16>
      %51 = vector.extract_strided_slice %10 {offsets = [1, 0], sizes = [1, 32], strides = [1, 1]} : vector<2x32xf32> to vector<1x32xf32>
      %52 = vector.extract_strided_slice %12 {offsets = [1, 0], sizes = [1, 32], strides = [1, 1]} : vector<2x32xf32> to vector<1x32xf32>
      %c0_29 = arith.constant 0 : index
      %c0_30 = arith.constant 0 : index
      %c0_31 = arith.constant 0 : index
      %c0_32 = arith.constant 0 : index
      %53 = vector.load %arg10[%c0_29, %c0_30, %c0_31, %c0_32] : memref<2x10x10x32xf32, #tpu.memory_space<vmem>>, vector<2x10x10x32xf32>
      %54 = vector.extract_strided_slice %53 {offsets = [0, 0, 0, 0], sizes = [2, 8, 8, 32], strides = [1, 1, 1, 1]} : vector<2x10x10x32xf32> to vector<2x8x8x32xf32>
      %55 = vector.shape_cast %54 : vector<2x8x8x32xf32> to vector<128x32xf32>
      %56 = vector.extract_strided_slice %53 {offsets = [0, 0, 1, 0], sizes = [2, 8, 8, 32], strides = [1, 1, 1, 1]} : vector<2x10x10x32xf32> to vector<2x8x8x32xf32>
      %57 = vector.shape_cast %56 : vector<2x8x8x32xf32> to vector<128x32xf32>
      %58 = vector.extract_strided_slice %53 {offsets = [0, 0, 2, 0], sizes = [2, 8, 8, 32], strides = [1, 1, 1, 1]} : vector<2x10x10x32xf32> to vector<2x8x8x32xf32>
      %59 = vector.shape_cast %58 : vector<2x8x8x32xf32> to vector<128x32xf32>
      %60 = vector.extract_strided_slice %53 {offsets = [0, 1, 0, 0], sizes = [2, 8, 8, 32], strides = [1, 1, 1, 1]} : vector<2x10x10x32xf32> to vector<2x8x8x32xf32>
      %61 = vector.shape_cast %60 : vector<2x8x8x32xf32> to vector<128x32xf32>
      %62 = vector.extract_strided_slice %53 {offsets = [0, 1, 1, 0], sizes = [2, 8, 8, 32], strides = [1, 1, 1, 1]} : vector<2x10x10x32xf32> to vector<2x8x8x32xf32>
      %63 = vector.shape_cast %62 : vector<2x8x8x32xf32> to vector<128x32xf32>
      %64 = vector.extract_strided_slice %53 {offsets = [0, 1, 2, 0], sizes = [2, 8, 8, 32], strides = [1, 1, 1, 1]} : vector<2x10x10x32xf32> to vector<2x8x8x32xf32>
      %65 = vector.shape_cast %64 : vector<2x8x8x32xf32> to vector<128x32xf32>
      %66 = vector.extract_strided_slice %53 {offsets = [0, 2, 0, 0], sizes = [2, 8, 8, 32], strides = [1, 1, 1, 1]} : vector<2x10x10x32xf32> to vector<2x8x8x32xf32>
      %67 = vector.shape_cast %66 : vector<2x8x8x32xf32> to vector<128x32xf32>
      %68 = vector.extract_strided_slice %53 {offsets = [0, 2, 1, 0], sizes = [2, 8, 8, 32], strides = [1, 1, 1, 1]} : vector<2x10x10x32xf32> to vector<2x8x8x32xf32>
      %69 = vector.shape_cast %68 : vector<2x8x8x32xf32> to vector<128x32xf32>
      %70 = vector.extract_strided_slice %53 {offsets = [0, 2, 2, 0], sizes = [2, 8, 8, 32], strides = [1, 1, 1, 1]} : vector<2x10x10x32xf32> to vector<2x8x8x32xf32>
      %71 = vector.shape_cast %70 : vector<2x8x8x32xf32> to vector<128x32xf32>
      %72 = tpu.concatenate %55, %57, %59, %61, %63, %65, %67, %69, %71 in 1 : vector<128x32xf32>, vector<128x32xf32>, vector<128x32xf32>, vector<128x32xf32>, vector<128x32xf32>, vector<128x32xf32>, vector<128x32xf32>, vector<128x32xf32>, vector<128x32xf32> -> vector<128x288xf32>
      %73 = arith.truncf %72 : vector<128x288xf32> to vector<128x288xbf16>
      %cst_33 = arith.constant dense<0.000000e+00> : vector<128x32xf32>
      %74 = tpu.matmul %73, %50, %cst_33 {dimension_numbers = #tpu.dot_dimension_numbers<[1], [0], [0], [1], [0, 0, 1, 1], [], []>} : vector<128x288xbf16>, vector<288x32xbf16>, vector<128x32xf32> -> vector<128x32xf32>
      %75 = vector.broadcast %51 : vector<1x32xf32> to vector<128x32xf32>
      %76 = arith.mulf %74, %75 : vector<128x32xf32>
      %77 = vector.broadcast %52 : vector<1x32xf32> to vector<128x32xf32>
      %78 = arith.addf %76, %77 : vector<128x32xf32>
      %79 = arith.addf %78, %14 : vector<128x32xf32>
      %cst_34 = arith.constant 0.000000e+00 : f32
      %80 = vector.broadcast %cst_34 : f32 to vector<128x32xf32>
      %81 = arith.maximumf %79, %80 : vector<128x32xf32>
      %82 = vector.shape_cast %81 : vector<128x32xf32> to vector<2x8x8x32xf32>
      %c0_35 = arith.constant 0 : index
      %c1_36 = arith.constant 1 : index
      %c1_37 = arith.constant 1 : index
      %c0_38 = arith.constant 0 : index
      %83 = vector.load %arg9[%c0_35, %c1_36, %c1_37, %c0_38] : memref<2x10x10x32xf32, #tpu.memory_space<vmem>>, vector<2x8x8x32xf32>
      tpu.vector_store %arg9[%c0_35, %c1_36, %c1_37, %c0_38], %82 {strides = array<i32>} : memref<2x10x10x32xf32, #tpu.memory_space<vmem>>, vector<2x8x8x32xf32>,
    } else {
    }
    %c3_i32 = arith.constant 3 : i32
    %6 = arith.cmpi eq, %arg0, %c3_i32 : i32
    %7 = arith.extui %6 : i1 to i32
    %c0_i32_3 = arith.constant 0 : i32
    %8 = arith.cmpi ne, %7, %c0_i32_3 : i32
    scf.if %8 {
      %c0 = arith.constant 0 : index
      %c1 = arith.constant 1 : index
      %c1_4 = arith.constant 1 : index
      %c0_5 = arith.constant 0 : index
      %9 = vector.load %arg9[%c0, %c1, %c1_4, %c0_5] : memref<2x10x10x32xf32, #tpu.memory_space<vmem>>, vector<2x8x8x32xf32>
      %10 = vector.shape_cast %9 : vector<2x8x8x32xf32> to vector<128x32xf32>
      %c0_6 = arith.constant 0 : index
      %c0_7 = arith.constant 0 : index
      %11 = vector.load %arg8[%c0_6, %c0_7] : memref<128x32xf32, #tpu.memory_space<vmem>>, vector<128x32xf32>
      tpu.vector_store %arg8[%c0_6, %c0_7], %10 {strides = array<i32>} : memref<128x32xf32, #tpu.memory_space<vmem>>, vector<128x32xf32>,
    } else {
    }
    return
  }
  func.func @transform_0(%arg0: i32) -> (i32, i32, i32, i32) {
    %c0_i32 = arith.constant 0 : i32
    %c0_i32_0 = arith.constant 0 : i32
    %c0_i32_1 = arith.constant 0 : i32
    %c0_i32_2 = arith.constant 0 : i32
    %c0_i32_3 = arith.constant 0 : i32
    return %c0_i32, %c0_i32_0, %c0_i32_1, %c0_i32_2 : i32, i32, i32, i32
  }
  func.func @transform_1(%arg0: i32) -> (i32, i32) {
    %c0_i32 = arith.constant 0 : i32
    %c0_i32_0 = arith.constant 0 : i32
    %c0_i32_1 = arith.constant 0 : i32
    return %c0_i32, %c0_i32_0 : i32, i32
  }
  func.func @transform_2(%arg0: i32) -> (i32, i32) {
    %c0_i32 = arith.constant 0 : i32
    %c0_i32_0 = arith.constant 0 : i32
    %c0_i32_1 = arith.constant 0 : i32
    return %c0_i32, %c0_i32_0 : i32, i32
  }
  func.func @transform_3(%arg0: i32) -> (i32, i32) {
    %c0_i32 = arith.constant 0 : i32
    %c0_i32_0 = arith.constant 0 : i32
    %c0_i32_1 = arith.constant 0 : i32
    return %c0_i32, %c0_i32_0 : i32, i32
  }
  func.func @transform_4(%arg0: i32) -> (i32, i32, i32, i32) {
    %c1_i32 = arith.constant 1 : i32
    %0 = arith.subi %arg0, %c1_i32 : i32
    %c0_i32 = arith.constant 0 : i32
    %1 = arith.maxsi %0, %c0_i32 : i32
    %c0_i32_0 = arith.constant 0 : i32
    %c0_i32_1 = arith.constant 0 : i32
    %c0_i32_2 = arith.constant 0 : i32
    %c0_i32_3 = arith.constant 0 : i32
    return %1, %c0_i32_0, %c0_i32_1, %c0_i32_2 : i32, i32, i32, i32
  }
  func.func @transform_5(%arg0: i32) -> (i32, i32, i32) {
    %c1_i32 = arith.constant 1 : i32
    %0 = arith.subi %arg0, %c1_i32 : i32
    %c0_i32 = arith.constant 0 : i32
    %1 = arith.maxsi %0, %c0_i32 : i32
    %c0_i32_0 = arith.constant 0 : i32
    %c0_i32_1 = arith.constant 0 : i32
    %c0_i32_2 = arith.constant 0 : i32
    return %1, %c0_i32_0, %c0_i32_1 : i32, i32, i32
  }
  func.func @transform_6(%arg0: i32) -> (i32, i32, i32) {
    %c1_i32 = arith.constant 1 : i32
    %0 = arith.subi %arg0, %c1_i32 : i32
    %c0_i32 = arith.constant 0 : i32
    %1 = arith.maxsi %0, %c0_i32 : i32
    %c0_i32_0 = arith.constant 0 : i32
    %c0_i32_1 = arith.constant 0 : i32
    %c0_i32_2 = arith.constant 0 : i32
    return %1, %c0_i32_0, %c0_i32_1 : i32, i32, i32
  }
  func.func @transform_7(%arg0: i32) -> (i32, i32) {
    %c0_i32 = arith.constant 0 : i32
    %c0_i32_0 = arith.constant 0 : i32
    %c0_i32_1 = arith.constant 0 : i32
    return %c0_i32, %c0_i32_0 : i32, i32
  }
}

module attributes {stable_mosaic.version = 11 : i64} {
  func.func @_heads_kernel(%arg0: memref<128x32xf32, #tpu.memory_space<vmem>>, %arg1: memref<32x2xf32, #tpu.memory_space<vmem>>, %arg2: memref<1x2xf32, #tpu.memory_space<vmem>>, %arg3: memref<2x64x128xf32, #tpu.memory_space<vmem>>, %arg4: memref<1x128xf32, #tpu.memory_space<vmem>>, %arg5: memref<32x1xf32, #tpu.memory_space<vmem>>, %arg6: memref<1x1xf32, #tpu.memory_space<vmem>>, %arg7: memref<64x32xf32, #tpu.memory_space<vmem>>, %arg8: memref<1x32xf32, #tpu.memory_space<vmem>>, %arg9: memref<32x128xf32, #tpu.memory_space<vmem>>, %arg10: memref<1x128xf32, #tpu.memory_space<vmem>>, %arg11: memref<2x128xf32, #tpu.memory_space<vmem>>, %arg12: memref<2x128xf32, #tpu.memory_space<vmem>>) attributes {dimension_semantics = [], scalar_prefetch = 0 : i64, scratch_operands = 0 : i64, tpu.core_type = #tpu.core_type<tc>} {
    %c0 = arith.constant 0 : index
    %c0_0 = arith.constant 0 : index
    %0 = vector.load %arg0[%c0, %c0_0] : memref<128x32xf32, #tpu.memory_space<vmem>>, vector<128x32xf32>
    %c0_1 = arith.constant 0 : index
    %c0_2 = arith.constant 0 : index
    %1 = vector.load %arg1[%c0_1, %c0_2] : memref<32x2xf32, #tpu.memory_space<vmem>>, vector<32x2xf32>
    %cst = arith.constant dense<0.000000e+00> : vector<128x2xf32>
    %2 = tpu.matmul %0, %1, %cst {dimension_numbers = #tpu.dot_dimension_numbers<[1], [0], [0], [1], [0, 0, 1, 1], [], []>} : vector<128x32xf32>, vector<32x2xf32>, vector<128x2xf32> -> vector<128x2xf32>
    %c0_3 = arith.constant 0 : index
    %c0_4 = arith.constant 0 : index
    %3 = vector.load %arg2[%c0_3, %c0_4] : memref<1x2xf32, #tpu.memory_space<vmem>>, vector<1x2xf32>
    %4 = vector.broadcast %3 : vector<1x2xf32> to vector<128x2xf32>
    %5 = arith.addf %2, %4 : vector<128x2xf32>
    %cst_5 = arith.constant 0.000000e+00 : f32
    %6 = vector.broadcast %cst_5 : f32 to vector<128x2xf32>
    %7 = arith.maximumf %5, %6 : vector<128x2xf32>
    %8 = vector.shape_cast %7 : vector<128x2xf32> to vector<2x64x2xf32>
    %cst_6 = arith.constant 0.000000e+00 : f32
    %9 = vector.broadcast %cst_6 : f32 to vector<2x128xf32>
    %10 = vector.extract_strided_slice %8 {offsets = [0, 0, 0], sizes = [2, 64, 1], strides = [1, 1, 1]} : vector<2x64x2xf32> to vector<2x64x1xf32>
    %c0_7 = arith.constant 0 : index
    %c0_8 = arith.constant 0 : index
    %c0_9 = arith.constant 0 : index
    %11 = vector.load %arg3[%c0_7, %c0_8, %c0_9] : memref<2x64x128xf32, #tpu.memory_space<vmem>>, vector<1x64x128xf32>
    %12 = vector.shape_cast %11 : vector<1x64x128xf32> to vector<64x128xf32>
    %13 = vector.shape_cast %12 : vector<64x128xf32> to vector<1x64x128xf32>
    %14 = vector.broadcast %10 : vector<2x64x1xf32> to vector<2x64x128xf32>
    %15 = vector.broadcast %13 : vector<1x64x128xf32> to vector<2x64x128xf32>
    %16 = arith.mulf %14, %15 : vector<2x64x128xf32>
    %cst_10 = arith.constant dense<0.000000e+00> : vector<2x128xf32>
    %17 = vector.multi_reduction <add>, %16, %cst_10 [1] : vector<2x64x128xf32> to vector<2x128xf32>
    %18 = arith.addf %9, %17 : vector<2x128xf32>
    %19 = vector.extract_strided_slice %8 {offsets = [0, 0, 1], sizes = [2, 64, 1], strides = [1, 1, 1]} : vector<2x64x2xf32> to vector<2x64x1xf32>
    %c1 = arith.constant 1 : index
    %c0_11 = arith.constant 0 : index
    %c0_12 = arith.constant 0 : index
    %20 = vector.load %arg3[%c1, %c0_11, %c0_12] : memref<2x64x128xf32, #tpu.memory_space<vmem>>, vector<1x64x128xf32>
    %21 = vector.shape_cast %20 : vector<1x64x128xf32> to vector<64x128xf32>
    %22 = vector.shape_cast %21 : vector<64x128xf32> to vector<1x64x128xf32>
    %23 = vector.broadcast %19 : vector<2x64x1xf32> to vector<2x64x128xf32>
    %24 = vector.broadcast %22 : vector<1x64x128xf32> to vector<2x64x128xf32>
    %25 = arith.mulf %23, %24 : vector<2x64x128xf32>
    %cst_13 = arith.constant dense<0.000000e+00> : vector<2x128xf32>
    %26 = vector.multi_reduction <add>, %25, %cst_13 [1] : vector<2x64x128xf32> to vector<2x128xf32>
    %27 = arith.addf %18, %26 : vector<2x128xf32>
    %c0_14 = arith.constant 0 : index
    %c0_15 = arith.constant 0 : index
    %28 = vector.load %arg4[%c0_14, %c0_15] : memref<1x128xf32, #tpu.memory_space<vmem>>, vector<1x128xf32>
    %29 = vector.broadcast %28 : vector<1x128xf32> to vector<2x128xf32>
    %30 = arith.addf %27, %29 : vector<2x128xf32>
    %cst_16 = arith.constant dense<0xFF800000> : vector<2xf32>
    %31 = vector.multi_reduction <maximumf>, %30, %cst_16 [1] : vector<2x128xf32> to vector<2xf32>
    %32 = vector.shape_cast %31 : vector<2xf32> to vector<2x1xf32>
    %33 = vector.broadcast %32 : vector<2x1xf32> to vector<2x128xf32>
    %34 = arith.subf %30, %33 : vector<2x128xf32>
    %35 = math.exp %34 : vector<2x128xf32>
    %cst_17 = arith.constant dense<0.000000e+00> : vector<2xf32>
    %36 = vector.multi_reduction <add>, %35, %cst_17 [1] : vector<2x128xf32> to vector<2xf32>
    %37 = vector.shape_cast %36 : vector<2xf32> to vector<2x1xf32>
    %38 = vector.broadcast %37 : vector<2x1xf32> to vector<2x128xf32>
    %39 = arith.divf %35, %38 : vector<2x128xf32>
    %c0_18 = arith.constant 0 : index
    %c0_19 = arith.constant 0 : index
    %40 = vector.load %arg11[%c0_18, %c0_19] : memref<2x128xf32, #tpu.memory_space<vmem>>, vector<2x128xf32>
    tpu.vector_store %arg11[%c0_18, %c0_19], %39 {strides = array<i32>} : memref<2x128xf32, #tpu.memory_space<vmem>>, vector<2x128xf32>,
    %c0_20 = arith.constant 0 : index
    %c0_21 = arith.constant 0 : index
    %41 = vector.load %arg5[%c0_20, %c0_21] : memref<32x1xf32, #tpu.memory_space<vmem>>, vector<32x1xf32>
    %cst_22 = arith.constant dense<0.000000e+00> : vector<128x1xf32>
    %42 = tpu.matmul %0, %41, %cst_22 {dimension_numbers = #tpu.dot_dimension_numbers<[1], [0], [0], [1], [0, 0, 1, 1], [], []>} : vector<128x32xf32>, vector<32x1xf32>, vector<128x1xf32> -> vector<128x1xf32>
    %c0_23 = arith.constant 0 : index
    %c0_24 = arith.constant 0 : index
    %43 = vector.load %arg6[%c0_23, %c0_24] : memref<1x1xf32, #tpu.memory_space<vmem>>, vector<1x1xf32>
    %44 = vector.broadcast %43 : vector<1x1xf32> to vector<128x1xf32>
    %45 = arith.addf %42, %44 : vector<128x1xf32>
    %cst_25 = arith.constant 0.000000e+00 : f32
    %46 = vector.broadcast %cst_25 : f32 to vector<128x1xf32>
    %47 = arith.maximumf %45, %46 : vector<128x1xf32>
    %48 = vector.shape_cast %47 : vector<128x1xf32> to vector<2x64x1xf32>
    %c0_26 = arith.constant 0 : index
    %c0_27 = arith.constant 0 : index
    %49 = vector.load %arg7[%c0_26, %c0_27] : memref<64x32xf32, #tpu.memory_space<vmem>>, vector<64x32xf32>
    %50 = vector.shape_cast %49 : vector<64x32xf32> to vector<1x64x32xf32>
    %51 = vector.broadcast %48 : vector<2x64x1xf32> to vector<2x64x32xf32>
    %52 = vector.broadcast %50 : vector<1x64x32xf32> to vector<2x64x32xf32>
    %53 = arith.mulf %51, %52 : vector<2x64x32xf32>
    %cst_28 = arith.constant dense<0.000000e+00> : vector<2x32xf32>
    %54 = vector.multi_reduction <add>, %53, %cst_28 [1] : vector<2x64x32xf32> to vector<2x32xf32>
    %c0_29 = arith.constant 0 : index
    %c0_30 = arith.constant 0 : index
    %55 = vector.load %arg8[%c0_29, %c0_30] : memref<1x32xf32, #tpu.memory_space<vmem>>, vector<1x32xf32>
    %56 = vector.broadcast %55 : vector<1x32xf32> to vector<2x32xf32>
    %57 = arith.addf %54, %56 : vector<2x32xf32>
    %cst_31 = arith.constant 0.000000e+00 : f32
    %58 = vector.broadcast %cst_31 : f32 to vector<2x32xf32>
    %59 = arith.maximumf %57, %58 : vector<2x32xf32>
    %c0_32 = arith.constant 0 : index
    %c0_33 = arith.constant 0 : index
    %60 = vector.load %arg9[%c0_32, %c0_33] : memref<32x128xf32, #tpu.memory_space<vmem>>, vector<32x128xf32>
    %cst_34 = arith.constant dense<0.000000e+00> : vector<2x128xf32>
    %61 = tpu.matmul %59, %60, %cst_34 {dimension_numbers = #tpu.dot_dimension_numbers<[1], [0], [0], [1], [0, 0, 1, 1], [], []>} : vector<2x32xf32>, vector<32x128xf32>, vector<2x128xf32> -> vector<2x128xf32>
    %c0_35 = arith.constant 0 : index
    %c0_36 = arith.constant 0 : index
    %62 = vector.load %arg10[%c0_35, %c0_36] : memref<1x128xf32, #tpu.memory_space<vmem>>, vector<1x128xf32>
    %63 = vector.broadcast %62 : vector<1x128xf32> to vector<2x128xf32>
    %64 = arith.addf %61, %63 : vector<2x128xf32>
    %65 = math.tanh %64 : vector<2x128xf32>
    %c0_37 = arith.constant 0 : index
    %c0_38 = arith.constant 0 : index
    %66 = vector.load %arg12[%c0_37, %c0_38] : memref<2x128xf32, #tpu.memory_space<vmem>>, vector<2x128xf32>
    tpu.vector_store %arg12[%c0_37, %c0_38], %65 {strides = array<i32>} : memref<2x128xf32, #tpu.memory_space<vmem>>, vector<2x128xf32>,
    return
  }
}

</mosaic_0001>

<bundles_post_ra>
// kernel: chess_model_forward.3
= control target key start
LH: loop header
LB: loop body
LE: loop exit
PB: predicated region body
PF: predicated region fallthrough
CT: control target
= control target key end

     0   :  { %s1728_s0 = inlined_call_operand.vmem [shape: f32[128,32], index: 0, kind: input, shape index: {}]   ;;  %s1729_s1 = inlined_call_operand.vmem [shape: f32[32,2], index: 1, kind: input, shape index: {}]   ;;  %s1730_s2 = inlined_call_operand.vmem [shape: f32[1,2], index: 2, kind: input, shape index: {}]   ;;  %s1731_s3 = inlined_call_operand.vmem [shape: f32[2,64,128], index: 3, kind: input, shape index: {}]   ;;  %s1732_s4 = inlined_call_operand.vmem [shape: f32[1,128], index: 4, kind: input, shape index: {}]   ;;  %s1733_s5 = inlined_call_operand.vmem [shape: f32[32,1], index: 5, kind: input, shape index: {}]   ;;  %s1734_s6 = inlined_call_operand.<no memory space> [shape: f32[1,1], index: 6, kind: input, shape index: {}]   ;;  %s1735_s7 = inlined_call_operand.vmem [shape: f32[64,32], index: 7, kind: input, shape index: {}]   ;;  %s1736_s8 = inlined_call_operand.vmem [shape: f32[1,32], index: 8, kind: input, shape index: {}]   ;;  %s1737_s9 = inlined_call_operand.vmem [shape: f32[32,128], index: 9, kind: input, shape index: {}]   ;;  %s1738_s10 = inlined_call_operand.vmem [shape: f32[1,128], index: 10, kind: input, shape index: {}]   ;;  %s1739_s11 = inlined_call_operand.hbm [shape: f32[2,128], index: 11, kind: output, shape index: {0}]   ;;  %s1740_s12 = inlined_call_operand.vmem [shape: f32[2,128], index: 12, kind: output, shape index: {1}]  }
   0x1   :  { %v18_v0 = vstv %s1734_s6 }
   0x2   :  { %19 = vst [vmem:[#allocation2] sm:$0x1] %v18_v0 }
   0x3   :  { %v580_v1 = vld [vmem:[%s1733_s5] sm:$0xff]  ;;  %v581_v2 = vld [vmem:[%s1733_s5 + $0x8] sm:$0xff]  ;;  %v582_v3 = vld [vmem:[%s1733_s5 + $0x10] sm:$0xff]  ;;  %vm70_vm0 = vcmask 261120  }
   0x4   :  { %v1190_v4 = vpack.c.bf16 %v581_v2, %v580_v1  ;;  %v583_v5 = vld [vmem:[%s1733_s5 + $0x18] sm:$0xff]  ;;  %v59_v6 = vld [vmem:[%s1729_s1] sm:$0xff]  ;;  %v60_v7 = vld [vmem:[%s1729_s1 + $0x8] sm:$0xff] }
   0x5   :  { %v1194_v8 = vpack.c.bf16 %v583_v5, %v582_v3  ;;  %v1182_v9 = vpack.c.bf16 %v60_v7, %v59_v6  ;;  %v43_v10 = vld [vmem:[%s1728_s0] sm:$0xff]  ;;  %v61_v11 = vld [vmem:[%s1729_s1 + $0x10] sm:$0xff]  ;;  %v62_v12 = vld [vmem:[%s1729_s1 + $0x18] sm:$0xff] }
   0x6   :  { %1191 = vmatprep.subr.bf16.mxu1 %v1190_v4  ;;  %1147 = vmatprep.mubr.msk.f32.mxu1 %vm70_vm0, %v43_v10  ;;  %v1186_v13 = vpack.c.bf16 %v62_v12, %v61_v11  ;;  %v44_v14 = vld [vmem:[%s1728_s0 + $0x8] sm:$0xff] }
   0x7   :  { %1193 = vmatpush3.bf16.msra.mxu1 %v1190_v4  ;;  %1183 = vmatprep.subr.bf16.mxu0 %v1182_v9 }
   0x8   :  { %1195 = vmatprep.subr.bf16.mxu1 %v1194_v8  ;;  %1185 = vmatpush3.bf16.msra.mxu0 %v1182_v9 }
   0x9   :  { %1187 = vmatprep.subr.bf16.mxu0 %v1186_v13  ;;  %1115 = vmatprep.mubr.msk.f32.mxu0 %vm70_vm0, %v43_v10 }
   0xb   :  { %1197 = vmatpush3.bf16.msra.mxu1 %v1194_v8 }
   0xc   :  { %20 = vsyncpa [#allocation4], 0  ;;  %1189 = vmatpush3.bf16.msra.mxu0 %v1186_v13  ;;  %v45_v15 = vld [vmem:[%s1728_s0 + $0x10] sm:$0xff]  ;;  %v46_v16 = vld [vmem:[%s1728_s0 + $0x18] sm:$0xff]  ;;  %v1266_v29 = vmov 0   ;;  %v1267_v30 = vmov 1  }
   0xd   :  { %v47_v17 = vld [vmem:[%s1728_s0 + $0x20] sm:$0xff]  ;;  %v48_v18 = vld [vmem:[%s1728_s0 + $0x28] sm:$0xff]  ;;  %v49_v19 = vld [vmem:[%s1728_s0 + $0x30] sm:$0xff]  ;;  %1210 = vset.pattern.permute.xlu1 %v1266_v29  ;;  %1211 = vset.pattern.permute.xlu0 %v1267_v30  ;;  %vm1269_vm1 = vmmov 0   ;;  %vm541_vm2 = vcmask 1041409   ;;  %vm544_vm3 = vcmask 1041408  }
   0xe   :  { %1148 = vmatmul.mubr.msk.f32.vlgmr.msra.gmra.mrb[0].mxu1 %vm70_vm0, %v44_v14  ;;  %v50_v20 = vld [vmem:[%s1728_s0 + $0x38] sm:$0xff]  ;;  %v51_v21 = vld [vmem:[%s1728_s0 + $0x40] sm:$0xff]  ;;  %v52_v22 = vld [vmem:[%s1728_s0 + $0x48] sm:$0xff] }
   0xf   :  { %1150 = vmatprep.mubr.msk.f32.mxu1 %vm70_vm0, %v45_v15  ;;  %1116 = vmatmul.mubr.msk.f32.vlgmr.msra.gmra.mrb[0].mxu0 %vm70_vm0, %v44_v14  ;;  %v53_v23 = vld [vmem:[%s1728_s0 + $0x50] sm:$0xff]  ;;  %v54_v24 = vld [vmem:[%s1728_s0 + $0x58] sm:$0xff]  ;;  %v55_v25 = vld [vmem:[%s1728_s0 + $0x60] sm:$0xff] }
  0x10   :  { %1118 = vmatprep.mubr.msk.f32.mxu0 %vm70_vm0, %v45_v15  ;;  %v56_v26 = vld [vmem:[%s1728_s0 + $0x68] sm:$0xff]  ;;  %v57_v27 = vld [vmem:[%s1728_s0 + $0x70] sm:$0xff]  ;;  %v58_v28 = vld [vmem:[%s1728_s0 + $0x78] sm:$0xff] }
  0x11   :  { %v1446_v31 = vld [vmem:[#allocation2] ss:$0 sm:$0xff] }
  0x12   :  { %1151 = vmatmul.mubr.msk.f32.gmra.mrb[2].mxu1 %vm70_vm0, %v46_v16  ;;  %v1451_v32 = vld [vmem:[%s1730_s2] ss:$0 sm:$0xff] }
  0x13   :  { %1153 = vmatprep.mubr.msk.f32.mxu1 %vm70_vm0, %v47_v17  ;;  %1119 = vmatmul.mubr.msk.f32.gmra.mrb[2].mxu0 %vm70_vm0, %v46_v16 }
  0x14   :  { %1121 = vmatprep.mubr.msk.f32.mxu0 %vm70_vm0, %v47_v17 }
  0x16   :  { %1154 = vmatmul.mubr.msk.f32.gmra.mrb[4].mxu1 %vm70_vm0, %v48_v18 }
  0x17   :  { %1156 = vmatprep.mubr.msk.f32.mxu1 %vm70_vm0, %v49_v19  ;;  %1122 = vmatmul.mubr.msk.f32.gmra.mrb[4].mxu0 %vm70_vm0, %v48_v18 }
  0x18   :  { %1124 = vmatprep.mubr.msk.f32.mxu0 %vm70_vm0, %v49_v19 }
  0x1a   :  { %1157 = vmatmul.mubr.msk.f32.gmra.mrb[6].mxu1 %vm70_vm0, %v50_v20 }
  0x1b   :  { %1159 = vmatprep.mubr.msk.f32.mxu1 %vm70_vm0, %v51_v21  ;;  %1125 = vmatmul.mubr.msk.f32.gmra.mrb[6].mxu0 %vm70_vm0, %v50_v20 }
  0x1c   :  { %1127 = vmatprep.mubr.msk.f32.mxu0 %vm70_vm0, %v51_v21 }
  0x1e   :  { %1160 = vmatmul.mubr.msk.f32.gmra.mrb[8].mxu1 %vm70_vm0, %v52_v22 }
  0x1f   :  { %1128 = vmatmul.mubr.msk.f32.gmra.mrb[8].mxu0 %vm70_vm0, %v52_v22  ;;  %1162 = vmatprep.mubr.msk.f32.mxu1 %vm70_vm0, %v53_v23 }
  0x20   :  { %1130 = vmatprep.mubr.msk.f32.mxu0 %vm70_vm0, %v53_v23 }
  0x22   :  { %1163 = vmatmul.mubr.msk.f32.gmra.mrb[10].mxu1 %vm70_vm0, %v54_v24 }
  0x23   :  { %1165 = vmatprep.mubr.msk.f32.mxu1 %vm70_vm0, %v55_v25  ;;  %1131 = vmatmul.mubr.msk.f32.gmra.mrb[10].mxu0 %vm70_vm0, %v54_v24 }
  0x24   :  { %1133 = vmatprep.mubr.msk.f32.mxu0 %vm70_vm0, %v55_v25 }
  0x26   :  { %1166 = vmatmul.mubr.msk.f32.gmra.mrb[12].mxu1 %vm70_vm0, %v56_v26 }
  0x27   :  { %1168 = vmatprep.mubr.msk.f32.mxu1 %vm70_vm0, %v57_v27  ;;  %1134 = vmatmul.mubr.msk.f32.gmra.mrb[12].mxu0 %vm70_vm0, %v56_v26 }
  0x28   :  { %1136 = vmatprep.mubr.msk.f32.mxu0 %vm70_vm0, %v57_v27 }
  0x2a   :  { %1169 = vmatmul.mubr.msk.f32.gmra.mrb[14].mxu1 %vm70_vm0, %v58_v28 }
  0x2b   :  { %1137 = vmatmul.mubr.msk.f32.gmra.mrb[14].mxu0 %vm70_vm0, %v58_v28 }
  0xe1   :  { %v1149_v33 = vpop.f32.mrb[0].mxu1 }
  0xe2   :  { %v663_v34 = vadd.f32 %v1149_v33, %v1446_v31  ;;  %v657_v35 = vpop.f32.mrb[1].mxu1  ;;  %v1117_v36 = vpop.f32.mrb[0].mxu0 }
  0xe3   :  { %v1455_v37 = vadd.f32 %v1117_v36, %v1451_v32  ;;  %v185_v38 = vpop.f32.mrb[1].mxu0  ;;  %v658_v40 = vadd.f32 %v1446_v31, %v657_v35 }
  0xe4   :  { %v737_v39 = vmax.f32 %v663_v34, 0.0  ;;  %v186_v43 = vadd.f32 %v1451_v32, %v185_v38 }
  0xe5   :  { %v265_v41 = vmax.f32 %v1455_v37, 0.0  ;;  %v1152_v42 = vpop.f32.mrb[2].mxu1  ;;  %v736_v47 = vmax.f32 %v658_v40, 0.0  ;;  %v1270_v37 = vmov 0.0  }
  0xe6   :  { %767 = vperm.xlu1 %1210, %v737_v39   ;;  %v667_v44 = vpop.f32.mrb[3].mxu1  ;;  %v1460_v45 = vpop.f32.mrb[2].mxu0  ;;  %v264_v49 = vmax.f32 %v186_v43, 0.0  ;;  %v673_v59 = vadd.f32 %v1152_v42, %v1446_v31  ;;  %1179 = vmatprep.mubr.msk.f32.mxu0 %vm1269_vm1, %v1270_v37 }
  0xe7   :  { %426 = vperm.xlu0 %1211, %v265_v41   ;;  %v195_v46 = vpop.f32.mrb[3].mxu0  ;;  %v668_v6 = vadd.f32 %v1446_v31, %v667_v44 }
  0xe8   :  { %v739_v3 = vmax.f32 %v673_v59, 0.0  ;;  %v196_v12 = vadd.f32 %v1451_v32, %v195_v46 }
  0xe9   :  { %v1155_v48 = vpop.f32.mrb[4].mxu1  ;;  %v738_v15 = vmax.f32 %v668_v6, 0.0  ;;  %v912_v6 = vld [vmem:[%s1737_s9 + $0x18] sm:$0xff] }
  0xea   :  { %762 = vperm.xlu1 %1210, %v736_v47   ;;  %v1464_v50 = vpop.f32.mrb[5].mxu1  ;;  %v1466_v51 = vpop.f32.mrb[4].mxu0  ;;  %v266_v21 = vmax.f32 %v196_v12, 0.0  ;;  %v683_v36 = vadd.f32 %v1155_v48, %v1446_v31 }
  0xeb   :  { %1216 = vset.pattern.permute.xlu0 %v1266_v29  ;;  %v205_v52 = vpop.f32.mrb[5].mxu0  ;;  %v678_v42 = vadd.f32 %v1446_v31, %v1464_v50 }
  0xec   :  { %v1470_v53 = vadd.f32 %v1451_v32, %v205_v52  ;;  %v741_v40 = vmax.f32 %v683_v36, 0.0 }
  0xed   :  { %v1472_v54 = vpop.f32.mrb[6].mxu1  ;;  %v740_v47 = vmax.f32 %v678_v42, 0.0 }
  0xee   :  { %290 = vperm.xlu1 %1210, %v264_v49   ;;  %v1474_v55 = vpop.f32.mrb[7].mxu1  ;;  %v1126_v56 = vpop.f32.mrb[6].mxu0  ;;  %v693_v46 = vadd.f32 %v1472_v54, %v1446_v31 }
  0xef   :  { %v1477_v57 = vadd.f32 %v1126_v56, %v1451_v32  ;;  %v215_v58 = vpop.f32.mrb[7].mxu0  ;;  %v688_v50 = vadd.f32 %v1446_v31, %v1474_v55  ;;  %v211_v55 = vadd.f32 %v1466_v51, %v1451_v32  ;;  %v910_v51 = vld [vmem:[%s1737_s9 + $0x8] sm:$0xff] }
  0xf0   :  { %v1481_v60 = vadd.f32 %v1451_v32, %v215_v58  ;;  %v743_v52 = vmax.f32 %v693_v46, 0.0  ;;  %v755_v46 = vld [vmem:[%s1735_s7 + $0x18] sm:$0xff] }
  0xf1   :  { %v1161_v61 = vpop.f32.mrb[8].mxu1  ;;  %v742_v54 = vmax.f32 %v688_v50, 0.0 }
  0xf2   :  { %v703_v62 = vadd.f32 %v1161_v61, %v1446_v31  ;;  %1212 = vset.pattern.permute.xlu1 %v1267_v30  ;;  %v697_v63 = vpop.f32.mrb[9].mxu1  ;;  %v1485_v0 = vpop.f32.mrb[8].mxu0  ;;  %v270_v12 = vmax.f32 %v1481_v60, 0.0  ;;  %v1581_v60 = vld [vmem:[%s1731_s3 + $0x48] sm:$0xff] }
  0xf3   :  { %422 = vperm.xlu1 %1212, %v264_v49   ;;  %v698_v1 = vadd.f32 %v1446_v31, %v697_v63  ;;  %v225_v2 = vpop.f32.mrb[9].mxu0  ;;  %v231_v59 = vadd.f32 %v1485_v0, %v1451_v32  ;;  %v201_v63 = vadd.f32 %v1460_v45, %v1451_v32  ;;  %v269_v0 = vmax.f32 %v211_v55, 0.0  ;;  %v756_v55 = vld [vmem:[%s1735_s7 + $0x20] sm:$0xff] }
  0xf4   :  { %v745_v4 = vmax.f32 %v703_v62, 0.0  ;;  %v1493_v10 = vadd.f32 %v1451_v32, %v225_v2 }
  0xf5   :  { %v1164_v5 = vpop.f32.mrb[10].mxu1  ;;  %v744_v7 = vmax.f32 %v698_v1, 0.0  ;;  %v273_v62 = vmax.f32 %v231_v59, 0.0  ;;  %v267_v1 = vmax.f32 %v201_v63, 0.0 }
  0xf6   :  { %807 = vperm.xlu0 %1216, %v745_v4   ;;  %v707_v8 = vpop.f32.mrb[11].mxu1  ;;  %v1489_v9 = vpop.f32.mrb[10].mxu0  ;;  %v272_v18 = vmax.f32 %v1493_v10, 0.0  ;;  %v713_v22 = vadd.f32 %v1164_v5, %v1446_v31  ;;  %v1268_v4 = vmov 0.0|0.0   ;;  %v911_v5 = vld [vmem:[%s1737_s9 + $0x10] sm:$0xff] }
  0xf7   :  { %1213 = vset.pattern.permute.xlu1 %v1266_v29  ;;  %v235_v11 = vpop.f32.mrb[11].mxu0  ;;  %v708_v34 = vadd.f32 %v1446_v31, %v707_v8  ;;  %1198 = vmatprep.subr.bf16.mxu0 %v1268_v4 }
  0xf8   :  { %777 = vperm.xlu1 %1213, %v739_v3   ;;  %v1497_v13 = vadd.f32 %v1451_v32, %v235_v11  ;;  %v747_v33 = vmax.f32 %v713_v22, 0.0  ;;  %v271_v11 = vmax.f32 %v1477_v57, 0.0 }
  0xf9   :  { %v1167_v14 = vpop.f32.mrb[12].mxu1  ;;  %v746_v38 = vmax.f32 %v708_v34, 0.0  ;;  %v754_v34 = vld [vmem:[%s1735_s7 + $0x10] sm:$0xff] }
  0xfa   :  { %802 = vperm.xlu0 %1216, %v744_v7   ;;  %v717_v16 = vpop.f32.mrb[13].mxu1  ;;  %v1135_v17 = vpop.f32.mrb[12].mxu0  ;;  %v723_v39 = vadd.f32 %v1167_v14, %v1446_v31  ;;  %v274_v45 = vmax.f32 %v1497_v13, 0.0  ;;  %v1202_v7 = vpack.c.bf16 %v912_v6, %v911_v5 }
  0xfb   :  { %v1501_v19 = vadd.f32 %v1135_v17, %v1451_v32  ;;  %v245_v20 = vpop.f32.mrb[13].mxu0  ;;  %v718_v44 = vadd.f32 %v1446_v31, %v717_v16  ;;  %v1586_v16 = vld [vmem:[%s1731_s3 + $0x40] sm:$0xff] }
  0xfc   :  { %772 = vperm.xlu1 %1213, %v738_v15   ;;  %v1505_v23 = vadd.f32 %v1451_v32, %v245_v20  ;;  %v749_v43 = vmax.f32 %v723_v39, 0.0 }
  0xfd   :  { %v1170_v24 = vpop.f32.mrb[14].mxu1  ;;  %v748_v48 = vmax.f32 %v718_v44, 0.0 }
  0xfe   :  { %1218 = vset.pattern.permute.xlu0 %v1267_v30  ;;  %v727_v25 = vpop.f32.mrb[15].mxu1  ;;  %v1138_v26 = vpop.f32.mrb[14].mxu0  ;;  %v733_v49 = vadd.f32 %v1170_v24, %v1446_v31  ;;  %v276_v8 = vmax.f32 %v1505_v23, 0.0  ;;  %v753_v24 = vld [vmem:[%s1735_s7 + $0x8] sm:$0xff] }
  0xff   :  { %454 = vperm.xlu0 %1218, %v272_v18   ;;  %v1511_v27 = vadd.f32 %v1138_v26, %v1451_v32  ;;  %v255_v28 = vpop.f32.mrb[15].mxu0  ;;  %v728_v58 = vadd.f32 %v1446_v31, %v727_v25  ;;  %v241_v31 = vadd.f32 %v1489_v9, %v1451_v32  ;;  %v268_v9 = vmax.f32 %v1470_v53, 0.0  ;;  %v752_v25 = vld [vmem:[%s1735_s7] sm:$0xff] }
 0x100   :  { %300 = vperm.xlu1 %1213, %v266_v21   ;;  %v1515_v35 = vadd.f32 %v1451_v32, %v255_v28  ;;  %v751_v56 = vmax.f32 %v733_v49, 0.0  ;;  %v909_v32 = vld [vmem:[%s1737_s9] sm:$0xff] }
 0x101   :  { %v750_v61 = vmax.f32 %v728_v58, 0.0  ;;  %v275_v2 = vmax.f32 %v241_v31, 0.0  ;;  %v1199_v3 = vpack.c.bf16 %v910_v51, %v909_v32  ;;  %v279_v10 = vmax.f32 %v1511_v27, 0.0  ;;  %v757_v51 = vld [vmem:[%s1735_s7 + $0x28] sm:$0xff] }
 0x102   :  { %v278_v53 = vmax.f32 %v1515_v35, 0.0 }
 0x103   :  { %1219 = vset.pattern.permute.xlu0 %v1266_v29  ;;  %1200 = vmatpush3.bf16.msra.mxu0 %v1199_v3 }
 0x104   :  { %817 = vperm.xlu0 %1219, %v747_v33   ;;  %1214 = vset.pattern.permute.xlu1 %v1267_v30  ;;  %v1603_v33 = vld [vmem:[%s1731_s3 + $0x50] sm:$0xff] }
 0x105   :  { %430 = vperm.xlu1 %1214, %v266_v21   ;;  %1201 = vmatprep.subr.bf16.mxu0 %v1268_v4 }
 0x107   :  { %1203 = vmatpush3.bf16.msra.mxu0 %v1202_v7 }
 0x108   :  { %812 = vperm.xlu0 %1219, %v746_v38  }
 0x109   :  { %1215 = vset.pattern.permute.xlu1 %v1266_v29 }
 0x10a   :  { %787 = vperm.xlu1 %1215, %v741_v40  }
 0x10c   :  { %827 = vperm.xlu0 %1219, %v749_v43  }
 0x10e   :  { %782 = vperm.xlu1 %1215, %v740_v47  }
 0x110   :  { %822 = vperm.xlu0 %1219, %v748_v48  }
 0x112   :  { %797 = vperm.xlu1 %1215, %v743_v52  }
 0x114   :  { %837 = vperm.xlu0 %1219, %v751_v56  }
 0x116   :  { %792 = vperm.xlu1 %1215, %v742_v54  }
 0x118   :  { %832 = vperm.xlu0 %1219, %v750_v61  }
 0x11a   :  { %335 = vperm.xlu1 %1215, %v273_v62  }
 0x11c   :  { %1223 = vset.pattern.permute.xlu0 %v1267_v30 }
 0x11d   :  { %434 = vperm.xlu0 %1223, %v267_v1  }
 0x11e   :  { %1217 = vset.pattern.permute.xlu1 %v1267_v30 }
 0x11f   :  { %458 = vperm.xlu1 %1217, %v273_v62  }
 0x121   :  { %442 = vperm.xlu0 %1223, %v269_v0  }
 0x123   :  { %466 = vperm.xlu1 %1217, %v275_v2  }
 0x125   :  { %1227 = vset.pattern.permute.xlu0 %v1266_v29 }
 0x126   :  { %330 = vperm.xlu0 %1227, %v272_v18  }
 0x127   :  { %1220 = vset.pattern.permute.xlu1 %v1266_v29 }
 0x128   :  { %340 = vperm.xlu1 %1220, %v274_v45  }
 0x12a   :  { %295 = vperm.xlu0 %1227, %v265_v41   ;;  %v277_v41 = vmax.f32 %v1501_v19, 0.0 }
 0x12c   :  { %1221 = vset.pattern.permute.xlu1 %v1267_v30 }
 0x12d   :  { %462 = vperm.xlu1 %1221, %v274_v45  }
 0x12e   :  { %345 = vperm.xlu0 %1227, %v275_v2  }
 0x131   :  { %1222 = vset.pattern.permute.xlu1 %v1266_v29 }
 0x132   :  { %305 = vperm.xlu0 %1227, %v267_v1   ;;  %350 = vperm.xlu1 %1222, %v276_v8  }
 0x136   :  { %355 = vperm.xlu0 %1227, %v277_v41   ;;  %1224 = vset.pattern.permute.xlu1 %v1267_v30 }
 0x137   :  { %470 = vperm.xlu1 %1224, %v276_v8  }
 0x13a   :  { %315 = vperm.xlu0 %1227, %v269_v0  }
 0x13b   :  { %1225 = vset.pattern.permute.xlu1 %v1266_v29 }
 0x13c   :  { %310 = vperm.xlu1 %1225, %v268_v9  }
 0x13e   :  { %365 = vperm.xlu0 %1227, %v279_v10  }
 0x140   :  { %1226 = vset.pattern.permute.xlu1 %v1267_v30 }
 0x141   :  { %438 = vperm.xlu1 %1226, %v268_v9  }
 0x142   :  { %325 = vperm.xlu0 %1227, %v271_v11  }
 0x145   :  { %474 = vperm.xlu1 %1226, %v277_v41  }
 0x149   :  { %1228 = vset.pattern.permute.xlu1 %v1266_v29 }
 0x14a   :  { %320 = vperm.xlu1 %1228, %v270_v12  }
 0x14e   :  { %1229 = vset.pattern.permute.xlu1 %v1267_v30 }
 0x14f   :  { %446 = vperm.xlu1 %1229, %v270_v12  }
 0x153   :  { %482 = vperm.xlu1 %1229, %v279_v10  }
 0x157   :  { %1230 = vset.pattern.permute.xlu1 %v1266_v29 }
 0x158   :  { %360 = vperm.xlu1 %1230, %v278_v53  }
 0x15c   :  { %1231 = vset.pattern.permute.xlu1 %v1267_v30 }
 0x15d   :  { %478 = vperm.xlu1 %1231, %v278_v53   ;;  %v759_v53 = vld [vmem:[%s1735_s7 + $0x38] sm:$0xff] }
 0x161   :  { %450 = vperm.xlu1 %1231, %v271_v11  }
 0x165   :  { %v768_v57 = vpop.permute.xlu1 %767 }
 0x166   :  { %v427_v15 = vpop.permute.xlu0 %426  ;;  %v841_v43 = vmul.f32 %v768_v57, %v753_v24 }
 0x167   :  { %v486_v30 = vmul.f32 %v1581_v60, %v427_v15 }
 0x168   :  { %v857_v59 = vsel %vm70_vm0, %v841_v43, 0.0 }
 0x169   :  { %v763_v13 = vpop.permute.xlu1 %762 }
 0x16a   :  { %v840_v36 = vmul.f32 %v763_v13, %v752_v25  ;;  %v758_v13 = vld [vmem:[%s1735_s7 + $0x30] sm:$0xff] }
 0x16c   :  { %v856_v52 = vsel %vm70_vm0, %v840_v36, 0.0 }
 0x16d   :  { %v1576_v14 = vpop.permute.xlu1 %290  ;;  %v858_v62 = vadd.f32 %v857_v59, %v856_v52 }
 0x172   :  { %v423_v29 = vpop.permute.xlu1 %422 }
 0x173   :  { %v485_v17 = vmul.f32 %v1586_v16, %v423_v29 }
 0x175   :  { %v501_v18 = vadd.f32 %v486_v30, %v485_v17  ;;  %v808_v19 = vpop.permute.xlu0 %807 }
 0x176   :  { %v849_v27 = vmul.f32 %v808_v19, %v753_v24 }
 0x177   :  { %v778_v20 = vpop.permute.xlu1 %777 }
 0x178   :  { %v878_v38 = vsel %vm70_vm0, %v849_v27, 0.0  ;;  %v843_v31 = vmul.f32 %v778_v20, %v755_v46 }
 0x179   :  { %v803_v21 = vpop.permute.xlu0 %802 }
 0x17a   :  { %v848_v28 = vmul.f32 %v803_v21, %v752_v25  ;;  %v861_v5 = vsel %vm70_vm0, %v843_v31, 0.0 }
 0x17b   :  { %v773_v22 = vpop.permute.xlu1 %772 }
 0x17c   :  { %v877_v39 = vsel %vm70_vm0, %v848_v28, 0.0  ;;  %v842_v44 = vmul.f32 %v773_v22, %v754_v34 }
 0x17d   :  { %v879_v47 = vadd.f32 %v878_v38, %v877_v39 }
 0x17e   :  { %v1590_v23 = vpop.permute.xlu0 %454  ;;  %v859_v54 = vsel %vm70_vm0, %v842_v44, 0.0 }
 0x17f   :  { %v1598_v26 = vpop.permute.xlu1 %300  ;;  %v860_v2 = vadd.f32 %v859_v54, %v858_v62 }
 0x181   :  { %v862_v37 = vadd.f32 %v861_v5, %v860_v2  ;;  %v282_v2 = vld [vmem:[%s1731_s3 + $0x10] sm:$0xff] }
 0x183   :  { %v818_v35 = vpop.permute.xlu0 %817 }
 0x184   :  { %v431_v40 = vpop.permute.xlu1 %430  ;;  %v851_v50 = vmul.f32 %v818_v35, %v755_v46 }
 0x185   :  { %v487_v42 = vmul.f32 %v1603_v33, %v431_v40 }
 0x186   :  { %v882_v0 = vsel %vm70_vm0, %v851_v50, 0.0 }
 0x187   :  { %v1614_v48 = vadd.f32 %v501_v18, %v487_v42  ;;  %v813_v49 = vpop.permute.xlu0 %812 }
 0x188   :  { %v850_v56 = vmul.f32 %v813_v49, %v754_v34 }
 0x189   :  { %v788_v58 = vpop.permute.xlu1 %787 }
 0x18a   :  { %v880_v61 = vsel %vm70_vm0, %v850_v56, 0.0  ;;  %v845_v9 = vmul.f32 %v788_v58, %v757_v51 }
 0x18b   :  { %v881_v63 = vadd.f32 %v880_v61, %v879_v47  ;;  %v828_v1 = vpop.permute.xlu0 %827 }
 0x18c   :  { %v853_v6 = vmul.f32 %v828_v1, %v757_v51  ;;  %v865_v30 = vsel %vm70_vm0, %v845_v9, 0.0 }
 0x18d   :  { %v783_v45 = vpop.permute.xlu1 %782  ;;  %v883_v3 = vadd.f32 %v882_v0, %v881_v63  ;;  %v280_v63 = vld [vmem:[%s1731_s3] sm:$0xff] }
 0x18e   :  { %v844_v32 = vmul.f32 %v783_v45, %v756_v55  ;;  %v886_v15 = vsel %vm70_vm0, %v853_v6, 0.0  ;;  %v1059_v0 = vld [vmem:[%s1736_s8] ss:$0 sm:$0xff] }
 0x18f   :  { %v823_v4 = vpop.permute.xlu0 %822 }
 0x190   :  { %v863_v7 = vsel %vm70_vm0, %v844_v32, 0.0  ;;  %v852_v8 = vmul.f32 %v823_v4, %v756_v55  ;;  %v281_v32 = vld [vmem:[%s1731_s3 + $0x8] sm:$0xff] }
 0x191   :  { %v798_v41 = vpop.permute.xlu1 %797  ;;  %v864_v11 = vadd.f32 %v863_v7, %v862_v37  ;;  %v370_v7 = vmul.f32 %v1598_v26, %v282_v2  ;;  %v283_v26 = vld [vmem:[%s1731_s3 + $0x18] sm:$0xff] }
 0x192   :  { %v884_v10 = vsel %vm70_vm0, %v852_v8, 0.0  ;;  %v847_v17 = vmul.f32 %v798_v41, %v759_v53 }
 0x193   :  { %v885_v12 = vadd.f32 %v884_v10, %v883_v3  ;;  %v838_v57 = vpop.permute.xlu0 %837  ;;  %v866_v20 = vadd.f32 %v865_v30, %v864_v11  ;;  %v368_v3 = vmul.f32 %v1576_v14, %v280_v63 }
 0x194   :  { %v855_v18 = vmul.f32 %v838_v57, %v759_v53  ;;  %v869_v34 = vsel %vm70_vm0, %v847_v17, 0.0 }
 0x195   :  { %v793_v29 = vpop.permute.xlu1 %792  ;;  %v887_v21 = vadd.f32 %v886_v15, %v885_v12 }
 0x196   :  { %v846_v19 = vmul.f32 %v793_v29, %v758_v13  ;;  %v890_v35 = vsel %vm70_vm0, %v855_v18, 0.0 }
 0x197   :  { %v833_v22 = vpop.permute.xlu0 %832 }
 0x198   :  { %v867_v24 = vsel %vm70_vm0, %v846_v19, 0.0  ;;  %v854_v25 = vmul.f32 %v833_v22, %v758_v13 }
 0x199   :  { %v868_v27 = vadd.f32 %v867_v24, %v866_v20  ;;  %v336_v28 = vpop.permute.xlu1 %335  ;;  %v284_v20 = vld [vmem:[%s1731_s3 + $0x20] sm:$0xff] }
 0x19a   :  { %v888_v36 = vsel %vm70_vm0, %v854_v25, 0.0 }
 0x19b   :  { %v870_v38 = vadd.f32 %v869_v34, %v868_v27  ;;  %v889_v39 = vadd.f32 %v888_v36, %v887_v21  ;;  %v377_v27 = vmul.f32 %v336_v28, %v281_v32  ;;  %v493_v28 = vmul.f32 %v1586_v16, %v1590_v23  ;;  %v1037_v16 = vld [vmem:[%s1731_s3 + $0x60] sm:$0xff] }
 0x19c   :  { %v1642_v40 = vpop.permute.xlu0 %434 }
 0x19d   :  { %v871_v42 = vrot.slane %v870_v38, 4  ;;  %v891_v43 = vadd.f32 %v890_v35, %v889_v39  ;;  %v286_v35 = vld [vmem:[%s1731_s3 + $0x30] sm:$0xff] }
 0x19e   :  { %v459_v44 = vpop.permute.xlu1 %458 }
 0x19f   :  { %v872_v46 = vadd.f32 %v871_v42, %v870_v38  ;;  %v892_v47 = vrot.slane %v891_v43, 4  ;;  %v285_v42 = vld [vmem:[%s1731_s3 + $0x28] sm:$0xff] }
 0x1a0   :  { %v1644_v49 = vpop.permute.xlu0 %442 }
 0x1a1   :  { %v873_v52 = vrot.slane %v872_v46, 2  ;;  %v893_v50 = vadd.f32 %v892_v47, %v891_v43 }
 0x1a2   :  { %v1646_v56 = vpop.permute.xlu1 %466 }
 0x1a3   :  { %v874_v58 = vadd.f32 %v873_v52, %v872_v46  ;;  %v894_v59 = vrot.slane %v893_v50, 2  ;;  %v494_v46 = vmul.f32 %v1581_v60, %v459_v44 }
 0x1a5   :  { %v875_v54 = vrot.slane %v874_v58, 1  ;;  %v895_v61 = vadd.f32 %v894_v59, %v893_v50  ;;  %v331_v62 = vpop.permute.xlu0 %330 }
 0x1a6   :  { %v376_v24 = vmul.f32 %v331_v62, %v280_v63  ;;  %v287_v63 = vld [vmem:[%s1731_s3 + $0x38] sm:$0xff] }
 0x1a7   :  { %v876_v1 = vadd.f32 %v875_v54, %v874_v58  ;;  %v896_v55 = vrot.slane %v895_v61, 1  ;;  %v341_v31 = vpop.permute.xlu1 %340  ;;  %v1036_v54 = vld [vmem:[%s1731_s3 + $0x58] sm:$0xff] }
 0x1a8   :  { %v397_v38 = vadd.f32 %v377_v27, %v376_v24  ;;  %v378_v39 = vmul.f32 %v341_v31, %v282_v2  ;;  %v488_v23 = vmul.f32 %v1036_v54, %v1642_v40 }
 0x1a9   :  { %v897_v45 = vadd.f32 %v896_v55, %v895_v61  ;;  %v296_v51 = vpop.permute.xlu0 %295  ;;  %v905_v6 = vadd.f32 %v1059_v0, %v876_v1  ;;  %v514_v1 = vadd.f32 %v494_v46, %v493_v28 }
 0x1aa   :  { %v369_v4 = vmul.f32 %v296_v51, %v281_v32  ;;  %v398_v61 = vadd.f32 %v397_v38, %v378_v39  ;;  %v496_v32 = vmul.f32 %v1036_v54, %v1646_v56 }
 0x1ab   :  { %v906_v5 = vadd.f32 %v1059_v0, %v897_v45  ;;  %v907_v10 = vmax.f32 %v905_v6, 0.0  ;;  %v1038_v6 = vld [vmem:[%s1731_s3 + $0x68] sm:$0xff] }
 0x1ac   :  { %v384_v8 = vadd.f32 %v369_v4, %v368_v3  ;;  %v463_v37 = vpop.permute.xlu1 %462 }
 0x1ad   :  { %v908_v41 = vmax.f32 %v906_v5, 0.0  ;;  %v346_v57 = vpop.permute.xlu0 %345  ;;  %v495_v58 = vmul.f32 %v1603_v33, %v463_v37  ;;  %v503_v37 = vadd.f32 %v1614_v48, %v488_v23 }
 0x1ae   :  { %v385_v9 = vadd.f32 %v384_v8, %v370_v7  ;;  %v379_v50 = vmul.f32 %v346_v57, %v283_v26  ;;  %v1040_v57 = vld [vmem:[%s1731_s3 + $0x78] sm:$0xff] }
 0x1af   :  { %v922_v11 = vrot.slane %v908_v41, 7  ;;  %v515_v33 = vadd.f32 %v514_v1, %v495_v58 }
 0x1b0   :  { %v399_v31 = vadd.f32 %v398_v61, %v379_v50 }
 0x1b1   :  { %v351_v12 = vpop.permute.xlu1 %350  ;;  %v923_v53 = vsel %vm541_vm2, %v922_v11, %v907_v10  ;;  %v306_v14 = vpop.permute.xlu0 %305  ;;  %v516_v41 = vadd.f32 %v515_v33, %v496_v32  ;;  %v1039_v10 = vld [vmem:[%s1731_s3 + $0x70] sm:$0xff] }
 0x1b2   :  { %1180 = vmatmul.mubr.msk.f32.vlgmr.msra.gmra.mrb[16].mxu0 %vm70_vm0, %v923_v53  ;;  %v371_v19 = vmul.f32 %v306_v14, %v283_v26  ;;  %v380_v62 = vmul.f32 %v351_v12, %v284_v20 }
 0x1b4   :  { %v386_v25 = vadd.f32 %v385_v9, %v371_v19  ;;  %v400_v45 = vadd.f32 %v399_v31, %v380_v62 }
 0x1b5   :  { %v356_v29 = vpop.permute.xlu0 %355 }
 0x1b6   :  { %v471_v13 = vpop.permute.xlu1 %470  ;;  %v381_v0 = vmul.f32 %v356_v29, %v285_v42 }
 0x1b7   :  { %v497_v51 = vmul.f32 %v1037_v16, %v471_v13 }
 0x1b8   :  { %v401_v7 = vadd.f32 %v400_v45, %v381_v0  ;;  %v1060_v45 = vld [vmem:[%s1738_s10] ss:$0 sm:$0xff]  ;;  %s1271_s10 = smov [#allocation3]  }
 0x1b9   :  { %v316_v18 = vpop.permute.xlu0 %315  ;;  %v517_v11 = vadd.f32 %v516_v41, %v497_v51  ;;  %s1004_s5 = sshll.u32 %s1271_s10, 4  ;;  %s1005_s5 = int_to_ptr.vmem [resolvable:$true] %s1004_s5 }
 0x1ba   :  { %v373_v47 = vmul.f32 %v316_v18, %v285_v42  ;;  %p1247_p1 = scmp.lt.s32.totalorder %s1005_s5, %s1005_s5 }
 0x1bb   :  { %v311_v15 = vpop.permute.xlu1 %310 }
 0x1bc   :  { %v372_v21 = vmul.f32 %v311_v15, %v284_v20  ;;  %v490_v15 = vmul.f32 %v1038_v6, %v1644_v49 }
 0x1bd   :  { %v366_v34 = vpop.permute.xlu0 %365 }
 0x1be   :  { %v387_v36 = vadd.f32 %v386_v25, %v372_v21  ;;  %v383_v40 = vmul.f32 %v366_v34, %v287_v63 }
 0x1c0   :  { %v439_v30 = vpop.permute.xlu1 %438  ;;  %v388_v59 = vadd.f32 %v387_v36, %v373_v47 }
 0x1c1   :  { %v326_v60 = vpop.permute.xlu0 %325  ;;  %v489_v3 = vmul.f32 %v1037_v16, %v439_v30 }
 0x1c2   :  { %v375_v2 = vmul.f32 %v326_v60, %v287_v63  ;;  %v1041_v60 = vld [vmem:[%s1732_s4] ss:$0 sm:$0xff] }
 0x1c3   :  { %v504_v12 = vadd.f32 %v503_v37, %v489_v3 }
 0x1c4   :  { %v475_v17 = vpop.permute.xlu1 %474 }
 0x1c5   :  { %v498_v9 = vmul.f32 %v1038_v6, %v475_v17  ;;  %v505_v18 = vadd.f32 %v504_v12, %v490_v15 }
 0x1c7   :  { %v518_v48 = vadd.f32 %v517_v11, %v498_v9 }
 0x1c9   :  { %v321_v22 = vpop.permute.xlu1 %320 }
 0x1ca   :  { %v374_v52 = vmul.f32 %v321_v22, %v286_v35 }
 0x1cc   :  { %v389_v55 = vadd.f32 %v388_v59, %v374_v52 }
 0x1ce   :  { %v447_v43 = vpop.permute.xlu1 %446  ;;  %v390_v4 = vadd.f32 %v389_v55, %v375_v2 }
 0x1cf   :  { %v491_v29 = vmul.f32 %v1039_v10, %v447_v43 }
 0x1d0   :  { %v391_v53 = vrot.slane %v390_v4, 4 }
 0x1d1   :  { %v506_v24 = vadd.f32 %v505_v18, %v491_v29 }
 0x1d2   :  { %v483_v44 = vpop.permute.xlu1 %482  ;;  %v392_v26 = vadd.f32 %v391_v53, %v390_v4 }
 0x1d3   :  { %v500_v19 = vmul.f32 %v1040_v57, %v483_v44 }
 0x1d7   :  { %v361_v5 = vpop.permute.xlu1 %360 }
 0x1d8   :  { %v382_v8 = vmul.f32 %v361_v5, %v286_v35  ;;  %v393_v35 = vrot.slane %v392_v26, 2 }
 0x1da   :  { %v402_v56 = vadd.f32 %v401_v7, %v382_v8  ;;  %v394_v46 = vadd.f32 %v393_v35, %v392_v26 }
 0x1dc   :  { %v403_v13 = vadd.f32 %v402_v56, %v383_v40  ;;  %v479_v14 = vpop.permute.xlu1 %478  ;;  %v395_v58 = vrot.slane %v394_v46, 1 }
 0x1dd   :  { %v499_v30 = vmul.f32 %v1039_v10, %v479_v14 }
 0x1de   :  { %v404_v17 = vrot.slane %v403_v13, 4  ;;  %v396_v1 = vadd.f32 %v395_v58, %v394_v46 }
 0x1df   :  { %v519_v20 = vadd.f32 %v518_v48, %v499_v30 }
 0x1e0   :  { %v405_v21 = vadd.f32 %v404_v17, %v403_v13  ;;  %v451_v22 = vpop.permute.xlu1 %450 }
 0x1e1   :  { %v520_v25 = vadd.f32 %v519_v20, %v500_v19  ;;  %v492_v27 = vmul.f32 %v1040_v57, %v451_v22 }
 0x1e2   :  { %v406_v34 = vrot.slane %v405_v21, 2 }
 0x1e3   :  { %v521_v36 = vrot.slane %v520_v25, 4  ;;  %v507_v38 = vadd.f32 %v506_v24, %v492_v27 }
 0x1e4   :  { %v407_v39 = vadd.f32 %v406_v34, %v405_v21 }
 0x1e5   :  { %v522_v42 = vadd.f32 %v521_v36, %v520_v25  ;;  %v508_v49 = vrot.slane %v507_v38, 4 }
 0x1e6   :  { %v408_v52 = vrot.slane %v407_v39, 1 }
 0x1e7   :  { %v523_v43 = vrot.slane %v522_v42, 2  ;;  %v509_v47 = vadd.f32 %v508_v49, %v507_v38 }
 0x1e8   :  { %v409_v61 = vadd.f32 %v408_v52, %v407_v39 }
 0x1e9   :  { %v524_v50 = vadd.f32 %v523_v43, %v522_v42  ;;  %v510_v28 = vrot.slane %v509_v47, 2 }
 0x1eb   :  { %v525_v59 = vrot.slane %v524_v50, 1  ;;  %v511_v54 = vadd.f32 %v510_v28, %v509_v47 }
 0x1ed   :  { %v526_v62 = vadd.f32 %v525_v59, %v524_v50  ;;  %v512_v63 = vrot.slane %v511_v54, 1 }
 0x1ef   :  { %v513_v44 = vadd.f32 %v512_v63, %v511_v54  ;;  %v528_v55 = vadd.f32 %v526_v62, %v409_v61 }
 0x1f1   :  { %v527_v31 = vadd.f32 %v513_v44, %v396_v1  ;;  %v537_v0 = vadd.f32 %v1041_v60, %v528_v55 }
 0x1f3   :  { %v536_v16 = vadd.f32 %v1041_v60, %v527_v31  ;;  %v540_v23 = vrot.slane %v537_v0, 7 }
 0x1f5   :  { %v542_v33 = vsel %vm541_vm2, %v540_v23, %v536_v16 }
 0x1f6   :  { %v545_v2 = vsel %vm544_vm3, %v542_v33, -inf }
 0x1f7   :  { %546 = vmax.xlane.f32.xlu0 %v545_v2 }
 0x284   :  { %v547_v32 = vpop.xlane.xlu0 %546 }
 0x285   :  { %v549_v51 = vrot.slane %v547_v32, 1  ;;  %v552_v3 = vsub.f32 %v536_v16, %v547_v32  ;;  %v992_v4 = vpop.f32.mrb[16].mxu0 }
 0x286   :  { %v993_v5 = vadd.f32 %v1060_v45, %v992_v4  ;;  %v1181_v6 = vpop.f32.mrb[17].mxu0 }
 0x287   :  { %v553_v7 = vsub.f32 %v537_v0, %v549_v51  ;;  %v554_v8 = vmul.f32 1.442695, %v552_v3 }
 0x288   :  { %1232 = vtanh.f32 %v993_v5 }
 0x289   :  { %v556_v37 = vmul.f32 1.442695, %v553_v7 }
 0x28b   :  { %1234 = vpow2.f32 %v556_v37 }
 0x28c   :  { %1236 = vpow2.f32 %v554_v8 }
 0x292   :  { %v1233_v41 = vpop.eup %1232 }
 0x293   :  { %997 = vst [vmem:[%s1740_s12] sm:$0x3] %v1233_v41  ;;  %s1242_s12 = scalar_lea.vmem %s1005_s5, 32 }
 0x294   :  { %p1243_p0 = scmp.ne.s32.totalorder %s1005_s5, %s1242_s12  ;;  %p1248_p2 = scmp.lt.s32.totalorder %s1242_s12, %s1242_s12 }
 0x295   :  { %v1235_v9 = vpop.eup %1234 }
 0x296   :  { %v560_v40 = vrot.slane %v1235_v9, 7  ;;  %v1237_v10 = vpop.eup %1236  ;;  %p1249_p3 = por %p1248_p2, %p1247_p1 }
 0x298   :  { %v561_v56 = vsel %vm541_vm2, %v560_v40, %v1237_v10  ;;  %p1250_p4 = pnand %p1249_p3, %p1243_p0 }
 0x299   :  { %v563_v11 = vsel %vm544_vm3, %v561_v56, 0.0 }
 0x29a   :  { %564 = vadd.xlane.f32.xlu1 %v563_v11 }
 0x327   :  { %v565_v12 = vpop.xlane.xlu1 %564 }
 0x328   :  { %v567_v53 = vrot.slane %v565_v12, 1  ;;  %1238 = vrcp.f32 %v565_v12 }
 0x32a   :  { %1240 = vrcp.f32 %v567_v53 }
 0x332   :  { %v1239_v57 = vpop.eup %1238 }
 0x333   :  { %v571_v15 = vmul.f32 %v1239_v57, %v1237_v10 }
 0x334   :  { %v1241_v13 = vpop.eup %1240 }
 0x335   :  { %v573_v14 = vmul.f32 %v1241_v13, %v1235_v9 }
 0x337   :  { %v576_v48 = vrot.slane %v573_v14, 7 }
 0x339   :  { %v577_v29 = vsel %vm541_vm2, %v576_v48, %v571_v15 }
 0x33a   :  { %579 = vst [vmem:[#allocation3] sm:$0x3] %v577_v29 }
 0x33b   :  { %1253 = shalt.err (!%p1250_p4)
}
 0x33c   :  { %s1254_s21 = scalar_lea.hbm %s1739_s11, 32 }
 0x33d   :  { %p1255_p5 = scmp.ne.s32.totalorder %s1739_s11, %s1254_s21  ;;  %p1258_p6 = scmp.lt.u32.totalorder %s1254_s21, %s1739_s11 }
 0x33f   :  { %p1260_p7 = pnand %p1258_p6, %p1255_p5 }
 0x341   :  { %1263 = shalt.err (!%p1260_p7)
}
 0x342   :  { %1007 = dma.vmem_to_hbm [thread:$0]  %s1005_s5, 32, %s1739_s11, [#allocation4]  }
 0x343   :  { %1264 = dma.done.wait [#allocation4], 32  }
 0x344   :  { %1265 = vsyncadd [#allocation4], 4294967264 }
 0x345   :  { %1015 = vsyncpa [#allocation4], 1 }

// kernel: chess_model_forward.2
= control target key start
LH: loop header
LB: loop body
LE: loop exit
PB: predicated region body
PF: predicated region fallthrough
CT: control target
= control target key end

     0   :  { %s5613_s24 = smov 0   ;;  %s7733_s0 = inlined_call_operand.vmem [shape: f32[2,8,8,128], index: 0, kind: input, shape index: {}]   ;;  %s7734_s1 = inlined_call_operand.vmem [shape: bf16[1152,32], index: 1, kind: input, shape index: {}]   ;;  %s7735_s2 = inlined_call_operand.vmem [shape: f32[1,32], index: 2, kind: input, shape index: {}]   ;;  %s7736_s3 = inlined_call_operand.vmem [shape: f32[1,32], index: 3, kind: input, shape index: {}]   ;;  %s7737_s4 = inlined_call_operand.vmem [shape: bf16[3,2,288,32], index: 4, kind: input, shape index: {}]   ;;  %s7738_s5 = inlined_call_operand.vmem [shape: f32[3,2,32], index: 5, kind: input, shape index: {}]   ;;  %s7739_s6 = inlined_call_operand.vmem [shape: f32[3,2,32], index: 6, kind: input, shape index: {}]   ;;  %s7740_s7 = inlined_call_operand.vmem [shape: f32[128,32], index: 7, kind: output, shape index: {}]  }
   0x1 LB: > { %s5619_s25 = sadd.s32 4294967295, %s5567_s24   ;;  %p4250_p0 = scmp.ge.s32.totalorder %s5567_s24, 1  ;;  %s5567_s24 = sphi %s5613_s24, %s17_s24  }
   0x2   : > { %p286_p1 = scmp.lt.s32.totalorder %s5567_s24, 5 }
   0x4   : > { %p287_p2 = pnand %p4250_p0, %p286_p1 }
   0x5   : > { %s4251_s26 = sadd.s32 (!%p287_p2), 4294967295, %s5619_s25  ;;  %p4272_p5 = scmp.ne.s32.totalorder (!%p287_p2), %s5619_s25, 0 }
   0x6   : > { %290 = sbr.rel (%p287_p2) target bundleno = 1251 (0x4e3), region = 48  ;;  %p331_p3 = scmp.gt.s32.totalorder (!%p287_p2), %s4251_s26, 0 }
   0x7   : > { %p4252_p4 = scmp.lt.s32.totalorder (!%p287_p2), %s4251_s26, 2 }
   0xd   : > { %s7762_s26 = smov (!%p331_p3, %s4251_s26), 0  ;;  %365 = sbr.rel (%p4272_p5) target bundleno = 415 (0x19f), region = 52 }
   0xe   : > { %s7764_s26 = smov (!%p4252_p4, %s7762_s26), 2 }
   0xf   : > { %s4957_s27 = smul.u32 288, %s7764_s26  ;;  %s4264_s28 = sshll.u32 %s7764_s26, 1 }
  0x10   : > { %s5627_s8 = scalar_lea.vmem %s7738_s5, %s4264_s28  ;;  %s5632_s11 = scalar_lea.vmem %s7739_s6, %s4264_s28 }
  0x11   : > { %s5637_s14 = scalar_lea.vmem %s7737_s4, %s4957_s27 }
  0x14   : > { %v4970_v0 = vld [vmem:[%s7734_s1 + $0x40] sm:$0xff]   ;;  %v5569_v2 = vmov 0.0   ;;  %v4974_v5 = vld [vmem:[%s7734_s1 + $0x48] sm:$0xff]   ;;  %v4978_v9 = vld [vmem:[%s7734_s1 + $0x50] sm:$0xff]   ;;  %vm739_vm0 = vcmask 1046528   ;;  %vm804_vm1 = vcmask 1045504  }
  0x15   : > { %v4971_v1 = vld [vmem:[%s7734_s1 + $0xc0] sm:$0xff]   ;;  %448 = vst [vmem:[#allocation4] sm:$0xff] %v5569_v2  ;;  %449 = vst [vmem:[#allocation4 + $0x8] sm:$0x3] %v5569_v2  ;;  %4445 = vmatprep.subr.bf16.mxu0 %v4970_v0  ;;  %v4975_v6 = vld [vmem:[%s7734_s1 + $0xc8] sm:$0xff]   ;;  %v5786_v38 = vrot.slane %v5569_v2, 1 }
  0x16   : > { %450 = vst [vmem:[#allocation4 + $0x10] sm:$0xff] %v5569_v2  ;;  %451 = vst [vmem:[#allocation4 + $0x18] sm:$0x3] %v5569_v2  ;;  %v4972_v3 = vld [vmem:[%s7734_s1] sm:$0xff]   ;;  %4509 = vmatprep.subr.bf16.mxu1 %v4971_v1  ;;  %v4976_v7 = vld [vmem:[%s7734_s1 + $0x8] sm:$0xff]   ;;  %v5795_v43 = vrot.slane %v5569_v2, 2 }
  0x17   : > { %452 = vst [vmem:[#allocation4 + $0x20] sm:$0xff] %v5569_v2  ;;  %453 = vst [vmem:[#allocation4 + $0x28] sm:$0x3] %v5569_v2  ;;  %v4973_v4 = vld [vmem:[%s7734_s1 + $0x80] sm:$0xff]   ;;  %4446 = vmatpush3.bf16.msra.mxu0 %v4972_v3  ;;  %v4977_v8 = vld [vmem:[%s7734_s1 + $0x88] sm:$0xff]   ;;  %vm366_vm2 = vcmask 261120  }
  0x18   : > { %454 = vst [vmem:[#allocation4 + $0x30] sm:$0xff] %v5569_v2  ;;  %455 = vst [vmem:[#allocation4 + $0x38] sm:$0x3] %v5569_v2  ;;  %4510 = vmatpush3.bf16.msra.mxu1 %v4973_v4  ;;  %4447 = vmatprep.subr.bf16.mxu0 %v4974_v5  ;;  %v4979_v10 = vld [vmem:[%s7734_s1 + $0xd0] sm:$0xff]   ;;  %v4982_v13 = vld [vmem:[%s7734_s1 + $0x58] sm:$0xff]   ;;  %vm368_vm3 = vcmask 254976  }
  0x19   : > { %456 = vst [vmem:[#allocation4 + $0x40] sm:$0xff] %v5569_v2  ;;  %457 = vst [vmem:[#allocation4 + $0x48] sm:$0x3] %v5569_v2  ;;  %4511 = vmatprep.subr.bf16.mxu1 %v4975_v6  ;;  %v4980_v11 = vld [vmem:[%s7734_s1 + $0x10] sm:$0xff]   ;;  %v4983_v14 = vld [vmem:[%s7734_s1 + $0xd8] sm:$0xff]  }
  0x1a   : > { %458 = vst [vmem:[#allocation4 + $0x50] sm:$0xff] %v5569_v2  ;;  %459 = vst [vmem:[#allocation4 + $0x58] sm:$0x3] %v5569_v2  ;;  %v4981_v12 = vld [vmem:[%s7734_s1 + $0x90] sm:$0xff]   ;;  %v4984_v15 = vld [vmem:[%s7734_s1 + $0x18] sm:$0xff]  }
  0x1b   : > { %460 = vst [vmem:[#allocation4 + $0x60] sm:$0xff] %v5569_v2  ;;  %461 = vst [vmem:[#allocation4 + $0x68] sm:$0x3] %v5569_v2  ;;  %4448 = vmatpush3.bf16.msra.mxu0 %v4976_v7  ;;  %v4985_v16 = vld [vmem:[%s7734_s1 + $0x98] sm:$0xff]   ;;  %v4986_v17 = vld [vmem:[%s7734_s1 + $0x60] sm:$0xff]  }
  0x1c   : > { %462 = vst [vmem:[#allocation4 + $0x70] sm:$0xff] %v5569_v2  ;;  %463 = vst [vmem:[#allocation4 + $0x78] sm:$0x3] %v5569_v2  ;;  %4512 = vmatpush3.bf16.msra.mxu1 %v4977_v8  ;;  %4449 = vmatprep.subr.bf16.mxu0 %v4978_v9  ;;  %v4987_v18 = vld [vmem:[%s7734_s1 + $0xe0] sm:$0xff]   ;;  %v4990_v21 = vld [vmem:[%s7734_s1 + $0x68] sm:$0xff]  }
  0x1d   : > { %464 = vst [vmem:[#allocation4 + $0x80] sm:$0xff] %v5569_v2  ;;  %465 = vst [vmem:[#allocation4 + $0x88] sm:$0x3] %v5569_v2  ;;  %4513 = vmatprep.subr.bf16.mxu1 %v4979_v10  ;;  %v4988_v19 = vld [vmem:[%s7734_s1 + $0x20] sm:$0xff]   ;;  %v4991_v22 = vld [vmem:[%s7734_s1 + $0xe8] sm:$0xff]  }
  0x1e   : > { %467 = vst [vmem:[#allocation4 + $0x98] sm:$0x3] %v5569_v2  ;;  %469 = vst [vmem:[#allocation4 + $0xa8] sm:$0x3] %v5569_v2  ;;  %v4989_v20 = vld [vmem:[%s7734_s1 + $0xa0] sm:$0xff]   ;;  %v4992_v23 = vld [vmem:[%s7734_s1 + $0x28] sm:$0xff]  }
  0x1f   : > { %470 = vst [vmem:[#allocation4 + $0xb0] sm:$0xff] %v5569_v2  ;;  %471 = vst [vmem:[#allocation4 + $0xb8] sm:$0x3] %v5569_v2  ;;  %4450 = vmatpush3.bf16.msra.mxu0 %v4980_v11  ;;  %v4993_v24 = vld [vmem:[%s7734_s1 + $0xa8] sm:$0xff]   ;;  %v4994_v25 = vld [vmem:[%s7734_s1 + $0x70] sm:$0xff]  }
  0x20   : > { %472 = vst [vmem:[#allocation4 + $0xc0] sm:$0xff] %v5569_v2  ;;  %473 = vst [vmem:[#allocation4 + $0xc8] sm:$0x3] %v5569_v2  ;;  %4514 = vmatpush3.bf16.msra.mxu1 %v4981_v12  ;;  %4451 = vmatprep.subr.bf16.mxu0 %v4982_v13  ;;  %v4995_v26 = vld [vmem:[%s7734_s1 + $0xf0] sm:$0xff]   ;;  %v4998_v29 = vld [vmem:[%s7734_s1 + $0x78] sm:$0xff]  }
  0x21   : > { %474 = vst [vmem:[#allocation4 + $0xd0] sm:$0xff] %v5569_v2  ;;  %475 = vst [vmem:[#allocation4 + $0xd8] sm:$0x3] %v5569_v2  ;;  %4515 = vmatprep.subr.bf16.mxu1 %v4983_v14  ;;  %v4996_v27 = vld [vmem:[%s7734_s1 + $0x30] sm:$0xff]   ;;  %v4999_v30 = vld [vmem:[%s7734_s1 + $0xf8] sm:$0xff]  }
  0x22   : > { %476 = vst [vmem:[#allocation4 + $0xe0] sm:$0xff] %v5569_v2  ;;  %477 = vst [vmem:[#allocation4 + $0xe8] sm:$0x3] %v5569_v2  ;;  %v4997_v28 = vld [vmem:[%s7734_s1 + $0xb0] sm:$0xff]   ;;  %v5000_v31 = vld [vmem:[%s7734_s1 + $0x38] sm:$0xff]  }
  0x23   : > { %478 = vst [vmem:[#allocation4 + $0xf0] sm:$0xff] %v5569_v2  ;;  %479 = vst [vmem:[#allocation4 + $0xf8] sm:$0x3] %v5569_v2  ;;  %4452 = vmatpush3.bf16.msra.mxu0 %v4984_v15  ;;  %v5001_v32 = vld [vmem:[%s7734_s1 + $0xb8] sm:$0xff]   ;;  %v488_v33 = vld [vmem:[%s7733_s0] sm:$0xff] }
  0x24   : > { %480 = vst [vmem:[#allocation4 + $0x100] sm:$0xff] %v5569_v2  ;;  %481 = vst [vmem:[#allocation4 + $0x108] sm:$0x3] %v5569_v2  ;;  %4516 = vmatpush3.bf16.msra.mxu1 %v4985_v16  ;;  %4453 = vmatprep.subr.bf16.mxu0 %v4986_v17  ;;  %v489_v34 = vld [vmem:[%s7733_s0 + $0x8] sm:$0xff]  ;;  %v5002_v36 = vld [vmem:[%s7734_s1 + $0x140] sm:$0xff]  }
  0x25   : > { %482 = vst [vmem:[#allocation4 + $0x110] sm:$0xff] %v5569_v2  ;;  %483 = vst [vmem:[#allocation4 + $0x118] sm:$0x3] %v5569_v2  ;;  %4517 = vmatprep.subr.bf16.mxu1 %v4987_v18  ;;  %v668_v35 = vld [vmem:[#allocation4 + $0x8] sm:$0x3]  ;;  %v5003_v37 = vld [vmem:[%s7734_s1 + $0x1c0] sm:$0xff]  }
  0x26   : > { %484 = vst [vmem:[#allocation4 + $0x120] sm:$0xff] %v5569_v2  ;;  %485 = vst [vmem:[#allocation4 + $0x128] sm:$0x3] %v5569_v2  ;;  %v741_v39 = vrot.slane %v668_v35, 1  ;;  %v490_v40 = vld [vmem:[%s7733_s0 + $0x10] sm:$0xff]  ;;  %v491_v41 = vld [vmem:[%s7733_s0 + $0x18] sm:$0xff] }
  0x27   : > { %487 = vst [vmem:[#allocation4 + $0x138] sm:$0x3] %v5569_v2  ;;  %4454 = vmatpush3.bf16.msra.mxu0 %v4988_v19  ;;  %505 = vst [vmem:[#allocation4 + $0x11] sm:$0xff] %v488_v33  ;;  %v806_v42 = vrot.slane %v668_v35, 2  ;;  %v5004_v57 = vld [vmem:[%s7734_s1 + $0x100] sm:$0xff]   ;;  %v5006_v61 = vld [vmem:[%s7734_s1 + $0x148] sm:$0xff]  }
  0x28   : > { %4518 = vmatpush3.bf16.msra.mxu1 %v4989_v20  ;;  %4455 = vmatprep.subr.bf16.mxu0 %v4990_v21  ;;  %506 = vst [vmem:[#allocation4 + $0x21] sm:$0xff] %v489_v34  ;;  %507 = vst [vmem:[#allocation4 + $0x31] sm:$0xff] %v490_v40  ;;  %v742_v47 = vsel %vm739_vm0, %v5786_v38, %v741_v39  ;;  %v5005_v60 = vld [vmem:[%s7734_s1 + $0x180] sm:$0xff]   ;;  %v5007_v3 = vld [vmem:[%s7734_s1 + $0x1c8] sm:$0xff]  }
  0x29   : > { %4519 = vmatprep.subr.bf16.mxu1 %v4991_v22  ;;  %508 = vst [vmem:[#allocation4 + $0x41] sm:$0xff] %v491_v41  ;;  %v807_v55 = vsel %vm804_vm1, %v5795_v43, %v806_v42  ;;  %v492_v4 = vld [vmem:[%s7733_s0 + $0x20] sm:$0xff]  ;;  %v493_v5 = vld [vmem:[%s7733_s0 + $0x28] sm:$0xff] }
  0x2a   : > { %509 = vst [vmem:[#allocation4 + $0x51] sm:$0xff] %v492_v4  ;;  %510 = vst [vmem:[#allocation4 + $0x61] sm:$0xff] %v493_v5  ;;  %v5008_v17 = vld [vmem:[%s7734_s1 + $0x108] sm:$0xff]  }
  0x2b   : > { %4456 = vmatpush3.bf16.msra.mxu0 %v4992_v23  ;;  %v5009_v18 = vld [vmem:[%s7734_s1 + $0x188] sm:$0xff]   ;;  %v5010_v23 = vld [vmem:[%s7734_s1 + $0x150] sm:$0xff]  }
  0x2c   : > { %4520 = vmatpush3.bf16.msra.mxu1 %v4993_v24  ;;  %4457 = vmatprep.subr.bf16.mxu0 %v4994_v25  ;;  %v5011_v24 = vld [vmem:[%s7734_s1 + $0x1d0] sm:$0xff]  }
  0x2d   : > { %4521 = vmatprep.subr.bf16.mxu1 %v4995_v26 }
  0x2e   : > { %v669_v44 = vld [vmem:[#allocation4 + $0x10] sm:$0xff]  ;;  %v670_v45 = vld [vmem:[#allocation4 + $0x18] sm:$0x3] }
  0x2f   : > { %4458 = vmatpush3.bf16.msra.mxu0 %v4996_v27  ;;  %v671_v46 = vld [vmem:[#allocation4 + $0x20] sm:$0xff]  ;;  %v672_v48 = vld [vmem:[#allocation4 + $0x28] sm:$0x3]  ;;  %v743_v49 = vrot.slane %v669_v44, 1  ;;  %v744_v50 = vrot.slane %v670_v45, 1  ;;  %v809_v52 = vrot.slane %v670_v45, 2  ;;  %v909_v59 = vpack.c.bf16 %v669_v44, %v5569_v2 }
  0x30   : > { %4522 = vmatpush3.bf16.msra.mxu1 %v4997_v28  ;;  %4459 = vmatprep.subr.bf16.mxu0 %v4998_v29  ;;  %v746_v51 = vrot.slane %v671_v46, 1  ;;  %v747_v53 = vrot.slane %v672_v48, 1  ;;  %v912_v54 = vpack.c.bf16 %v671_v46, %v669_v44  ;;  %v808_v56 = vrot.slane %v669_v44, 2  ;;  %v673_v7 = vld [vmem:[#allocation4 + $0x30] sm:$0xff]  ;;  %v674_v8 = vld [vmem:[#allocation4 + $0x38] sm:$0x3] }
  0x31   : > { %4523 = vmatprep.subr.bf16.mxu1 %v4999_v30  ;;  %v5805_v58 = vsel %vm739_vm0, %v743_v49, %v744_v50  ;;  %v811_v0 = vrot.slane %v671_v46, 2  ;;  %v812_v1 = vrot.slane %v672_v48, 2  ;;  %v5828_v9 = vld [vmem:[#allocation4 + $0x40] sm:$0xff]  ;;  %v749_v11 = vrot.slane %v673_v7, 1  ;;  %v676_v14 = vld [vmem:[#allocation4 + $0x48] sm:$0x3] }
  0x32   : > { %v910_v62 = vpack.c.bf16 %v5805_v58, %v742_v47  ;;  %1524 = vmatprep.mubr.bf16.mxu1 %v912_v54  ;;  %v5816_v63 = vsel %vm804_vm1, %v808_v56, %v809_v52  ;;  %v5831_v10 = vsel %vm739_vm0, %v746_v51, %v747_v53  ;;  %v750_v12 = vrot.slane %v674_v8, 1  ;;  %v5012_v27 = vld [vmem:[%s7734_s1 + $0x110] sm:$0xff]   ;;  %v678_v34 = vld [vmem:[#allocation4 + $0x58] sm:$0x3]  ;;  %v5879_v35 = vld [vmem:[#allocation4 + $0x60] sm:$0xff] }
  0x33   : > { %4460 = vmatpush3.bf16.msra.mxu0 %v5000_v31  ;;  %v911_v6 = vpack.c.bf16 %v5816_v63, %v807_v55  ;;  %v918_v13 = vpack.c.bf16 %v5828_v9, %v673_v7  ;;  %v814_v15 = vrot.slane %v673_v7, 2  ;;  %v815_v16 = vrot.slane %v674_v8, 2  ;;  %v5013_v30 = vld [vmem:[%s7734_s1 + $0x190] sm:$0xff]   ;;  %v680_v44 = vld [vmem:[#allocation4 + $0x68] sm:$0x3]  ;;  %v5014_v50 = vld [vmem:[%s7734_s1 + $0x158] sm:$0xff]  }
  0x34   : > { %4524 = vmatpush3.bf16.msra.mxu1 %v5001_v32  ;;  %4573 = vmatprep.subr.bf16.mxu0 %v5002_v36  ;;  %v5841_v19 = vsel %vm739_vm0, %v749_v11, %v750_v12  ;;  %v5844_v20 = vsel %vm804_vm1, %v811_v0, %v812_v1  ;;  %v752_v21 = vrot.slane %v5828_v9, 1  ;;  %v753_v22 = vrot.slane %v676_v14, 1  ;;  %v494_v31 = vld [vmem:[%s7733_s0 + $0x30] sm:$0xff]  ;;  %v495_v32 = vld [vmem:[%s7733_s0 + $0x38] sm:$0xff]  ;;  %v5018_v11 = vld [vmem:[%s7734_s1 + $0x160] sm:$0xff]  }
  0x35   : > { %4637 = vmatprep.subr.bf16.mxu1 %v5003_v37  ;;  %1427 = vmatprep.mubr.bf16.mxu0 %v910_v62  ;;  %v5855_v25 = vpack.c.bf16 %v5841_v19, %v5831_v10  ;;  %v5858_v26 = vsel %vm804_vm1, %v814_v15, %v815_v16  ;;  %v5864_v28 = vpack.c.bf16 %v673_v7, %v671_v46  ;;  %v677_v33 = vld [vmem:[#allocation4 + $0x50] sm:$0xff]  ;;  %v817_v36 = vrot.slane %v5828_v9, 2  ;;  %v5015_v51 = vld [vmem:[%s7734_s1 + $0x1d8] sm:$0xff]   ;;  %v5019_v16 = vld [vmem:[%s7734_s1 + $0x1e0] sm:$0xff]  }
  0x36   : > { %1428 = vmatmul.mubr.bf16.vlgmr.msra.gmra.mrb[0].mxu0 %v909_v59  ;;  %v5868_v29 = vpack.c.bf16 %v5858_v26, %v5844_v20  ;;  %v818_v37 = vrot.slane %v676_v14, 2  ;;  %511 = vst [vmem:[#allocation4 + $0x71] sm:$0xff] %v494_v31  ;;  %512 = vst [vmem:[#allocation4 + $0x81] sm:$0xff] %v495_v32  ;;  %v5883_v39 = vsel %vm739_vm0, %v752_v21, %v753_v22  ;;  %v755_v40 = vrot.slane %v677_v33, 1  ;;  %v5016_v55 = vld [vmem:[%s7734_s1 + $0x118] sm:$0xff]  }
  0x37   : > { %1525 = vmatmul.mubr.bf16.vlgmr.msra.gmra.mrb[0].mxu1 %v911_v6  ;;  %4574 = vmatpush3.bf16.msra.mxu0 %v5004_v57  ;;  %v756_v41 = vrot.slane %v678_v34, 1  ;;  %v924_v42 = vpack.c.bf16 %v5879_v35, %v677_v33  ;;  %v820_v45 = vrot.slane %v677_v33, 2  ;;  %v821_v46 = vrot.slane %v678_v34, 2  ;;  %v5017_v56 = vld [vmem:[%s7734_s1 + $0x198] sm:$0xff]   ;;  %v496_v57 = vld [vmem:[%s7733_s0 + $0x40] sm:$0xff] }
  0x38   : > { %4638 = vmatpush3.bf16.msra.mxu1 %v5005_v60  ;;  %1532 = vmatprep.mubr.bf16.mxu1 %v918_v13  ;;  %7747 = vst [vmem:[#allocation5_spill] sm:$0xff] %v5868_v29  ;;  %v758_v48 = vrot.slane %v5879_v35, 1  ;;  %v759_v49 = vrot.slane %v680_v44, 1  ;;  %v5903_v53 = vsel %vm804_vm1, %v817_v36, %v818_v37  ;;  %v5918_v59 = vld [vmem:[#allocation4 + $0xa8] sm:$0x3]  ;;  %v5921_v60 = vpack.c.bf16 %v677_v33, %v5828_v9 }
  0x39   : > { %4575 = vmatprep.subr.bf16.mxu0 %v5006_v61  ;;  %4639 = vmatprep.subr.bf16.mxu1 %v5007_v3  ;;  %v5889_v47 = vsel %vm739_vm0, %v755_v40, %v756_v41  ;;  %v5906_v54 = vsel %vm804_vm1, %v820_v45, %v821_v46  ;;  %v823_v3 = vrot.slane %v5879_v35, 2  ;;  %v824_v4 = vrot.slane %v680_v44, 2  ;;  %513 = vst [vmem:[#allocation4 + $0xb1] sm:$0xff] %v496_v57  ;;  %v497_v9 = vld [vmem:[%s7733_s0 + $0x48] sm:$0xff] }
  0x3a   : > { %1435 = vmatprep.mubr.bf16.mxu0 %v5855_v25  ;;  %v5900_v52 = vpack.c.bf16 %v5889_v47, %v5883_v39  ;;  %v5925_v61 = vpack.c.bf16 %v5906_v54, %v5903_v53  ;;  %v5931_v5 = vsel %vm739_vm0, %v758_v48, %v759_v49  ;;  %514 = vst [vmem:[#allocation4 + $0xc1] sm:$0xff] %v497_v9  ;;  %v765_v15 = vrot.slane %v5918_v59, 1  ;;  %v5022_v36 = vld [vmem:[%s7734_s1 + $0x168] sm:$0xff]  }
  0x3b   : > { %4576 = vmatpush3.bf16.msra.mxu0 %v5008_v17  ;;  %v5957_v21 = vsel %vm804_vm1, %v823_v3, %v824_v4  ;;  %v830_v34 = vrot.slane %v5918_v59, 2  ;;  %v5025_v57 = vld [vmem:[%s7734_s1 + $0x1a8] sm:$0xff]   ;;  %v500_v59 = vld [vmem:[%s7733_s0 + $0x60] sm:$0xff] }
  0x3c   : > { %4640 = vmatpush3.bf16.msra.mxu1 %v5009_v18  ;;  %4577 = vmatprep.subr.bf16.mxu0 %v5010_v23  ;;  %7748 = vst [vmem:[#allocation6_spill] sm:$0xff] %v5925_v61  ;;  %v5020_v18 = vld [vmem:[%s7734_s1 + $0x120] sm:$0xff]   ;;  %v766_v33 = vsel %vm739_vm0, %v5786_v38, %v765_v15  ;;  %517 = vst [vmem:[#allocation4 + $0xf1] sm:$0xff] %v500_v59 }
  0x3d   : > { %4641 = vmatprep.subr.bf16.mxu1 %v5011_v24  ;;  %v681_v62 = vld [vmem:[#allocation4 + $0x70] sm:$0xff]  ;;  %v682_v0 = vld [vmem:[#allocation4 + $0x78] sm:$0x3]  ;;  %v5927_v1 = vld [vmem:[#allocation4 + $0x80] sm:$0xff] }
  0x3e   : > { %1436 = vmatmul.mubr.bf16.gmra.mrb[4].mxu0 %v5864_v28  ;;  %v761_v6 = vrot.slane %v681_v62, 1  ;;  %v762_v7 = vrot.slane %v682_v0, 1  ;;  %v930_v8 = vpack.c.bf16 %v5927_v1, %v681_v62  ;;  %v826_v12 = vrot.slane %v681_v62, 2  ;;  %v5021_v23 = vld [vmem:[%s7734_s1 + $0x1a0] sm:$0xff]   ;;  %v498_v24 = vld [vmem:[%s7733_s0 + $0x50] sm:$0xff] }
  0x3f   : > { %1533 = vmatmul.mubr.bf16.gmra.mrb[4].mxu1 %v5868_v29  ;;  %4578 = vmatpush3.bf16.msra.mxu0 %v5012_v27  ;;  %v827_v13 = vrot.slane %v682_v0, 2  ;;  %515 = vst [vmem:[#allocation4 + $0xd1] sm:$0xff] %v498_v24  ;;  %v499_v27 = vld [vmem:[%s7733_s0 + $0x58] sm:$0xff]  ;;  %v831_v0 = vsel %vm804_vm1, %v5795_v43, %v830_v34  ;;  %v5027_v34 = vld [vmem:[%s7734_s1 + $0x1f0] sm:$0xff]  }
  0x40   : > { %1540 = vmatprep.mubr.bf16.mxu1 %v924_v42  ;;  %4642 = vmatpush3.bf16.msra.mxu1 %v5013_v30  ;;  %v5941_v14 = vsel %vm739_vm0, %v761_v6, %v762_v7  ;;  %v5973_v30 = vpack.c.bf16 %v681_v62, %v5879_v35  ;;  %v689_v31 = vld [vmem:[#allocation4 + $0xb0] sm:$0xff]  ;;  %v690_v32 = vld [vmem:[#allocation4 + $0xb8] sm:$0x3]  ;;  %516 = vst [vmem:[#allocation4 + $0xe1] sm:$0xff] %v499_v27  ;;  %v5023_v42 = vld [vmem:[%s7734_s1 + $0x1e8] sm:$0xff]  }
  0x41   : > { %4579 = vmatprep.subr.bf16.mxu0 %v5014_v50  ;;  %1443 = vmatprep.mubr.bf16.mxu0 %v5900_v52  ;;  %v5951_v17 = vpack.c.bf16 %v5941_v14, %v5931_v5  ;;  %v5960_v22 = vsel %vm804_vm1, %v826_v12, %v827_v13  ;;  %v767_v40 = vrot.slane %v689_v31, 1  ;;  %v768_v35 = vrot.slane %v690_v32, 1  ;;  %v5988_v44 = vld [vmem:[#allocation4 + $0xc0] sm:$0xff]  ;;  %v692_v46 = vld [vmem:[#allocation4 + $0xc8] sm:$0x3] }
  0x42   : > { %4643 = vmatprep.subr.bf16.mxu1 %v5015_v51  ;;  %v5983_v37 = vpack.c.bf16 %v5960_v22, %v5957_v21  ;;  %v832_v41 = vrot.slane %v689_v31, 2  ;;  %v833_v45 = vrot.slane %v690_v32, 2  ;;  %v939_v49 = vpack.c.bf16 %v5988_v44, %v689_v31  ;;  %v501_v62 = vld [vmem:[%s7733_s0 + $0x68] sm:$0xff] }
  0x43   : > { %4580 = vmatpush3.bf16.msra.mxu0 %v5016_v55  ;;  %v5991_v48 = vsel %vm739_vm0, %v767_v40, %v768_v35  ;;  %v770_v50 = vrot.slane %v5988_v44, 1  ;;  %v771_v51 = vrot.slane %v692_v46, 1  ;;  %518 = vst [vmem:[#allocation4 + $0x101] sm:$0xff] %v501_v62  ;;  %v835_v12 = vrot.slane %v5988_v44, 2  ;;  %v5028_v40 = vld [vmem:[%s7734_s1 + $0x130] sm:$0xff]  }
  0x44   : > { %4644 = vmatpush3.bf16.msra.mxu1 %v5017_v56  ;;  %4581 = vmatprep.subr.bf16.mxu0 %v5018_v11  ;;  %7749 = vst [vmem:[#allocation7_spill] sm:$0xff] %v5983_v37  ;;  %v937_v55 = vpack.c.bf16 %v5991_v48, %v766_v33  ;;  %v5024_v56 = vld [vmem:[%s7734_s1 + $0x128] sm:$0xff]   ;;  %v6013_v3 = vsel %vm804_vm1, %v832_v41, %v833_v45  ;;  %v836_v15 = vrot.slane %v692_v46, 2  ;;  %v5029_v35 = vld [vmem:[%s7734_s1 + $0x1b0] sm:$0xff]  }
  0x45   : > { %4645 = vmatprep.subr.bf16.mxu1 %v5019_v16  ;;  %v6016_v7 = vsel %vm739_vm0, %v770_v50, %v771_v51  ;;  %v936_v13 = vpack.c.bf16 %v689_v31, %v5569_v2  ;;  %v502_v41 = vld [vmem:[%s7733_s0 + $0x70] sm:$0xff] }
  0x46   : > { %1444 = vmatmul.mubr.bf16.gmra.mrb[8].mxu0 %v5921_v60  ;;  %v693_v4 = vld [vmem:[#allocation4 + $0xd0] sm:$0xff]  ;;  %v694_v6 = vld [vmem:[#allocation4 + $0xd8] sm:$0x3]  ;;  %v6054_v45 = vsel %vm804_vm1, %v835_v12, %v836_v15  ;;  %519 = vst [vmem:[#allocation4 + $0x111] sm:$0xff] %v502_v41 }
  0x47   : > { %1541 = vmatmul.mubr.bf16.gmra.mrb[8].mxu1 %v5925_v61  ;;  %1451 = vmatprep.mubr.bf16.mxu0 %v5951_v17  ;;  %v774_v9 = vrot.slane %v694_v6, 1  ;;  %v6018_v11 = vld [vmem:[#allocation4 + $0xe0] sm:$0xff]  ;;  %v6022_v16 = vld [vmem:[#allocation4 + $0xe8] sm:$0x3]  ;;  %v838_v27 = vrot.slane %v693_v4, 2  ;;  %v839_v32 = vrot.slane %v694_v6, 2  ;;  %v6077_v15 = vpack.c.bf16 %v693_v4, %v5988_v44 }
  0x48   : > { %1548 = vmatprep.mubr.bf16.mxu1 %v930_v8  ;;  %4582 = vmatpush3.bf16.msra.mxu0 %v5020_v18  ;;  %v773_v8 = vrot.slane %v693_v4, 1  ;;  %v5026_v18 = vld [vmem:[%s7734_s1 + $0x170] sm:$0xff]   ;;  %v945_v2 = vpack.c.bf16 %v6018_v11, %v693_v4  ;;  %v776_v31 = vrot.slane %v6018_v11, 1  ;;  %v842_v62 = vrot.slane %v6022_v16, 2  ;;  %v5030_v12 = vld [vmem:[%s7734_s1 + $0x178] sm:$0xff]  }
  0x49   : > { %4646 = vmatpush3.bf16.msra.mxu1 %v5021_v23  ;;  %4583 = vmatprep.subr.bf16.mxu0 %v5022_v36  ;;  %v938_v23 = vpack.c.bf16 %v6013_v3, %v831_v0  ;;  %v777_v36 = vrot.slane %v6022_v16, 1  ;;  %v697_v46 = vld [vmem:[#allocation4 + $0xf0] sm:$0xff]  ;;  %v6058_v50 = vsel %vm804_vm1, %v838_v27, %v839_v32  ;;  %v5032_v32 = vld [vmem:[%s7734_s1 + $0x138] sm:$0xff]  }
  0x4a   : > { %4647 = vmatprep.subr.bf16.mxu1 %v5023_v42  ;;  %v6029_v24 = vsel %vm739_vm0, %v773_v8, %v774_v9  ;;  %v503_v42 = vld [vmem:[%s7733_s0 + $0x78] sm:$0xff]  ;;  %v779_v51 = vrot.slane %v697_v46, 1  ;;  %v6064_v59 = vld [vmem:[#allocation4 + $0x100] sm:$0xff]  ;;  %v700_v0 = vld [vmem:[#allocation4 + $0x108] sm:$0x3]  ;;  %v844_v8 = vrot.slane %v697_v46, 2  ;;  %v6081_v16 = vpack.c.bf16 %v6058_v50, %v6054_v45 }
  0x4b   : > { %v6033_v33 = vpack.c.bf16 %v6029_v24, %v6016_v7  ;;  %520 = vst [vmem:[#allocation4 + $0x121] sm:$0xff] %v503_v42  ;;  %v782_v27 = vrot.slane %v6064_v59, 1  ;;  %v783_v44 = vrot.slane %v700_v0, 1  ;;  %v5033_v4 = vld [vmem:[%s7734_s1 + $0x1b8] sm:$0xff]  }
  0x4c   : > { %4584 = vmatpush3.bf16.msra.mxu0 %v5024_v56  ;;  %v841_v56 = vrot.slane %v6018_v11, 2  ;;  %7750 = vst [vmem:[#allocation8_spill] sm:$0xff] %v6081_v16 }
  0x4d   : > { %4648 = vmatpush3.bf16.msra.mxu1 %v5025_v57  ;;  %4585 = vmatprep.subr.bf16.mxu0 %v5026_v18  ;;  %v6062_v57 = vsel %vm739_vm0, %v776_v31, %v777_v36  ;;  %v702_v31 = vld [vmem:[#allocation4 + $0x118] sm:$0x3] }
  0x4e   : > { %1452 = vmatmul.mubr.bf16.gmra.mrb[12].mxu0 %v5973_v30  ;;  %4649 = vmatprep.subr.bf16.mxu1 %v5027_v34  ;;  %v786_v36 = vrot.slane %v702_v31, 1 }
  0x4f   : > { %1549 = vmatmul.mubr.bf16.gmra.mrb[12].mxu1 %v5983_v37  ;;  %1459 = vmatprep.mubr.bf16.mxu0 %v937_v55  ;;  %v706_v37 = vld [vmem:[#allocation4 + $0x138] sm:$0x3] }
  0x50   : > { %1556 = vmatprep.mubr.bf16.mxu1 %v939_v49  ;;  %v698_v49 = vld [vmem:[#allocation4 + $0xf8] sm:$0x3]  ;;  %4586 = vmatpush3.bf16.msra.mxu0 %v5028_v40  ;;  %v6100_v40 = vld [vmem:[%s7734_s1 + $0x200] sm:$0xff]  }
  0x51   : > { %v780_v55 = vrot.slane %v698_v49, 1  ;;  %4650 = vmatpush3.bf16.msra.mxu1 %v5029_v35  ;;  %v845_v9 = vrot.slane %v698_v49, 2  ;;  %4587 = vmatprep.subr.bf16.mxu0 %v5030_v12  ;;  %v6104_v35 = vsel %vm804_vm1, %v841_v56, %v842_v62  ;;  %v873_v49 = vrot.slane %v5927_v1, 1  ;;  %v684_v56 = vld [vmem:[#allocation4 + $0x88] sm:$0x3] }
  0x52   : > { %v6109_v42 = vld [vmem:[#allocation4 + $0x120] sm:$0xff]  ;;  %v847_v12 = vrot.slane %v6064_v59, 2  ;;  %v881_v62 = vrot.slane %v5927_v1, 2 }
  0x53   : > { %v6068_v6 = vsel %vm739_vm0, %v779_v51, %v780_v55  ;;  %v6107_v41 = vsel %vm804_vm1, %v844_v8, %v845_v9  ;;  %v6113_v51 = vsel %vm739_vm0, %v782_v27, %v783_v44  ;;  %v6122_v8 = vpack.c.bf16 %v697_v46, %v6018_v11 }
  0x54   : > { %v6085_v18 = vpack.c.bf16 %v6068_v6, %v6062_v57  ;;  %4588 = vmatpush3.bf16.msra.mxu0 %v5032_v32  ;;  %7751 = vst [vmem:[#allocation9_spill] sm:$0xff] %v6113_v51  ;;  %v848_v9 = vrot.slane %v700_v0, 2  ;;  %v6127_v27 = vpack.c.bf16 %v6107_v41, %v6104_v35  ;;  %v882_v44 = vrot.slane %v684_v56, 2 }
  0x55   : > { %4865 = vmatprep.subr.bf16.mxu0 %v6100_v40  ;;  %v851_v11 = vrot.slane %v702_v31, 2  ;;  %v876_v61 = vrot.slane %v6109_v42, 1  ;;  %v704_v31 = vld [vmem:[#allocation4 + $0x128] sm:$0x3] }
  0x56   : > { %1460 = vmatmul.mubr.bf16.gmra.mrb[16].mxu0 %v936_v13  ;;  %v5031_v13 = vld [vmem:[%s7734_s1 + $0x1f8] sm:$0xff]   ;;  %7752 = vst [vmem:[#allocation10_spill] sm:$0xff] %v6127_v27 }
  0x57   : > { %1557 = vmatmul.mubr.bf16.gmra.mrb[16].mxu1 %v938_v23  ;;  %1467 = vmatprep.mubr.bf16.mxu0 %v6033_v33  ;;  %v951_v23 = vpack.c.bf16 %v6064_v59, %v697_v46 }
  0x58   : > { %1564 = vmatprep.mubr.bf16.mxu1 %v945_v2  ;;  %4651 = vmatprep.subr.bf16.mxu1 %v5031_v13  ;;  %v701_v2 = vld [vmem:[#allocation4 + $0x110] sm:$0xff]  ;;  %v686_v13 = vld [vmem:[#allocation4 + $0x98] sm:$0x3] }
  0x59   : > { %v785_v34 = vrot.slane %v701_v2, 1  ;;  %4652 = vmatpush3.bf16.msra.mxu1 %v5033_v4  ;;  %v957_v32 = vpack.c.bf16 %v6109_v42, %v701_v2  ;;  %v894_v4 = vrot.slane %v686_v13, 1 }
  0x5a   : > { %4937 = vmatprep.subr.bf16.mxu1 %v6100_v40 }
  0x5b   : > { %v6116_v55 = vsel %vm739_vm0, %v785_v34, %v786_v36  ;;  %v850_v36 = vrot.slane %v701_v2, 2  ;;  %v6139_v0 = vsel %vm739_vm0, %v5786_v38, %v894_v4  ;;  %v885_v4 = vrot.slane %v704_v31, 2 }
  0x5c   : > { %v6132_v34 = vpack.c.bf16 %v6116_v55, %v6113_v51  ;;  %v877_v51 = vrot.slane %v704_v31, 1 }
  0x5e   : > { %1468 = vmatmul.mubr.bf16.gmra.mrb[20].mxu0 %v6077_v15 }
  0x5f   : > { %1565 = vmatmul.mubr.bf16.gmra.mrb[20].mxu1 %v6081_v16  ;;  %1475 = vmatprep.mubr.bf16.mxu0 %v6085_v18  ;;  %v6145_v16 = vsel %vm804_vm1, %v847_v12, %v848_v9  ;;  %v6161_v9 = vsel %vm804_vm1, %v850_v36, %v851_v11  ;;  %v6182_v11 = vpack.c.bf16 %v701_v2, %v6064_v59  ;;  %v5035_v2 = vld [vmem:[%s7734_s1 + $0x208] sm:$0xff]  }
  0x60   : > { %1572 = vmatprep.mubr.bf16.mxu1 %v951_v23  ;;  %v874_v23 = vrot.slane %v684_v56, 1  ;;  %v902_v56 = vrot.slane %v686_v13, 2  ;;  %v897_v13 = vrot.slane %v706_v37, 1  ;;  %v920_v59 = vpack.c.bf16 %v5903_v53, %v5858_v26 }
  0x62   : > { %v6135_v46 = vsel %vm739_vm0, %v873_v49, %v874_v23  ;;  %v884_v49 = vrot.slane %v6109_v42, 2  ;;  %v6153_v23 = vsel %vm804_vm1, %v881_v62, %v882_v44  ;;  %v6157_v12 = vsel %vm804_vm1, %v5795_v43, %v902_v56 }
  0x63   : > { %v935_v29 = vpack.c.bf16 %v6157_v12, %v6153_v23  ;;  %v6166_v62 = vsel %vm739_vm0, %v876_v61, %v877_v51  ;;  %v6173_v56 = vsel %vm739_vm0, %v5786_v38, %v897_v13  ;;  %v6186_v61 = vpack.c.bf16 %v6161_v9, %v6145_v16 }
  0x64   : > { %v6169_v44 = vsel %vm804_vm1, %v884_v49, %v885_v4  ;;  %v914_v51 = vpack.c.bf16 %v5844_v20, %v5816_v63  ;;  %v919_v63 = vpack.c.bf16 %v5883_v39, %v5841_v19  ;;  %v5037_v20 = vld [vmem:[%s7734_s1 + $0x218] sm:$0xff]   ;;  %v5038_v19 = vld [vmem:[%s7734_s1 + $0x220] sm:$0xff]   ;;  %v932_v26 = vpack.c.bf16 %v6153_v23, %v5960_v22 }
  0x65   : > { %v7753_v39 = vpack.c.bf16 %v6139_v0, %v6135_v46  ;;  %v7755_v22 = vld [vmem:[#allocation9_spill] sm:$0xff] }
  0x66   : > { %1476 = vmatmul.mubr.bf16.gmra.mrb[24].mxu0 %v6122_v8 }
  0x67   : > { %1573 = vmatmul.mubr.bf16.gmra.mrb[24].mxu1 %v6127_v27  ;;  %1483 = vmatprep.mubr.bf16.mxu0 %v6132_v34  ;;  %v905_v27 = vrot.slane %v706_v37, 2  ;;  %v961_v37 = vpack.c.bf16 %v6173_v56, %v6166_v62 }
  0x68   : > { %1580 = vmatprep.mubr.bf16.mxu1 %v957_v32  ;;  %v958_v32 = vpack.c.bf16 %v6166_v62, %v6116_v55 }
  0x69   : > { %v6179_v36 = vsel %vm804_vm1, %v5795_v43, %v905_v27  ;;  %v913_v43 = vpack.c.bf16 %v5831_v10, %v5805_v58  ;;  %v5036_v58 = vld [vmem:[%s7734_s1 + $0x210] sm:$0xff]   ;;  %v926_v10 = vpack.c.bf16 %v5957_v21, %v5906_v54  ;;  %v941_v54 = vpack.c.bf16 %v6054_v45, %v6013_v3  ;;  %v7759_v45 = vld [vmem:[#allocation10_spill] sm:$0xff] }
  0x6a   : > { %v962_v38 = vpack.c.bf16 %v6179_v36, %v6169_v44  ;;  %v953_v21 = vpack.c.bf16 %v6145_v16, %v6107_v41 }
  0x6e   : > { %1484 = vmatmul.mubr.bf16.gmra.mrb[28].mxu0 %v6182_v11 }
  0x6f   : > { %1581 = vmatmul.mubr.bf16.gmra.mrb[28].mxu1 %v6186_v61  ;;  %1621 = vmatprep.mubr.bf16.mxu0 %v914_v51 }
  0x70   : > { %1718 = vmatprep.mubr.bf16.mxu1 %v5855_v25  ;;  %v925_v25 = vpack.c.bf16 %v5931_v5, %v5889_v47  ;;  %v5040_v47 = vld [vmem:[%s7734_s1 + $0x230] sm:$0xff]   ;;  %v7754_v5 = vpack.c.bf16 %v6135_v46, %v5941_v14  ;;  %v946_v14 = vpack.c.bf16 %v6062_v57, %v6029_v24  ;;  %v7757_v24 = vld [vmem:[#allocation8_spill] sm:$0xff] }
  0x76   : > { %1622 = vmatmul.mubr.bf16.vlgmr.msra.gmra.mrb[32].mxu0 %v913_v43 }
  0x77   : > { %1719 = vmatmul.mubr.bf16.vlgmr.msra.gmra.mrb[32].mxu1 %v5864_v28  ;;  %4866 = vmatpush3.bf16.msra.mxu0 %v6100_v40  ;;  %v5039_v28 = vld [vmem:[%s7734_s1 + $0x228] sm:$0xff]  }
  0x78   : > { %4945 = vmatpush3.bf16.msra.mxu1 %v6100_v40  ;;  %1629 = vmatprep.mubr.bf16.mxu0 %v920_v59 }
  0x79   : > { %1726 = vmatprep.mubr.bf16.mxu1 %v5900_v52  ;;  %4867 = vmatprep.subr.bf16.mxu0 %v5035_v2  ;;  %v6237_v52 = vld [vmem:[#allocation4] sm:$0xff] }
  0x7a   : > { %4938 = vmatprep.subr.bf16.mxu1 %v5035_v2  ;;  %v933_v53 = vpack.c.bf16 %v6237_v52, %v5927_v1  ;;  %v940_v1 = vpack.c.bf16 %v6016_v7, %v5991_v48  ;;  %v959_v48 = vpack.c.bf16 %v6169_v44, %v6161_v9  ;;  %v960_v3 = vpack.c.bf16 %v6237_v52, %v6109_v42  ;;  %v7756_v7 = vld [vmem:[#allocation5_spill] sm:$0xff] }
  0x7b   : > { %4868 = vmatpush3.bf16.msra.mxu0 %v5035_v2  ;;  %367 = vst.msk [vmem:[#allocation2] sm:$0xff] %vm366_vm2, %v6237_v52  ;;  %374 = vst.msk [vmem:[#allocation2 + $0x30] sm:$0xff] %vm366_vm2, %v6237_v52 }
  0x7c   : > { %4946 = vmatpush3.bf16.msra.mxu1 %v5035_v2  ;;  %4869 = vmatprep.subr.bf16.mxu0 %v5036_v58  ;;  %369 = vst.msk [vmem:[#allocation2 + $0x8] sm:$0x3] %vm368_vm3, %v6237_v52  ;;  %375 = vst.msk [vmem:[#allocation2 + $0x38] sm:$0x3] %vm368_vm3, %v6237_v52 }
  0x7d   : > { %4939 = vmatprep.subr.bf16.mxu1 %v5036_v58  ;;  %386 = vst.msk [vmem:[#allocation2 + $0x90] sm:$0xff] %vm366_vm2, %v6237_v52  ;;  %388 = vst.msk [vmem:[#allocation2 + $0xa0] sm:$0xff] %vm366_vm2, %v6237_v52 }
  0x7e   : > { %1630 = vmatmul.mubr.bf16.gmra.mrb[36].mxu0 %v919_v63  ;;  %387 = vst.msk [vmem:[#allocation2 + $0x98] sm:$0x3] %vm368_vm3, %v6237_v52  ;;  %389 = vst.msk [vmem:[#allocation2 + $0xa8] sm:$0x3] %vm368_vm3, %v6237_v52 }
  0x7f   : > { %1727 = vmatmul.mubr.bf16.gmra.mrb[36].mxu1 %v5921_v60  ;;  %1637 = vmatprep.mubr.bf16.mxu0 %v926_v10  ;;  %v5041_v60 = vld [vmem:[%s7734_s1 + $0x238] sm:$0xff]   ;;  %406 = vst.msk [vmem:[#allocation2 + $0x130] sm:$0xff] %vm366_vm2, %v6237_v52  ;;  %408 = vst.msk [vmem:[#allocation3] sm:$0xff] %vm366_vm2, %v6237_v52 }
  0x80   : > { %1734 = vmatprep.mubr.bf16.mxu1 %v5951_v17  ;;  %4870 = vmatpush3.bf16.msra.mxu0 %v5036_v58  ;;  %v947_v17 = vpack.c.bf16 %v6104_v35, %v6058_v50  ;;  %v7760_v50 = vld [vmem:[#allocation7_spill] sm:$0xff]  ;;  %407 = vst.msk [vmem:[#allocation2 + $0x138] sm:$0x3] %vm368_vm3, %v6237_v52  ;;  %409 = vst.msk [vmem:[#allocation3 + $0x8] sm:$0x3] %vm368_vm3, %v6237_v52 }
  0x81   : > { %4947 = vmatpush3.bf16.msra.mxu1 %v5036_v58  ;;  %4871 = vmatprep.subr.bf16.mxu0 %v5037_v20  ;;  %410 = vst.msk [vmem:[#allocation3 + $0x10] sm:$0xff] %vm366_vm2, %v6237_v52  ;;  %412 = vst.msk [vmem:[#allocation3 + $0x20] sm:$0xff] %vm366_vm2, %v6237_v52 }
  0x82   : > { %4940 = vmatprep.subr.bf16.mxu1 %v5037_v20  ;;  %411 = vst.msk [vmem:[#allocation3 + $0x18] sm:$0x3] %vm368_vm3, %v6237_v52  ;;  %413 = vst.msk [vmem:[#allocation3 + $0x28] sm:$0x3] %vm368_vm3, %v6237_v52 }
  0x83   : > { %414 = vst.msk [vmem:[#allocation3 + $0x30] sm:$0xff] %vm366_vm2, %v6237_v52  ;;  %416 = vst.msk [vmem:[#allocation3 + $0x40] sm:$0xff] %vm366_vm2, %v6237_v52 }
  0x84   : > { %4872 = vmatpush3.bf16.msra.mxu0 %v5037_v20  ;;  %415 = vst.msk [vmem:[#allocation3 + $0x38] sm:$0x3] %vm368_vm3, %v6237_v52  ;;  %417 = vst.msk [vmem:[#allocation3 + $0x48] sm:$0x3] %vm368_vm3, %v6237_v52 }
  0x85   : > { %4948 = vmatpush3.bf16.msra.mxu1 %v5037_v20  ;;  %4873 = vmatprep.subr.bf16.mxu0 %v5038_v19  ;;  %418 = vst.msk [vmem:[#allocation3 + $0x50] sm:$0xff] %vm366_vm2, %v6237_v52  ;;  %420 = vst.msk [vmem:[#allocation3 + $0x60] sm:$0xff] %vm366_vm2, %v6237_v52 }
  0x86   : > { %4941 = vmatprep.subr.bf16.mxu1 %v5038_v19  ;;  %1638 = vmatmul.mubr.bf16.gmra.mrb[40].mxu0 %v925_v25  ;;  %419 = vst.msk [vmem:[#allocation3 + $0x58] sm:$0x3] %vm368_vm3, %v6237_v52  ;;  %421 = vst.msk [vmem:[#allocation3 + $0x68] sm:$0x3] %vm368_vm3, %v6237_v52 }
  0x87   : > { %1735 = vmatmul.mubr.bf16.gmra.mrb[40].mxu1 %v5973_v30  ;;  %1645 = vmatprep.mubr.bf16.mxu0 %v932_v26  ;;  %v952_v30 = vpack.c.bf16 %v7755_v22, %v6068_v6  ;;  %422 = vst.msk [vmem:[#allocation3 + $0x70] sm:$0xff] %vm366_vm2, %v6237_v52  ;;  %424 = vst.msk [vmem:[#allocation3 + $0x80] sm:$0xff] %vm366_vm2, %v6237_v52 }
  0x88   : > { %1742 = vmatprep.mubr.bf16.mxu1 %v7753_v39  ;;  %4874 = vmatpush3.bf16.msra.mxu0 %v5038_v19  ;;  %423 = vst.msk [vmem:[#allocation3 + $0x78] sm:$0x3] %vm368_vm3, %v6237_v52  ;;  %425 = vst.msk [vmem:[#allocation3 + $0x88] sm:$0x3] %vm368_vm3, %v6237_v52 }
  0x89   : > { %4949 = vmatpush3.bf16.msra.mxu1 %v5038_v19  ;;  %4875 = vmatprep.subr.bf16.mxu0 %v5039_v28  ;;  %426 = vst.msk [vmem:[#allocation3 + $0x90] sm:$0xff] %vm366_vm2, %v6237_v52  ;;  %428 = vst.msk [vmem:[#allocation3 + $0xa0] sm:$0xff] %vm366_vm2, %v6237_v52 }
  0x8a   : > { %4942 = vmatprep.subr.bf16.mxu1 %v5039_v28  ;;  %427 = vst.msk [vmem:[#allocation3 + $0x98] sm:$0x3] %vm368_vm3, %v6237_v52  ;;  %429 = vst.msk [vmem:[#allocation3 + $0xa8] sm:$0x3] %vm368_vm3, %v6237_v52 }
  0x8b   : > { %430 = vst.msk [vmem:[#allocation3 + $0xb0] sm:$0xff] %vm366_vm2, %v6237_v52  ;;  %432 = vst.msk [vmem:[#allocation3 + $0xc0] sm:$0xff] %vm366_vm2, %v6237_v52 }
  0x8c   : > { %4876 = vmatpush3.bf16.msra.mxu0 %v5039_v28  ;;  %431 = vst.msk [vmem:[#allocation3 + $0xb8] sm:$0x3] %vm368_vm3, %v6237_v52  ;;  %433 = vst.msk [vmem:[#allocation3 + $0xc8] sm:$0x3] %vm368_vm3, %v6237_v52 }
  0x8d   : > { %4950 = vmatpush3.bf16.msra.mxu1 %v5039_v28  ;;  %4877 = vmatprep.subr.bf16.mxu0 %v5040_v47  ;;  %434 = vst.msk [vmem:[#allocation3 + $0xd0] sm:$0xff] %vm366_vm2, %v6237_v52  ;;  %436 = vst.msk [vmem:[#allocation3 + $0xe0] sm:$0xff] %vm366_vm2, %v6237_v52 }
  0x8e   : > { %4943 = vmatprep.subr.bf16.mxu1 %v5040_v47  ;;  %1646 = vmatmul.mubr.bf16.gmra.mrb[44].mxu0 %v7754_v5  ;;  %435 = vst.msk [vmem:[#allocation3 + $0xd8] sm:$0x3] %vm368_vm3, %v6237_v52  ;;  %437 = vst.msk [vmem:[#allocation3 + $0xe8] sm:$0x3] %vm368_vm3, %v6237_v52 }
  0x8f   : > { %1743 = vmatmul.mubr.bf16.gmra.mrb[44].mxu1 %v933_v53  ;;  %1653 = vmatprep.mubr.bf16.mxu0 %v941_v54  ;;  %438 = vst.msk [vmem:[#allocation3 + $0xf0] sm:$0xff] %vm366_vm2, %v6237_v52  ;;  %440 = vst.msk [vmem:[#allocation3 + $0x100] sm:$0xff] %vm366_vm2, %v6237_v52 }
  0x90   : > { %1750 = vmatprep.mubr.bf16.mxu1 %v6033_v33  ;;  %4878 = vmatpush3.bf16.msra.mxu0 %v5040_v47  ;;  %v7758_v33 = vld [vmem:[#allocation6_spill] sm:$0xff]  ;;  %439 = vst.msk [vmem:[#allocation3 + $0xf8] sm:$0x3] %vm368_vm3, %v6237_v52  ;;  %441 = vst.msk [vmem:[#allocation3 + $0x108] sm:$0x3] %vm368_vm3, %v6237_v52 }
  0x91   : > { %4951 = vmatpush3.bf16.msra.mxu1 %v5040_v47  ;;  %4879 = vmatprep.subr.bf16.mxu0 %v5041_v60  ;;  %442 = vst.msk [vmem:[#allocation3 + $0x110] sm:$0xff] %vm366_vm2, %v6237_v52  ;;  %444 = vst.msk [vmem:[#allocation3 + $0x120] sm:$0xff] %vm366_vm2, %v6237_v52 }
  0x92   : > { %4944 = vmatprep.subr.bf16.mxu1 %v5041_v60  ;;  %443 = vst.msk [vmem:[#allocation3 + $0x118] sm:$0x3] %vm368_vm3, %v6237_v52  ;;  %445 = vst.msk [vmem:[#allocation3 + $0x128] sm:$0x3] %vm368_vm3, %v6237_v52 }
  0x93   : > { %446 = vst.msk [vmem:[#allocation3 + $0x130] sm:$0xff] %vm366_vm2, %v6237_v52  ;;  %370 = vst.msk [vmem:[#allocation2 + $0x10] sm:$0xff] %vm366_vm2, %v6237_v52 }
  0x94   : > { %4880 = vmatpush3.bf16.msra.mxu0 %v5041_v60  ;;  %447 = vst.msk [vmem:[#allocation3 + $0x138] sm:$0x3] %vm368_vm3, %v6237_v52  ;;  %371 = vst.msk [vmem:[#allocation2 + $0x18] sm:$0x3] %vm368_vm3, %v6237_v52 }
  0x95   : > { %4952 = vmatpush3.bf16.msra.mxu1 %v5041_v60  ;;  %372 = vst.msk [vmem:[#allocation2 + $0x20] sm:$0xff] %vm366_vm2, %v6237_v52  ;;  %376 = vst.msk [vmem:[#allocation2 + $0x40] sm:$0xff] %vm366_vm2, %v6237_v52 }
  0x96   : > { %1654 = vmatmul.mubr.bf16.gmra.mrb[48].mxu0 %v940_v1  ;;  %373 = vst.msk [vmem:[#allocation2 + $0x28] sm:$0x3] %vm368_vm3, %v6237_v52  ;;  %377 = vst.msk [vmem:[#allocation2 + $0x48] sm:$0x3] %vm368_vm3, %v6237_v52 }
  0x97   : > { %1751 = vmatmul.mubr.bf16.gmra.mrb[48].mxu1 %v6077_v15  ;;  %1661 = vmatprep.mubr.bf16.mxu0 %v947_v17  ;;  %378 = vst.msk [vmem:[#allocation2 + $0x50] sm:$0xff] %vm366_vm2, %v6237_v52  ;;  %380 = vst.msk [vmem:[#allocation2 + $0x60] sm:$0xff] %vm366_vm2, %v6237_v52 }
  0x98   : > { %1758 = vmatprep.mubr.bf16.mxu1 %v6085_v18  ;;  %379 = vst.msk [vmem:[#allocation2 + $0x58] sm:$0x3] %vm368_vm3, %v6237_v52  ;;  %381 = vst.msk [vmem:[#allocation2 + $0x68] sm:$0x3] %vm368_vm3, %v6237_v52 }
  0x99   : > { %382 = vst.msk [vmem:[#allocation2 + $0x70] sm:$0xff] %vm366_vm2, %v6237_v52  ;;  %384 = vst.msk [vmem:[#allocation2 + $0x80] sm:$0xff] %vm366_vm2, %v6237_v52 }
  0x9a   : > { %383 = vst.msk [vmem:[#allocation2 + $0x78] sm:$0x3] %vm368_vm3, %v6237_v52  ;;  %385 = vst.msk [vmem:[#allocation2 + $0x88] sm:$0x3] %vm368_vm3, %v6237_v52 }
  0x9b   : > { %390 = vst.msk [vmem:[#allocation2 + $0xb0] sm:$0xff] %vm366_vm2, %v6237_v52  ;;  %392 = vst.msk [vmem:[#allocation2 + $0xc0] sm:$0xff] %vm366_vm2, %v6237_v52 }
  0x9c   : > { %391 = vst.msk [vmem:[#allocation2 + $0xb8] sm:$0x3] %vm368_vm3, %v6237_v52  ;;  %393 = vst.msk [vmem:[#allocation2 + $0xc8] sm:$0x3] %vm368_vm3, %v6237_v52 }
  0x9d   : > { %394 = vst.msk [vmem:[#allocation2 + $0xd0] sm:$0xff] %vm366_vm2, %v6237_v52  ;;  %396 = vst.msk [vmem:[#allocation2 + $0xe0] sm:$0xff] %vm366_vm2, %v6237_v52 }
  0x9e   : > { %1662 = vmatmul.mubr.bf16.gmra.mrb[52].mxu0 %v946_v14  ;;  %395 = vst.msk [vmem:[#allocation2 + $0xd8] sm:$0x3] %vm368_vm3, %v6237_v52  ;;  %397 = vst.msk [vmem:[#allocation2 + $0xe8] sm:$0x3] %vm368_vm3, %v6237_v52 }
  0x9f   : > { %1759 = vmatmul.mubr.bf16.gmra.mrb[52].mxu1 %v6122_v8  ;;  %1669 = vmatprep.mubr.bf16.mxu0 %v953_v21  ;;  %398 = vst.msk [vmem:[#allocation2 + $0xf0] sm:$0xff] %vm366_vm2, %v6237_v52  ;;  %400 = vst.msk [vmem:[#allocation2 + $0x100] sm:$0xff] %vm366_vm2, %v6237_v52 }
  0xa0   : > { %1766 = vmatprep.mubr.bf16.mxu1 %v6132_v34  ;;  %399 = vst.msk [vmem:[#allocation2 + $0xf8] sm:$0x3] %vm368_vm3, %v6237_v52  ;;  %401 = vst.msk [vmem:[#allocation2 + $0x108] sm:$0x3] %vm368_vm3, %v6237_v52 }
  0xa1   : > { %402 = vst.msk [vmem:[#allocation2 + $0x110] sm:$0xff] %vm366_vm2, %v6237_v52  ;;  %404 = vst.msk [vmem:[#allocation2 + $0x120] sm:$0xff] %vm366_vm2, %v6237_v52 }
  0xa2   : > { %403 = vst.msk [vmem:[#allocation2 + $0x118] sm:$0x3] %vm368_vm3, %v6237_v52  ;;  %405 = vst.msk [vmem:[#allocation2 + $0x128] sm:$0x3] %vm368_vm3, %v6237_v52 }
  0xa6   : > { %1670 = vmatmul.mubr.bf16.gmra.mrb[56].mxu0 %v952_v30 }
  0xa7   : > { %1767 = vmatmul.mubr.bf16.gmra.mrb[56].mxu1 %v6182_v11  ;;  %1677 = vmatprep.mubr.bf16.mxu0 %v959_v48 }
  0xa8   : > { %1774 = vmatprep.mubr.bf16.mxu1 %v961_v37 }
  0xae   : > { %1678 = vmatmul.mubr.bf16.gmra.mrb[60].mxu0 %v958_v32 }
  0xaf   : > { %1775 = vmatmul.mubr.bf16.gmra.mrb[60].mxu1 %v960_v3  ;;  %4881 = vmatprep.mubr.bf16.mxu0 %v7756_v7 }
  0xb0   : > { %4889 = vmatprep.mubr.bf16.mxu1 %v7757_v24 }
  0xb6   : > { %4882 = vmatmul.mubr.bf16.vlgmr.msra.gmra.mrb[64].mxu0 %v7758_v33 }
  0xb7   : > { %4890 = vmatmul.mubr.bf16.vlgmr.msra.gmra.mrb[64].mxu1 %v7759_v45  ;;  %4885 = vmatprep.mubr.bf16.mxu0 %v7760_v50 }
  0xb8   : > { %4893 = vmatprep.mubr.bf16.mxu1 %v6186_v61 }
  0xbe   : > { %4886 = vmatmul.mubr.bf16.gmra.mrb[68].mxu0 %v935_v29 }
  0xbf   : > { %4894 = vmatmul.mubr.bf16.gmra.mrb[68].mxu1 %v962_v38 }
 0x109   : > { %v4461_v29 = vpop.f32.mrb[0].mxu0 }
 0x10a   : > { %v4525_v57 = vpop.f32.mrb[0].mxu1  ;;  %v4462_v6 = vpop.f32.mrb[1].mxu0 }
 0x10b   : > { %v4526_v15 = vpop.f32.mrb[1].mxu1  ;;  %v4463_v16 = vadd.f32 %v4462_v6, %v4461_v29  ;;  %v4464_v40 = vpop.f32.mrb[2].mxu0 }
 0x10c   : > { %v4527_v18 = vadd.f32 %v4526_v15, %v4525_v57  ;;  %v4528_v35 = vpop.f32.mrb[2].mxu1  ;;  %v4465_v41 = vpop.f32.mrb[3].mxu0 }
 0x10d   : > { %v4529_v42 = vpop.f32.mrb[3].mxu1  ;;  %v4466_v8 = vadd.f32 %v4465_v41, %v4464_v40 }
 0x10e   : > { %v6447_v55 = vadd.f32 %v4527_v18, %v4463_v16  ;;  %v4530_v27 = vadd.f32 %v4529_v42, %v4528_v35 }
 0x110   : > { %v6449_v34 = vadd.f32 %v4530_v27, %v4466_v8 }
 0x111   : > { %v4467_v46 = vpop.f32.mrb[4].mxu0 }
 0x112   : > { %v4531_v0 = vpop.f32.mrb[4].mxu1  ;;  %v4468_v31 = vpop.f32.mrb[5].mxu0 }
 0x113   : > { %v4532_v49 = vpop.f32.mrb[5].mxu1  ;;  %v4469_v23 = vadd.f32 %v4468_v31, %v4467_v46  ;;  %v4470_v12 = vpop.f32.mrb[6].mxu0 }
 0x114   : > { %v4533_v4 = vadd.f32 %v4532_v49, %v4531_v0  ;;  %v4534_v9 = vpop.f32.mrb[6].mxu1  ;;  %v4471_v13 = vpop.f32.mrb[7].mxu0 }
 0x115   : > { %v4535_v62 = vpop.f32.mrb[7].mxu1  ;;  %v4472_v56 = vadd.f32 %v4471_v13, %v4470_v12 }
 0x116   : > { %v6451_v44 = vadd.f32 %v4533_v4, %v4469_v23  ;;  %v4536_v32 = vadd.f32 %v4535_v62, %v4534_v9 }
 0x118   : > { %v6453_v36 = vadd.f32 %v4536_v32, %v4472_v56 }
 0x119   : > { %v4473_v11 = vpop.f32.mrb[8].mxu0 }
 0x11a   : > { %v4537_v61 = vpop.f32.mrb[8].mxu1  ;;  %v4474_v37 = vpop.f32.mrb[9].mxu0 }
 0x11b   : > { %v4538_v38 = vpop.f32.mrb[9].mxu1  ;;  %v4475_v51 = vadd.f32 %v4474_v37, %v4473_v11  ;;  %v4476_v59 = vpop.f32.mrb[10].mxu0 }
 0x11c   : > { %v4539_v43 = vadd.f32 %v4538_v38, %v4537_v61  ;;  %v4540_v2 = vpop.f32.mrb[10].mxu1  ;;  %v4477_v58 = vpop.f32.mrb[11].mxu0 }
 0x11d   : > { %v4541_v63 = vpop.f32.mrb[11].mxu1  ;;  %v4478_v20 = vadd.f32 %v4477_v58, %v4476_v59 }
 0x11e   : > { %v6455_v10 = vadd.f32 %v4539_v43, %v4475_v51  ;;  %v4542_v19 = vadd.f32 %v4541_v63, %v4540_v2 }
 0x120   : > { %v6457_v25 = vadd.f32 %v4542_v19, %v4478_v20 }
 0x121   : > { %v4479_v26 = vpop.f32.mrb[12].mxu0 }
 0x122   : > { %v4543_v28 = vpop.f32.mrb[12].mxu1  ;;  %v4480_v39 = vpop.f32.mrb[13].mxu0 }
 0x123   : > { %v4544_v47 = vpop.f32.mrb[13].mxu1  ;;  %v4481_v52 = vadd.f32 %v4480_v39, %v4479_v26  ;;  %v4482_v54 = vpop.f32.mrb[14].mxu0 }
 0x124   : > { %v4545_v53 = vadd.f32 %v4544_v47, %v4543_v28  ;;  %v4546_v60 = vpop.f32.mrb[14].mxu1  ;;  %v4483_v5 = vpop.f32.mrb[15].mxu0 }
 0x125   : > { %v4547_v1 = vpop.f32.mrb[15].mxu1  ;;  %v4484_v14 = vadd.f32 %v4483_v5, %v4482_v54 }
 0x126   : > { %v6459_v17 = vadd.f32 %v4545_v53, %v4481_v52  ;;  %v4548_v21 = vadd.f32 %v4547_v1, %v4546_v60 }
 0x128   : > { %v6461_v22 = vadd.f32 %v4548_v21, %v4484_v14 }
 0x129   : > { %v4485_v30 = vpop.f32.mrb[16].mxu0 }
 0x12a   : > { %v4549_v48 = vpop.f32.mrb[16].mxu1  ;;  %v4486_v3 = vpop.f32.mrb[17].mxu0 }
 0x12b   : > { %v4550_v7 = vpop.f32.mrb[17].mxu1  ;;  %v4487_v24 = vadd.f32 %v4486_v3, %v4485_v30  ;;  %v4488_v45 = vpop.f32.mrb[18].mxu0 }
 0x12c   : > { %v4551_v33 = vadd.f32 %v4550_v7, %v4549_v48  ;;  %v4552_v50 = vpop.f32.mrb[18].mxu1  ;;  %v4489_v29 = vpop.f32.mrb[19].mxu0 }
 0x12d   : > { %v4553_v57 = vpop.f32.mrb[19].mxu1  ;;  %v4490_v15 = vadd.f32 %v4489_v29, %v4488_v45 }
 0x12e   : > { %v6463_v6 = vadd.f32 %v4551_v33, %v4487_v24  ;;  %v4554_v16 = vadd.f32 %v4553_v57, %v4552_v50 }
 0x130   : > { %v6465_v18 = vadd.f32 %v4554_v16, %v4490_v15 }
 0x131   : > { %v4491_v40 = vpop.f32.mrb[20].mxu0 }
 0x132   : > { %v4555_v35 = vpop.f32.mrb[20].mxu1  ;;  %v4492_v41 = vpop.f32.mrb[21].mxu0 }
 0x133   : > { %v4556_v42 = vpop.f32.mrb[21].mxu1  ;;  %v4493_v8 = vadd.f32 %v4492_v41, %v4491_v40  ;;  %v4494_v46 = vpop.f32.mrb[22].mxu0 }
 0x134   : > { %v4557_v27 = vadd.f32 %v4556_v42, %v4555_v35  ;;  %v4558_v0 = vpop.f32.mrb[22].mxu1  ;;  %v4495_v31 = vpop.f32.mrb[23].mxu0 }
 0x135   : > { %v4559_v49 = vpop.f32.mrb[23].mxu1  ;;  %v4496_v4 = vadd.f32 %v4495_v31, %v4494_v46 }
 0x136   : > { %v6467_v23 = vadd.f32 %v4557_v27, %v4493_v8  ;;  %v4560_v12 = vadd.f32 %v4559_v49, %v4558_v0 }
 0x138   : > { %v6469_v9 = vadd.f32 %v4560_v12, %v4496_v4 }
 0x139   : > { %v4497_v13 = vpop.f32.mrb[24].mxu0 }
 0x13a   : > { %v4561_v62 = vpop.f32.mrb[24].mxu1  ;;  %v4498_v56 = vpop.f32.mrb[25].mxu0 }
 0x13b   : > { %v4562_v32 = vpop.f32.mrb[25].mxu1  ;;  %v4499_v11 = vadd.f32 %v4498_v56, %v4497_v13  ;;  %v4500_v37 = vpop.f32.mrb[26].mxu0 }
 0x13c   : > { %v4563_v61 = vadd.f32 %v4562_v32, %v4561_v62  ;;  %v4564_v38 = vpop.f32.mrb[26].mxu1  ;;  %v4501_v51 = vpop.f32.mrb[27].mxu0 }
 0x13d   : > { %v4565_v43 = vpop.f32.mrb[27].mxu1  ;;  %v4502_v2 = vadd.f32 %v4501_v51, %v4500_v37 }
 0x13e   : > { %v6471_v59 = vadd.f32 %v4563_v61, %v4499_v11  ;;  %v4566_v58 = vadd.f32 %v4565_v43, %v4564_v38 }
 0x140   : > { %v6473_v63 = vadd.f32 %v4566_v58, %v4502_v2 }
 0x141   : > { %v4503_v20 = vpop.f32.mrb[28].mxu0 }
 0x142   : > { %v4567_v19 = vpop.f32.mrb[28].mxu1  ;;  %v4504_v26 = vpop.f32.mrb[29].mxu0 }
 0x143   : > { %v4568_v28 = vpop.f32.mrb[29].mxu1  ;;  %v4505_v39 = vadd.f32 %v4504_v26, %v4503_v20  ;;  %v4506_v52 = vpop.f32.mrb[30].mxu0 }
 0x144   : > { %v4569_v47 = vadd.f32 %v4568_v28, %v4567_v19  ;;  %v4570_v53 = vpop.f32.mrb[30].mxu1  ;;  %v4507_v54 = vpop.f32.mrb[31].mxu0 }
 0x145   : > { %v4571_v60 = vpop.f32.mrb[31].mxu1  ;;  %v4508_v1 = vadd.f32 %v4507_v54, %v4506_v52 }
 0x146   : > { %v6475_v5 = vadd.f32 %v4569_v47, %v4505_v39  ;;  %v4572_v14 = vadd.f32 %v4571_v60, %v4570_v53 }
 0x148   : > { %v6477_v21 = vadd.f32 %v4572_v14, %v4508_v1 }
 0x149   : > { %v4589_v30 = vpop.f32.mrb[32].mxu0 }
 0x14a   : > { %v4653_v48 = vpop.f32.mrb[32].mxu1  ;;  %v4590_v3 = vpop.f32.mrb[33].mxu0 }
 0x14b   : > { %v4654_v7 = vpop.f32.mrb[33].mxu1  ;;  %v4591_v24 = vadd.f32 %v4590_v3, %v4589_v30  ;;  %v4592_v45 = vpop.f32.mrb[34].mxu0 }
 0x14c   : > { %v4655_v33 = vadd.f32 %v4654_v7, %v4653_v48  ;;  %v4656_v50 = vpop.f32.mrb[34].mxu1  ;;  %v4593_v29 = vpop.f32.mrb[35].mxu0 }
 0x14d   : > { %v4657_v57 = vpop.f32.mrb[35].mxu1  ;;  %v1624_v15 = vadd.f32 %v4591_v24, %v6447_v55  ;;  %v4594_v16 = vadd.f32 %v4593_v29, %v4592_v45 }
 0x14e   : > { %v4658_v40 = vadd.f32 %v4657_v57, %v4656_v50 }
 0x14f   : > { %v1627_v35 = vadd.f32 %v4594_v16, %v6449_v34  ;;  %v6481_v41 = vadd.f32 %v4655_v33, %v1624_v15 }
 0x151   : > { %v4595_v42 = vpop.f32.mrb[36].mxu0  ;;  %v6483_v27 = vadd.f32 %v4658_v40, %v1627_v35 }
 0x152   : > { %v4659_v8 = vpop.f32.mrb[36].mxu1  ;;  %v4596_v46 = vpop.f32.mrb[37].mxu0 }
 0x153   : > { %v4660_v0 = vpop.f32.mrb[37].mxu1  ;;  %v4597_v31 = vadd.f32 %v4596_v46, %v4595_v42  ;;  %v4598_v4 = vpop.f32.mrb[38].mxu0 }
 0x154   : > { %v4661_v49 = vadd.f32 %v4660_v0, %v4659_v8  ;;  %v4662_v12 = vpop.f32.mrb[38].mxu1  ;;  %v4599_v13 = vpop.f32.mrb[39].mxu0 }
 0x155   : > { %v4663_v62 = vpop.f32.mrb[39].mxu1  ;;  %v1632_v55 = vadd.f32 %v4597_v31, %v6451_v44  ;;  %v4600_v56 = vadd.f32 %v4599_v13, %v4598_v4 }
 0x156   : > { %v4664_v32 = vadd.f32 %v4663_v62, %v4662_v12 }
 0x157   : > { %v1635_v34 = vadd.f32 %v4600_v56, %v6453_v36  ;;  %v6487_v11 = vadd.f32 %v4661_v49, %v1632_v55 }
 0x159   : > { %v4601_v61 = vpop.f32.mrb[40].mxu0  ;;  %v6489_v38 = vadd.f32 %v4664_v32, %v1635_v34 }
 0x15a   : > { %v4665_v37 = vpop.f32.mrb[40].mxu1  ;;  %v4602_v51 = vpop.f32.mrb[41].mxu0 }
 0x15b   : > { %v4666_v43 = vpop.f32.mrb[41].mxu1  ;;  %v4603_v2 = vadd.f32 %v4602_v51, %v4601_v61  ;;  %v4604_v20 = vpop.f32.mrb[42].mxu0 }
 0x15c   : > { %v4667_v58 = vadd.f32 %v4666_v43, %v4665_v37  ;;  %v4668_v19 = vpop.f32.mrb[42].mxu1  ;;  %v4605_v26 = vpop.f32.mrb[43].mxu0 }
 0x15d   : > { %v4669_v28 = vpop.f32.mrb[43].mxu1  ;;  %v1640_v44 = vadd.f32 %v4603_v2, %v6455_v10  ;;  %v4606_v39 = vadd.f32 %v4605_v26, %v4604_v20 }
 0x15e   : > { %v4670_v47 = vadd.f32 %v4669_v28, %v4668_v19 }
 0x15f   : > { %v1643_v36 = vadd.f32 %v4606_v39, %v6457_v25  ;;  %v6493_v52 = vadd.f32 %v4667_v58, %v1640_v44 }
 0x161   : > { %v4607_v53 = vpop.f32.mrb[44].mxu0  ;;  %v6495_v60 = vadd.f32 %v4670_v47, %v1643_v36 }
 0x162   : > { %v4671_v54 = vpop.f32.mrb[44].mxu1  ;;  %v4608_v1 = vpop.f32.mrb[45].mxu0 }
 0x163   : > { %v4672_v14 = vpop.f32.mrb[45].mxu1  ;;  %v4609_v30 = vadd.f32 %v4608_v1, %v4607_v53  ;;  %v4610_v3 = vpop.f32.mrb[46].mxu0 }
 0x164   : > { %v4673_v48 = vadd.f32 %v4672_v14, %v4671_v54  ;;  %v4674_v7 = vpop.f32.mrb[46].mxu1  ;;  %v4611_v24 = vpop.f32.mrb[47].mxu0 }
 0x165   : > { %v4675_v33 = vpop.f32.mrb[47].mxu1  ;;  %v1648_v10 = vadd.f32 %v4609_v30, %v6459_v17  ;;  %v4612_v45 = vadd.f32 %v4611_v24, %v4610_v3 }
 0x166   : > { %v4676_v50 = vadd.f32 %v4675_v33, %v4674_v7 }
 0x167   : > { %v1651_v25 = vadd.f32 %v4612_v45, %v6461_v22  ;;  %v6499_v29 = vadd.f32 %v4673_v48, %v1648_v10 }
 0x169   : > { %v4613_v57 = vpop.f32.mrb[48].mxu0  ;;  %v6501_v16 = vadd.f32 %v4676_v50, %v1651_v25 }
 0x16a   : > { %v4677_v15 = vpop.f32.mrb[48].mxu1  ;;  %v4614_v40 = vpop.f32.mrb[49].mxu0 }
 0x16b   : > { %v4678_v35 = vpop.f32.mrb[49].mxu1  ;;  %v4615_v42 = vadd.f32 %v4614_v40, %v4613_v57  ;;  %v4616_v46 = vpop.f32.mrb[50].mxu0 }
 0x16c   : > { %v4679_v8 = vadd.f32 %v4678_v35, %v4677_v15  ;;  %v4680_v0 = vpop.f32.mrb[50].mxu1  ;;  %v4617_v31 = vpop.f32.mrb[51].mxu0 }
 0x16d   : > { %v4681_v49 = vpop.f32.mrb[51].mxu1  ;;  %v1656_v17 = vadd.f32 %v4615_v42, %v6463_v6  ;;  %v4618_v4 = vadd.f32 %v4617_v31, %v4616_v46 }
 0x16e   : > { %v4682_v12 = vadd.f32 %v4681_v49, %v4680_v0  ;;  %v6520_v49 = vld [vmem:[%s7735_s2] ss:$0 sm:$0xff] }
 0x16f   : > { %v1659_v22 = vadd.f32 %v4618_v4, %v6465_v18  ;;  %v1753_v13 = vadd.f32 %v4679_v8, %v1656_v17 }
 0x171   : > { %v4619_v62 = vpop.f32.mrb[52].mxu0  ;;  %v6505_v56 = vadd.f32 %v4682_v12, %v1659_v22 }
 0x172   : > { %v4683_v55 = vpop.f32.mrb[52].mxu1  ;;  %v4620_v32 = vpop.f32.mrb[53].mxu0 }
 0x173   : > { %v4684_v34 = vpop.f32.mrb[53].mxu1  ;;  %v4621_v61 = vadd.f32 %v4620_v32, %v4619_v62  ;;  %v4622_v51 = vpop.f32.mrb[54].mxu0 }
 0x174   : > { %v4685_v37 = vadd.f32 %v4684_v34, %v4683_v55  ;;  %v4686_v43 = vpop.f32.mrb[54].mxu1  ;;  %v4623_v2 = vpop.f32.mrb[55].mxu0 }
 0x175   : > { %v4687_v58 = vpop.f32.mrb[55].mxu1  ;;  %v1664_v20 = vadd.f32 %v4621_v61, %v6467_v23  ;;  %v4624_v6 = vadd.f32 %v4623_v2, %v4622_v51 }
 0x176   : > { %v4688_v19 = vadd.f32 %v4687_v58, %v4686_v43 }
 0x177   : > { %v1667_v26 = vadd.f32 %v4624_v6, %v6469_v9  ;;  %v1761_v18 = vadd.f32 %v4685_v37, %v1664_v20 }
 0x179   : > { %v4625_v28 = vpop.f32.mrb[56].mxu0  ;;  %v1764_v39 = vadd.f32 %v4688_v19, %v1667_v26 }
 0x17a   : > { %v4689_v44 = vpop.f32.mrb[56].mxu1  ;;  %v4626_v47 = vpop.f32.mrb[57].mxu0 }
 0x17b   : > { %v4690_v36 = vpop.f32.mrb[57].mxu1  ;;  %v4627_v53 = vadd.f32 %v4626_v47, %v4625_v28  ;;  %v4628_v1 = vpop.f32.mrb[58].mxu0 }
 0x17c   : > { %v4691_v54 = vadd.f32 %v4690_v36, %v4689_v44  ;;  %v4692_v14 = vpop.f32.mrb[58].mxu1  ;;  %v4629_v30 = vpop.f32.mrb[59].mxu0 }
 0x17d   : > { %v4693_v48 = vpop.f32.mrb[59].mxu1  ;;  %v1672_v3 = vadd.f32 %v4627_v53, %v6471_v59  ;;  %v4630_v7 = vadd.f32 %v4629_v30, %v4628_v1 }
 0x17e   : > { %v4694_v23 = vadd.f32 %v4693_v48, %v4692_v14 }
 0x17f   : > { %v1675_v24 = vadd.f32 %v4630_v7, %v6473_v63  ;;  %v6511_v33 = vadd.f32 %v4691_v54, %v1672_v3 }
 0x181   : > { %v4631_v9 = vpop.f32.mrb[60].mxu0  ;;  %v6513_v45 = vadd.f32 %v4694_v23, %v1675_v24 }
 0x182   : > { %v4695_v10 = vpop.f32.mrb[60].mxu1  ;;  %v4632_v50 = vpop.f32.mrb[61].mxu0 }
 0x183   : > { %v4696_v25 = vpop.f32.mrb[61].mxu1  ;;  %v4633_v57 = vadd.f32 %v4632_v50, %v4631_v9  ;;  %v4634_v40 = vpop.f32.mrb[62].mxu0 }
 0x184   : > { %v4697_v15 = vadd.f32 %v4696_v25, %v4695_v10  ;;  %v4698_v35 = vpop.f32.mrb[62].mxu1  ;;  %v4635_v42 = vpop.f32.mrb[63].mxu0 }
 0x185   : > { %v4699_v8 = vpop.f32.mrb[63].mxu1  ;;  %v1680_v59 = vadd.f32 %v4633_v57, %v6475_v5  ;;  %v4636_v46 = vadd.f32 %v4635_v42, %v4634_v40  ;;  %v6526_v5 = vld [vmem:[%s7736_s3] ss:$0 sm:$0xff] }
 0x186   : > { %v4700_v0 = vadd.f32 %v4699_v8, %v4698_v35 }
 0x187   : > { %v1683_v63 = vadd.f32 %v4636_v46, %v6477_v21  ;;  %v1777_v31 = vadd.f32 %v4697_v15, %v1680_v59 }
 0x189   : > { %v4883_v17 = vpop.f32.mrb[64].mxu0  ;;  %v1780_v12 = vadd.f32 %v4700_v0, %v1683_v63 }
 0x18a   : > { %v4891_v4 = vpop.f32.mrb[64].mxu1  ;;  %v1826_v22 = vadd.f32 %v4883_v17, %v6487_v11  ;;  %v1817_v55 = vpop.f32.mrb[65].mxu0 }
 0x18b   : > { %v1858_v62 = vadd.f32 %v4891_v4, %v1761_v18  ;;  %v1849_v32 = vpop.f32.mrb[65].mxu1  ;;  %v1818_v21 = vadd.f32 %v1817_v55, %v6481_v41  ;;  %v4884_v61 = vpop.f32.mrb[66].mxu0 }
 0x18c   : > { %v1850_v34 = vadd.f32 %v1849_v32, %v1753_v13  ;;  %v4892_v37 = vpop.f32.mrb[66].mxu1  ;;  %v1888_v51 = vmul.f32 %v6520_v49, %v1826_v22  ;;  %v1829_v2 = vadd.f32 %v4884_v61, %v6489_v38  ;;  %v1820_v58 = vpop.f32.mrb[67].mxu0 }
 0x18d   : > { %v1896_v43 = vmul.f32 %v6520_v49, %v1858_v62  ;;  %v1861_v11 = vadd.f32 %v4892_v37, %v1764_v39  ;;  %v1852_v20 = vpop.f32.mrb[67].mxu1  ;;  %v1886_v6 = vmul.f32 %v6520_v49, %v1818_v21  ;;  %v1821_v26 = vadd.f32 %v1820_v58, %v6483_v27 }
 0x18e   : > { %v1894_v19 = vmul.f32 %v6520_v49, %v1850_v34  ;;  %v1853_v41 = vadd.f32 %v1852_v20, %v6505_v56  ;;  %v1910_v13 = vadd.f32 %v6526_v5, %v1888_v51  ;;  %v1889_v28 = vmul.f32 %v6520_v49, %v1829_v2 }
 0x18f   : > { %v1918_v18 = vadd.f32 %v6526_v5, %v1896_v43  ;;  %v1897_v44 = vmul.f32 %v6520_v49, %v1861_v11  ;;  %v1908_v38 = vadd.f32 %v6526_v5, %v1886_v6  ;;  %v1887_v47 = vmul.f32 %v6520_v49, %v1821_v26 }
 0x190   : > { %v1916_v39 = vadd.f32 %v6526_v5, %v1894_v19  ;;  %v1895_v36 = vmul.f32 %v6520_v49, %v1853_v41  ;;  %v1926_v53 = vmax.f32 %v1910_v13, 0.0  ;;  %v1911_v56 = vadd.f32 %v6526_v5, %v1889_v28 }
 0x191   : > { %v1934_v27 = vmax.f32 %v1918_v18, 0.0  ;;  %v1919_v54 = vadd.f32 %v6526_v5, %v1897_v44  ;;  %v1924_v1 = vmax.f32 %v1908_v38, 0.0  ;;  %v1909_v30 = vadd.f32 %v6526_v5, %v1887_v47  ;;  %v4887_v3 = vpop.f32.mrb[68].mxu0 }
 0x192   : > { %v1932_v14 = vmax.f32 %v1916_v39, 0.0  ;;  %v1917_v48 = vadd.f32 %v6526_v5, %v1895_v36  ;;  %v4895_v7 = vpop.f32.mrb[68].mxu1  ;;  %1943 = vst.msk [vmem:[#allocation2 + $0x31] sm:$0xff] %vm366_vm2, %v1926_v53  ;;  %v1927_v23 = vmax.f32 %v1911_v56, 0.0  ;;  %v1842_v9 = vadd.f32 %v4887_v3, %v6499_v29  ;;  %v1833_v50 = vpop.f32.mrb[69].mxu0 }
 0x193   : > { %1951 = vst.msk [vmem:[#allocation2 + $0xd1] sm:$0xff] %vm366_vm2, %v1934_v27  ;;  %v1935_v24 = vmax.f32 %v1919_v54, 0.0  ;;  %v1874_v10 = vadd.f32 %v4895_v7, %v1777_v31  ;;  %v1865_v25 = vpop.f32.mrb[69].mxu1  ;;  %1941 = vst.msk [vmem:[#allocation2 + $0x11] sm:$0xff] %vm366_vm2, %v1924_v1  ;;  %v1925_v57 = vmax.f32 %v1909_v30, 0.0  ;;  %v1834_v40 = vadd.f32 %v1833_v50, %v6493_v52  ;;  %v4888_v42 = vpop.f32.mrb[70].mxu0 }
 0x194   : > { %1949 = vst.msk [vmem:[#allocation2 + $0xb1] sm:$0xff] %vm366_vm2, %v1932_v14  ;;  %v1933_v15 = vmax.f32 %v1917_v48, 0.0  ;;  %v1866_v35 = vadd.f32 %v1865_v25, %v6511_v33  ;;  %v4896_v8 = vpop.f32.mrb[70].mxu1  ;;  %1944 = vst.msk [vmem:[#allocation2 + $0x41] sm:$0xff] %vm366_vm2, %v1927_v23  ;;  %v1892_v29 = vmul.f32 %v6520_v49, %v1842_v9  ;;  %v1845_v46 = vadd.f32 %v4888_v42, %v6501_v16  ;;  %v1836_v63 = vpop.f32.mrb[71].mxu0 }
 0x195   : > { %1952 = vst.msk [vmem:[#allocation2 + $0xe1] sm:$0xff] %vm366_vm2, %v1935_v24  ;;  %v1900_v59 = vmul.f32 %v6520_v49, %v1874_v10  ;;  %v1877_v0 = vadd.f32 %v4896_v8, %v1780_v12  ;;  %v1868_v31 = vpop.f32.mrb[71].mxu1  ;;  %1942 = vst.msk [vmem:[#allocation2 + $0x21] sm:$0xff] %vm366_vm2, %v1925_v57  ;;  %v1890_v52 = vmul.f32 %v6520_v49, %v1834_v40 }
 0x196   : > { %1950 = vst.msk [vmem:[#allocation2 + $0xc1] sm:$0xff] %vm366_vm2, %v1933_v15  ;;  %v1898_v33 = vmul.f32 %v6520_v49, %v1866_v35  ;;  %v1837_v17 = vadd.f32 %v1836_v63, %v6495_v60  ;;  %v1869_v4 = vadd.f32 %v1868_v31, %v6513_v45  ;;  %v1914_v22 = vadd.f32 %v6526_v5, %v1892_v29 }
 0x197   : > { %v1922_v62 = vadd.f32 %v6526_v5, %v1900_v59  ;;  %v1893_v16 = vmul.f32 %v6520_v49, %v1845_v46  ;;  %v1901_v12 = vmul.f32 %v6520_v49, %v1877_v0  ;;  %v1912_v55 = vadd.f32 %v6526_v5, %v1890_v52 }
 0x198   : > { %v1920_v32 = vadd.f32 %v6526_v5, %v1898_v33  ;;  %v1891_v21 = vmul.f32 %v6520_v49, %v1837_v17  ;;  %v1899_v34 = vmul.f32 %v6520_v49, %v1869_v4  ;;  %v1930_v61 = vmax.f32 %v1914_v22, 0.0 }
 0x199   : > { %v1938_v60 = vmax.f32 %v1922_v62, 0.0  ;;  %v1915_v45 = vadd.f32 %v6526_v5, %v1893_v16  ;;  %v1923_v37 = vadd.f32 %v6526_v5, %v1901_v12  ;;  %v1928_v51 = vmax.f32 %v1912_v55, 0.0 }
 0x19a   : > { %v1936_v43 = vmax.f32 %v1920_v32, 0.0  ;;  %v1913_v2 = vadd.f32 %v6526_v5, %v1891_v21  ;;  %v1921_v11 = vadd.f32 %v6526_v5, %v1899_v34  ;;  %1947 = vst.msk [vmem:[#allocation2 + $0x71] sm:$0xff] %vm366_vm2, %v1930_v61 }
 0x19b   : > { %1955 = vst.msk [vmem:[#allocation2 + $0x111] sm:$0xff] %vm366_vm2, %v1938_v60  ;;  %v1931_v58 = vmax.f32 %v1915_v45, 0.0  ;;  %v1939_v20 = vmax.f32 %v1923_v37, 0.0  ;;  %1945 = vst.msk [vmem:[#allocation2 + $0x51] sm:$0xff] %vm366_vm2, %v1928_v51 }
 0x19c   : > { %1953 = vst.msk [vmem:[#allocation2 + $0xf1] sm:$0xff] %vm366_vm2, %v1936_v43  ;;  %v1929_v49 = vmax.f32 %v1913_v2, 0.0  ;;  %v1937_v6 = vmax.f32 %v1921_v11, 0.0 }
 0x19d   : > { %1948 = vst.msk [vmem:[#allocation2 + $0x81] sm:$0xff] %vm366_vm2, %v1931_v58  ;;  %1956 = vst.msk [vmem:[#allocation2 + $0x121] sm:$0xff] %vm366_vm2, %v1939_v20 }
 0x19e   : > { %1946 = vst.msk [vmem:[#allocation2 + $0x61] sm:$0xff] %vm366_vm2, %v1929_v49  ;;  %1954 = vst.msk [vmem:[#allocation2 + $0x101] sm:$0xff] %vm366_vm2, %v1937_v6 }
 0x19f PF: > { %p4347_p6 = scmp.le.s32.totalorder %s5619_s25, 0 }
 0x1a0   : > { %v6587_v5 = vld [vmem:[#allocation2 + $0x20] sm:$0xff] (!%p4347_p6)  ;;  %v6589_v19 = vld [vmem:[#allocation2 + $0x30] sm:$0xff] (!%p4347_p6)  ;;  %vm2137_vm4 = vcmask (!%p4347_p6), 1045504   ;;  %v2019_v13 = vld [vmem:[#allocation2 + $0x18] sm:$0x3] (!%p4347_p6)  ;;  %vm2088_vm5 = vcmask (!%p4347_p6), 1046528  }
 0x1a1   : > { %1960 = sbr.rel (%p4347_p6) target bundleno = 1241 (0x4d9), region = 56  ;;  %v6591_v26 = vld [vmem:[#allocation2 + $0x10] sm:$0xff] (!%p4347_p6)  ;;  %v5043_v41 = vpack.i.bf16 (!%p4347_p6), %v6589_v19, %v6587_v5  ;;  %v2021_v18 = vld [vmem:[#allocation2 + $0x28] sm:$0x3] (!%p4347_p6)  ;;  %v2144_v44 = vrot.slane (!%p4347_p6), %v6587_v5, 2  ;;  %v2142_v38 = vrot.slane (!%p4347_p6), %v2019_v13, 2 }
 0x1a2   : > { %v2141_v28 = vrot.slane (!%p4347_p6), %v6591_v26, 2  ;;  %v2145_v39 = vrot.slane (!%p4347_p6), %v2021_v18, 2  ;;  %v6597_v47 = vld [vmem:[#allocation2] sm:$0xff] (!%p4347_p6)  ;;  %v2017_v36 = vld [vmem:[#allocation2 + $0x8] sm:$0x3] (!%p4347_p6)  ;;  %s5570_s15 = smov (!%p4347_p6), 64   ;;  %v5068_v42 = vpack.i.bf16 (!%p4347_p6), %v6587_v5, %v6591_v26 }
 0x1a3   : > { %5044 = vrot.lane.b32.xlu1 (!%p4347_p6), %v5043_v41, %s5570_s15  ;;  %v2138_v53 = vrot.slane (!%p4347_p6), %v6597_v47, 2  ;;  %v2139_v27 = vrot.slane (!%p4347_p6), %v2017_v36, 2  ;;  %v2089_v56 = vrot.slane (!%p4347_p6), %v6597_v47, 1  ;;  %v2090_v54 = vrot.slane (!%p4347_p6), %v2017_v36, 1  ;;  %v2023_v3 = vld [vmem:[#allocation2 + $0x38] sm:$0x3] (!%p4347_p6) }
 0x1a4   : > { %v2143_v1 = vsel (!%p4347_p6), %vm2137_vm4, %v2141_v28, %v2142_v38  ;;  %v6604_v14 = vsel (!%p4347_p6), %vm2137_vm4, %v2144_v44, %v2145_v39  ;;  %v2092_v30 = vrot.slane (!%p4347_p6), %v6591_v26, 1  ;;  %v2093_v48 = vrot.slane (!%p4347_p6), %v2019_v13, 1  ;;  %v6611_v10 = vld [vmem:[#allocation2 + $0x40] sm:$0xff] (!%p4347_p6)  ;;  %v2025_v50 = vld [vmem:[#allocation2 + $0x48] sm:$0x3] (!%p4347_p6)  ;;  %s5571_s16 = smov (!%p4347_p6), 32  }
 0x1a5   : > { %v5048_v7 = vpack.i.bf16 (!%p4347_p6), %v6604_v14, %v2143_v1  ;;  %v2140_v23 = vsel (!%p4347_p6), %vm2137_vm4, %v2138_v53, %v2139_v27  ;;  %v2091_v24 = vsel (!%p4347_p6), %vm2088_vm5, %v2089_v56, %v2090_v54  ;;  %v2095_v9 = vrot.slane (!%p4347_p6), %v6587_v5, 1  ;;  %s5572_s17 = smov (!%p4347_p6), 96   ;;  %v6640_v4 = vld [vmem:[#allocation2 + $0x50] sm:$0xff] (!%p4347_p6)  ;;  %v2027_v22 = vld [vmem:[#allocation2 + $0x58] sm:$0x3] (!%p4347_p6)  ;;  %v6646_v12 = vld [vmem:[#allocation2 + $0x60] sm:$0xff] (!%p4347_p6) }
 0x1a6   : > { %v5058_v25 = vpack.i.bf16 (!%p4347_p6), %v2143_v1, %v2140_v23  ;;  %v6614_v57 = vsel (!%p4347_p6), %vm2088_vm5, %v2092_v30, %v2093_v48  ;;  %v2096_v15 = vrot.slane (!%p4347_p6), %v2021_v18, 1  ;;  %v2098_v40 = vrot.slane (!%p4347_p6), %v6589_v19, 1  ;;  %v2029_v61 = vld [vmem:[#allocation2 + $0x68] sm:$0x3] (!%p4347_p6)  ;;  %v5523_v37 = vld [vmem:[%s5637_s14 + $0x40] sm:$0xff] (!%p4347_p6)   ;;  %v6673_v18 = vld [vmem:[#allocation2 + $0x70] sm:$0xff] (!%p4347_p6) }
 0x1a7   : > { %5049 = vrot.lane.b32.xlu0 (!%p4347_p6), %v5048_v7, %s5571_s16  ;;  %v5053_v35 = vpack.i.bf16 (!%p4347_p6), %v6614_v57, %v2091_v24  ;;  %v2099_v8 = vrot.slane (!%p4347_p6), %v2023_v3, 1  ;;  %v2147_v29 = vrot.slane (!%p4347_p6), %v6589_v19, 2  ;;  %v2148_v46 = vrot.slane (!%p4347_p6), %v2023_v3, 2  ;;  %v5524_v43 = vld [vmem:[%s5637_s14] sm:$0xff] (!%p4347_p6)   ;;  %4717 = vmatprep.subr.bf16.mxu0 (!%p4347_p6), %v5523_v37  ;;  %v5525_v6 = vld [vmem:[%s5637_s14 + $0x48] sm:$0xff] (!%p4347_p6)   ;;  %v5527_v28 = vld [vmem:[%s5637_s14 + $0x50] sm:$0xff] (!%p4347_p6)  }
 0x1a8   : > { %5059 = vrot.lane.b32.xlu1 %v5058_v25, %s5570_s15  ;;  %v6624_v59 = vsel %vm2088_vm5, %v2095_v9, %v2096_v15  ;;  %v2150_v0 = vrot.slane %v6611_v10, 2  ;;  %v2151_v63 = vrot.slane %v2025_v50, 2  ;;  %v2101_v16 = vrot.slane %v6611_v10, 1  ;;  %4718 = vmatpush3.bf16.msra.mxu0 %v5524_v43  ;;  %v5526_v41 = vld [vmem:[%s5637_s14 + $0x8] sm:$0xff]   ;;  %v2031_v39 = vld [vmem:[#allocation2 + $0x78] sm:$0x3] }
 0x1a9   : > { %v6628_v31 = vsel %vm2088_vm5, %v2098_v40, %v2099_v8  ;;  %v6635_v33 = vsel %vm2137_vm4, %v2147_v29, %v2148_v46  ;;  %v2102_v32 = vrot.slane %v2025_v50, 1  ;;  %v2104_v21 = vrot.slane %v6640_v4, 1  ;;  %4719 = vmatprep.subr.bf16.mxu0 %v5525_v6  ;;  %v5528_v36 = vld [vmem:[%s5637_s14 + $0x10] sm:$0xff]   ;;  %v6684_v53 = vld [vmem:[#allocation2 + $0x88] sm:$0x3]  ;;  %v5529_v27 = vld [vmem:[%s5637_s14 + $0x58] sm:$0xff]  }
 0x1aa   : > { %v5063_v52 = vpack.i.bf16 %v6628_v31, %v6624_v59  ;;  %v6638_v17 = vsel %vm2137_vm4, %v2150_v0, %v2151_v63  ;;  %v5088_v55 = vpack.i.bf16 %v6635_v33, %v6604_v14  ;;  %v2105_v34 = vrot.slane %v2027_v22, 1  ;;  %v6692_v48 = vld [vmem:[#allocation2 + $0x80] sm:$0xff]  ;;  %v6697_v23 = vld [vmem:[#allocation2 + $0x90] sm:$0xff]  ;;  %v6699_v24 = vld [vmem:[#allocation2 + $0x98] sm:$0x3] }
 0x1ab   : > { %5054 = vrot.lane.b32.xlu0 %v5053_v35, %s5571_s16  ;;  %v5073_v62 = vpack.i.bf16 %v6638_v17, %v6635_v33  ;;  %v2153_v60 = vrot.slane %v6640_v4, 2  ;;  %v2154_v45 = vrot.slane %v2027_v22, 2  ;;  %v2156_v51 = vrot.slane %v6646_v12, 2  ;;  %v6702_v25 = vld [vmem:[#allocation2 + $0xa0] sm:$0xff]  ;;  %v5530_v15 = vld [vmem:[%s5637_s14 + $0x18] sm:$0xff]   ;;  %v5533_v43 = vld [vmem:[%s5637_s14 + $0x68] sm:$0xff]  }
 0x1ac   : > { %5069 = vrot.lane.b32.xlu1 %v5068_v42, %s5572_s17  ;;  %v5083_v2 = vpack.i.bf16 %v6640_v4, %v6611_v10  ;;  %v5098_v11 = vpack.i.bf16 %v6611_v10, %v6589_v19  ;;  %v6663_v58 = vsel %vm2088_vm5, %v2101_v16, %v2102_v32  ;;  %v6666_v20 = vsel %vm2088_vm5, %v2104_v21, %v2105_v34  ;;  %v5531_v42 = vld [vmem:[%s5637_s14 + $0x60] sm:$0xff]   ;;  %v6717_v63 = vld [vmem:[#allocation2 + $0xa8] sm:$0x3]  ;;  %v6728_v32 = vld [vmem:[#allocation2 + $0xb8] sm:$0x3] }
 0x1ad   : > { %v2157_v49 = vrot.slane %v2029_v61, 2  ;;  %v5093_v13 = vpack.i.bf16 %v6666_v20, %v6663_v58  ;;  %v6678_v44 = vsel %vm2137_vm4, %v2153_v60, %v2154_v45  ;;  %4720 = vmatpush3.bf16.msra.mxu0 %v5526_v41  ;;  %v2107_v54 = vrot.slane %v6646_v12, 1  ;;  %v6734_v60 = vld [vmem:[#allocation2 + $0xc8] sm:$0x3]  ;;  %v5532_v45 = vld [vmem:[%s5637_s14 + $0x20] sm:$0xff]  }
 0x1ae   : > { %4721 = vmatprep.subr.bf16.mxu0 %v5527_v28  ;;  %v2108_v1 = vrot.slane %v2029_v61, 1  ;;  %v2110_v30 = vrot.slane %v6673_v18, 1  ;;  %v5118_v3 = vpack.i.bf16 %v6678_v44, %v6638_v17  ;;  %v2111_v7 = vrot.slane %v2031_v39, 1  ;;  %v6732_v61 = vld [vmem:[#allocation2 + $0xc0] sm:$0xff] }
 0x1af   : > { %5064 = vrot.lane.b32.xlu0 %v5063_v52, %s5572_s17  ;;  %v6681_v38 = vsel %vm2137_vm4, %v2156_v51, %v2157_v49  ;;  %v2159_v9 = vrot.slane %v6673_v18, 2  ;;  %v2160_v50 = vrot.slane %v2031_v39, 2  ;;  %v5113_v40 = vpack.i.bf16 %v6673_v18, %v6646_v12  ;;  %v5537_v37 = vld [vmem:[%s5637_s14 + $0x80] sm:$0xff]  }
 0x1b0   : > { %5079 = vrot.lane.b32.xlu1 %v5063_v52, %s5571_s16  ;;  %v5103_v56 = vpack.i.bf16 %v6681_v38, %v6678_v44  ;;  %v2212_v35 = vrot.slane %v6692_v48, 2  ;;  %v5128_v8 = vpack.i.bf16 %v6646_v12, %v6640_v4  ;;  %v6713_v29 = vsel %vm2088_vm5, %v2107_v54, %v2108_v1  ;;  %4897 = vmatprep.subr.bf16.mxu1 %v5537_v37  ;;  %v5540_v54 = vld [vmem:[%s5637_s14 + $0x88] sm:$0xff]  }
 0x1b1   : > { %4722 = vmatpush3.bf16.msra.mxu0 %v5528_v36  ;;  %v2213_v46 = vrot.slane %v6684_v53, 2  ;;  %v2228_v0 = vrot.slane %v6697_v23, 2  ;;  %v6721_v52 = vsel %vm2088_vm5, %v2110_v30, %v2111_v7  ;;  %v2229_v22 = vrot.slane %v6699_v24, 2  ;;  %v5534_v36 = vld [vmem:[%s5637_s14 + $0x28] sm:$0xff]   ;;  %4898 = vmatpush3.bf16.msra.mxu1 %v5537_v37 }
 0x1b2   : > { %4723 = vmatprep.subr.bf16.mxu0 %v5529_v27  ;;  %v2191_v16 = vrot.slane %v6684_v53, 1  ;;  %v2222_v21 = vrot.slane %v6697_v23, 1  ;;  %v2223_v34 = vrot.slane %v6699_v24, 1  ;;  %v2113_v51 = vrot.slane %v6702_v25, 1  ;;  %4899 = vmatprep.subr.bf16.mxu1 %v5540_v54  ;;  %v2045_v24 = vld [vmem:[#allocation2 + $0xe8] sm:$0x3] }
 0x1b3   : > { %5074 = vrot.lane.b32.xlu0 %v5073_v62, %s5571_s16  ;;  %v2190_v62 = vrot.slane %v6692_v48, 1  ;;  %v6746_v49 = vsel %vm2137_vm4, %v2212_v35, %v2213_v46  ;;  %v2114_v6 = vrot.slane %v6717_v63, 1  ;;  %v2166_v39 = vrot.slane %v6728_v32, 2  ;;  %v5538_v46 = vld [vmem:[%s5637_s14 + $0x78] sm:$0xff]  }
 0x1b4   : > { %5089 = vrot.lane.b32.xlu1 %v5088_v55, %s5570_s15  ;;  %v6726_v55 = vld [vmem:[#allocation2 + $0xb0] sm:$0xff]  ;;  %v2168_v53 = vrot.slane %v6732_v61, 2  ;;  %v2169_v27 = vrot.slane %v6734_v60, 2  ;;  %v2162_v30 = vrot.slane %v6702_v25, 2  ;;  %v2163_v35 = vrot.slane %v6717_v63, 2 }
 0x1b5   : > { %4724 = vmatpush3.bf16.msra.mxu0 %v5530_v15  ;;  %v2116_v41 = vrot.slane %v6726_v55, 1  ;;  %v2165_v28 = vrot.slane %v6726_v55, 2  ;;  %v5143_v15 = vpack.i.bf16 %v6697_v23, %v6692_v48  ;;  %vm2538_vm6 = vcmask 261120   ;;  %4900 = vmatpush3.bf16.msra.mxu1 %v5540_v54 }
 0x1b6   : > { %4725 = vmatprep.subr.bf16.mxu0 %v5531_v42  ;;  %v2119_v42 = vrot.slane %v6732_v61, 1  ;;  %v2224_v63 = vsel %vm2088_vm5, %v2222_v21, %v2223_v34  ;;  %v6807_v21 = vld [vmem:[#allocation2 + $0xe0] sm:$0xff]  ;;  %v2164_v23 = vsel %vm2137_vm4, %v2162_v30, %v2163_v35  ;;  %v2126_v35 = vrot.slane %v2045_v24, 1 }
 0x1b7   : > { %5084 = vrot.lane.b32.xlu0 %v5083_v2, %s5570_s15  ;;  %v5123_v2 = vpack.i.bf16 %v6721_v52, %v6713_v29  ;;  %vm2555_vm7 = vcmask 523264   ;;  %vm2572_vm8 = vcmask 785408  }
 0x1b8   : > { %5099 = vrot.lane.b32.xlu1 %v5098_v11, %s5572_s17  ;;  %v2161_v11 = vsel %vm2137_vm4, %v2159_v9, %v2160_v50  ;;  %v6764_v9 = vld [vmem:[#allocation2 + $0xd0] sm:$0xff]  ;;  %v6766_v50 = vld [vmem:[#allocation2 + $0xd8] sm:$0x3] }
 0x1b9   : > { %4726 = vmatpush3.bf16.msra.mxu0 %v5532_v45  ;;  %v5133_v1 = vpack.i.bf16 %v6746_v49, %v2161_v11  ;;  %v5148_v7 = vpack.i.bf16 %v2161_v11, %v6681_v38  ;;  %v2171_v45 = vrot.slane %v6764_v9, 2  ;;  %v2172_v37 = vrot.slane %v6766_v50, 2 }
 0x1ba   : > { %4727 = vmatprep.subr.bf16.mxu0 %v5533_v43  ;;  %v2642_v43 = vpack.c.bf16 %v6678_v44, %v6638_v17  ;;  %v2167_v44 = vsel %vm2137_vm4, %v2165_v28, %v2166_v39  ;;  %v2175_v39 = vrot.slane %v2045_v24, 2  ;;  %v6863_v24 = vld [vmem:[#allocation2 + $0x110] sm:$0xff] }
 0x1bb   : > { %5094 = vrot.lane.b32.xlu0 %v5093_v13, %s5572_s17  ;;  %v5178_v34 = vpack.i.bf16 %v2167_v44, %v2164_v23  ;;  %v2173_v28 = vsel %vm2137_vm4, %v2171_v45, %v2172_v37  ;;  %v6846_v45 = vld [vmem:[#allocation2 + $0x100] sm:$0xff]  ;;  %v2049_v37 = vld [vmem:[#allocation2 + $0x108] sm:$0x3] }
 0x1bc   : > { %5109 = vrot.lane.b32.xlu1 %v5093_v13, %s5571_s16  ;;  %v2117_v13 = vrot.slane %v6728_v32, 1  ;;  %v6778_v32 = vsel %vm2088_vm5, %v2190_v62, %v2191_v16  ;;  %v2645_v62 = vpack.c.bf16 %v2161_v11, %v6681_v38  ;;  %v2115_v16 = vsel %vm2088_vm5, %v2113_v51, %v2114_v6 }
 0x1bd   : > { %4728 = vmatpush3.bf16.msra.mxu0 %v5534_v36  ;;  %v2170_v38 = vsel %vm2137_vm4, %v2168_v53, %v2169_v27  ;;  %v2122_v51 = vrot.slane %v6764_v9, 1  ;;  %v2123_v11 = vrot.slane %v6766_v50, 1  ;;  %v2174_v6 = vrot.slane %v6807_v21, 2 }
 0x1be   : > { %v5173_v53 = vpack.i.bf16 %v6764_v9, %v6732_v61  ;;  %v2651_v27 = vpack.c.bf16 %v2173_v28, %v2170_v38 }
 0x1bf   : > { %5104 = vrot.lane.b32.xlu0 %v5103_v56, %s5571_s16  ;;  %v5535_v56 = vld [vmem:[%s5637_s14 + $0x70] sm:$0xff]   ;;  %v2176_v30 = vsel %vm2137_vm4, %v2174_v6, %v2175_v39 }
 0x1c0   : > { %5119 = vrot.lane.b32.xlu1 %v5118_v3, %s5570_s15  ;;  %v5536_v3 = vld [vmem:[%s5637_s14 + $0x30] sm:$0xff]   ;;  %4729 = vmatprep.subr.bf16.mxu0 %v5535_v56  ;;  %v5188_v56 = vpack.i.bf16 %v6732_v61, %v6726_v55 }
 0x1c1   : > { %4730 = vmatpush3.bf16.msra.mxu0 %v5536_v3 }
 0x1c2   : > { %4731 = vmatprep.subr.bf16.mxu0 %v5538_v46 }
 0x1c3   : > { %5114 = vrot.lane.b32.xlu0 %v5113_v40, %s5570_s15  ;;  %v5158_v40 = vpack.i.bf16 %v6692_v48, %v6673_v18  ;;  %v5539_v48 = vld [vmem:[%s5637_s14 + $0x38] sm:$0xff]  }
 0x1c4   : > { %5129 = vrot.lane.b32.xlu1 %v5128_v8, %s5572_s17  ;;  %v2120_v8 = vrot.slane %v6734_v60, 1  ;;  %v2639_v60 = vpack.c.bf16 %v6635_v33, %v6604_v14  ;;  %v2230_v14 = vsel %vm2137_vm4, %v2228_v0, %v2229_v22  ;;  %v5153_v33 = vpack.i.bf16 %v2224_v63, %v6778_v32 }
 0x1c5   : > { %4732 = vmatpush3.bf16.msra.mxu0 %v5539_v48  ;;  %v2648_v0 = vpack.c.bf16 %v2230_v14, %v6746_v49  ;;  %v5163_v22 = vpack.i.bf16 %v2170_v38, %v2167_v44  ;;  %v6848_v48 = vld [vmem:[#allocation2 + $0x120] sm:$0xff]  ;;  %v2054_v14 = vld [vmem:[#allocation2 + $0x130] sm:$0xff]  ;;  %v2181_v44 = vrot.slane %v2049_v37, 2 }
 0x1c6   : > { %4901 = vmatprep.mubr.msk.bf16.mxu1 %vm2538_vm6, %v2639_v60  ;;  %v6829_v54 = vsel %vm2088_vm5, %v2119_v42, %v2120_v8  ;;  %v5208_v42 = vpack.i.bf16 %v2173_v28, %v2170_v38  ;;  %v5218_v60 = vpack.i.bf16 %v6807_v21, %v6764_v9  ;;  %v2231_v38 = vrot.slane %v2054_v14, 2 }
 0x1c7   : > { %5124 = vrot.lane.b32.xlu0 %v5123_v2, %s5572_s17  ;;  %4902 = vmatmul.mubr.msk.bf16.vlgmr.msra.gmra.mrb[0].mxu1 %vm2538_vm6, %v2642_v43 }
 0x1c8   : > { %5139 = vrot.lane.b32.xlu1 %v5123_v2, %s5571_s16  ;;  %v6792_v2 = vsel %vm2088_vm5, %v2116_v41, %v2117_v13  ;;  %4905 = vmatprep.mubr.msk.bf16.mxu1 %vm2538_vm6, %v2645_v62  ;;  %v6817_v41 = vld [vmem:[#allocation2 + $0xf0] sm:$0xff]  ;;  %v2047_v13 = vld [vmem:[#allocation2 + $0xf8] sm:$0x3]  ;;  %v2180_v62 = vrot.slane %v6846_v45, 2 }
 0x1c9   : > { %v5168_v17 = vpack.i.bf16 %v6792_v2, %v2115_v16  ;;  %v2177_v49 = vrot.slane %v6817_v41, 2  ;;  %v2178_v36 = vrot.slane %v2047_v13, 2  ;;  %v2128_v8 = vrot.slane %v6817_v41, 1  ;;  %v2053_v16 = vld [vmem:[#allocation2 + $0x128] sm:$0x3] }
 0x1ca   : > { %v2129_v46 = vrot.slane %v2047_v13, 1  ;;  %v5203_v63 = vpack.i.bf16 %v6817_v41, %v6807_v21  ;;  %v2182_v13 = vsel %vm2137_vm4, %v2180_v62, %v2181_v44  ;;  %v2225_v62 = vrot.slane %v2054_v14, 1 }
 0x1cb   : > { %5134 = vrot.lane.b32.xlu0 %v5133_v1, %s5571_s16  ;;  %v6832_v1 = vsel %vm2088_vm5, %v2122_v51, %v2123_v11  ;;  %v2179_v3 = vsel %vm2137_vm4, %v2177_v49, %v2178_v36  ;;  %v2183_v11 = vrot.slane %v6863_v24, 2 }
 0x1cc   : > { %5149 = vrot.lane.b32.xlu1 %v5148_v7, %s5570_s15  ;;  %v5183_v7 = vpack.i.bf16 %v6832_v1, %v6829_v54  ;;  %v2654_v50 = vpack.c.bf16 %v2179_v3, %v2176_v30  ;;  %v5238_v39 = vpack.i.bf16 %v2179_v3, %v2176_v30  ;;  %v5223_v36 = vpack.i.bf16 %v2182_v13, %v2179_v3 }
 0x1cd   : > { %v5248_v3 = vpack.i.bf16 %v6846_v45, %v6817_v41 }
 0x1cf   : > { %5144 = vrot.lane.b32.xlu0 %v5143_v15, %s5570_s15  ;;  %4906 = vmatmul.mubr.msk.bf16.gmra.mrb[4].mxu1 %vm2538_vm6, %v2648_v0  ;;  %v5193_v15 = vpack.i.bf16 %v2176_v30, %v2173_v28  ;;  %v2051_v0 = vld [vmem:[#allocation2 + $0x118] sm:$0x3]  ;;  %v5233_v30 = vpack.i.bf16 %v6863_v24, %v6846_v45 }
 0x1d0   : > { %5159 = vrot.lane.b32.xlu1 %v5158_v40, %s5572_s17  ;;  %4909 = vmatprep.mubr.msk.bf16.mxu1 %vm2538_vm6, %v2651_v27  ;;  %v2125_v40 = vrot.slane %v6807_v21, 1  ;;  %v2184_v6 = vrot.slane %v2051_v0, 2 }
 0x1d2   : > { %v6856_v43 = vsel %vm2088_vm5, %v2125_v40, %v2126_v35  ;;  %v2185_v27 = vsel %vm2137_vm4, %v2183_v11, %v2184_v6 }
 0x1d3   : > { %5154 = vrot.lane.b32.xlu0 %v5153_v33, %s5572_s17  ;;  %v2055_v33 = vld [vmem:[#allocation2 + $0x138] sm:$0x3]  ;;  %v2657_v40 = vpack.c.bf16 %v2185_v27, %v2182_v13 }
 0x1d4   : > { %5169 = vrot.lane.b32.xlu1 %v5168_v17, %s5571_s16  ;;  %v6861_v17 = vsel %vm2088_vm5, %v2128_v8, %v2129_v46  ;;  %v2232_v23 = vrot.slane %v2055_v33, 2  ;;  %v2226_v44 = vrot.slane %v2055_v33, 1 }
 0x1d5   : > { %v5213_v51 = vpack.i.bf16 %v6861_v17, %v6856_v43 }
 0x1d6   : > { %v2233_v28 = vsel %vm2137_vm4, %v2231_v38, %v2232_v23  ;;  %v5263_v38 = vpack.i.bf16 %v2054_v14, %v6848_v48  ;;  %v5278_v23 = vpack.i.bf16 %v6848_v48, %v6863_v24 }
 0x1d7   : > { %5164 = vrot.lane.b32.xlu0 %v5163_v22, %s5571_s16  ;;  %4910 = vmatmul.mubr.msk.bf16.gmra.mrb[8].mxu1 %vm2538_vm6, %v2654_v50  ;;  %v2215_v22 = vrot.slane %v6848_v48, 2  ;;  %v2134_v50 = vrot.slane %v6863_v24, 1 }
 0x1d8   : > { %5179 = vrot.lane.b32.xlu1 %v5178_v34, %s5570_s15  ;;  %v2216_v34 = vrot.slane %v2053_v16, 2  ;;  %4913 = vmatprep.mubr.msk.bf16.mxu1 %vm2538_vm6, %v2657_v40 }
 0x1da   : > { %v2217_v49 = vsel %vm2137_vm4, %v2215_v22, %v2216_v34  ;;  %v2227_v22 = vsel %vm2088_vm5, %v2225_v62, %v2226_v44 }
 0x1db   : > { %5174 = vrot.lane.b32.xlu0 %v5173_v53, %s5570_s15  ;;  %v2131_v53 = vrot.slane %v6846_v45, 1  ;;  %v5253_v46 = vpack.i.bf16 %v2217_v49, %v2185_v27 }
 0x1dc   : > { %5189 = vrot.lane.b32.xlu1 %v5188_v56, %s5572_s17  ;;  %v2660_v56 = vpack.c.bf16 %v2233_v28, %v2217_v49 }
 0x1df   : > { %5184 = vrot.lane.b32.xlu0 %v5183_v7, %s5572_s17  ;;  %4914 = vmatmul.mubr.msk.bf16.gmra.mrb[12].mxu1 %vm2538_vm6, %v2660_v56 }
 0x1e0   : > { %5199 = vrot.lane.b32.xlu1 %v5183_v7, %s5571_s16  ;;  %v2132_v7 = vrot.slane %v2049_v37, 1  ;;  %v5268_v37 = vpack.i.bf16 %v2185_v27, %v2182_v13 }
 0x1e2   : > { %v6888_v35 = vsel %vm2088_vm5, %v2131_v53, %v2132_v7 }
 0x1e3   : > { %5194 = vrot.lane.b32.xlu0 %v5193_v15, %s5571_s16  ;;  %v2135_v15 = vrot.slane %v2051_v0, 1 }
 0x1e4   : > { %5209 = vrot.lane.b32.xlu1 %v5208_v42, %s5570_s15 }
 0x1e5   : > { %v6891_v42 = vsel %vm2088_vm5, %v2134_v50, %v2135_v15 }
 0x1e6   : > { %v5243_v8 = vpack.i.bf16 %v6891_v42, %v6888_v35 }
 0x1e7   : > { %5204 = vrot.lane.b32.xlu0 %v5203_v63, %s5570_s15  ;;  %v2193_v63 = vrot.slane %v6848_v48, 1 }
 0x1e8   : > { %5219 = vrot.lane.b32.xlu1 %v5218_v60, %s5572_s17  ;;  %v2194_v60 = vrot.slane %v2053_v16, 1 }
 0x1ea   : > { %v6906_v0 = vsel %vm2088_vm5, %v2193_v63, %v2194_v60 }
 0x1eb   : > { %5214 = vrot.lane.b32.xlu0 %v5213_v51, %s5572_s17  ;;  %v5273_v16 = vpack.i.bf16 %v2227_v22, %v6906_v0 }
 0x1ec   : > { %5229 = vrot.lane.b32.xlu1 %v5213_v51, %s5571_s16 }
 0x1ef   : > { %5224 = vrot.lane.b32.xlu0 %v5223_v36, %s5571_s16 }
 0x1f0   : > { %5239 = vrot.lane.b32.xlu1 %v5238_v39, %s5570_s15 }
 0x1f3   : > { %5234 = vrot.lane.b32.xlu0 %v5233_v30, %s5570_s15 }
 0x1f4   : > { %5249 = vrot.lane.b32.xlu1 %v5248_v3, %s5572_s17 }
 0x1f7   : > { %5244 = vrot.lane.b32.xlu0 %v5243_v8, %s5572_s17 }
 0x1f8   : > { %5259 = vrot.lane.b32.xlu1 %v5243_v8, %s5571_s16 }
 0x1fb   : > { %5254 = vrot.lane.b32.xlu0 %v5253_v46, %s5571_s16 }
 0x1fc   : > { %5269 = vrot.lane.b32.xlu1 %v5268_v37, %s5570_s15 }
 0x1ff   : > { %5264 = vrot.lane.b32.xlu0 %v5263_v38, %s5570_s15 }
 0x200   : > { %5279 = vrot.lane.b32.xlu1 %v5278_v23, %s5572_s17 }
 0x203   : > { %5274 = vrot.lane.b32.xlu0 %v5273_v16, %s5572_s17 }
 0x215   : > { %v5045_v33 = vpop.permute.xlu1 %5044 }
 0x216   : > { %v5047_v36 = vunpack.i.h.bf16 %v5045_v33  ;;  %v5046_v53 = vunpack.i.l.bf16 %v5045_v33 }
 0x219   : > { %v5050_v14 = vpop.permute.xlu0 %5049 }
 0x21a   : > { %v5060_v34 = vpop.permute.xlu1 %5059  ;;  %v5052_v51 = vunpack.i.h.bf16 %v5050_v14  ;;  %v5051_v11 = vunpack.i.l.bf16 %v5050_v14 }
 0x21b   : > { %v5062_v6 = vunpack.i.h.bf16 %v5060_v34  ;;  %v5061_v48 = vunpack.i.l.bf16 %v5060_v34 }
 0x21c   : > { %v2589_v15 = vsel %vm2538_vm6, %v6614_v57, %v5051_v11  ;;  %v2590_v40 = vsel %vm2538_vm6, %v6624_v59, %v5052_v51 }
 0x21d   : > { %v5055_v13 = vpop.permute.xlu0 %5054  ;;  %v2605_v60 = vsel %vm2555_vm7, %v2589_v15, %v5046_v53 }
 0x21e   : > { %v5057_v28 = vunpack.i.h.bf16 %v5055_v13  ;;  %v5056_v39 = vunpack.i.l.bf16 %v5055_v13  ;;  %v5070_v49 = vpop.permute.xlu1 %5069 }
 0x21f   : > { %v5072_v27 = vunpack.i.h.bf16 %v5070_v49  ;;  %v5071_v56 = vunpack.i.l.bf16 %v5070_v49 }
 0x220   : > { %v2540_v7 = vsel %vm2538_vm6, %v6591_v26, %v5057_v28  ;;  %v2539_v50 = vsel %vm2538_vm6, %v6597_v47, %v5056_v39  ;;  %v2606_v26 = vsel %vm2555_vm7, %v2590_v40, %v5047_v36 }
 0x221   : > { %v5065_v30 = vpop.permute.xlu0 %5064  ;;  %v2556_v3 = vsel %vm2555_vm7, %v2539_v50, %v5061_v48  ;;  %v2557_v8 = vsel %vm2555_vm7, %v2540_v7, %v5062_v6 }
 0x222   : > { %v5067_v46 = vunpack.i.h.bf16 %v5065_v30  ;;  %v5066_v37 = vunpack.i.l.bf16 %v5065_v30  ;;  %v5080_v63 = vpop.permute.xlu1 %5079  ;;  %v2573_v47 = vsel %vm2572_vm8, %v2556_v3, %v5071_v56  ;;  %v2574_v62 = vsel %vm2572_vm8, %v2557_v8, %v5072_v27 }
 0x223   : > { %v5082_v23 = vunpack.i.h.bf16 %v5080_v63  ;;  %v5081_v22 = vunpack.i.l.bf16 %v5080_v63  ;;  %v2637_v33 = vpack.c.bf16 %v2574_v62, %v2573_v47 }
 0x224   : > { %v2621_v57 = vsel %vm2572_vm8, %v2605_v60, %v5066_v37  ;;  %v2622_v59 = vsel %vm2572_vm8, %v2606_v26, %v5067_v46 }
 0x225   : > { %v5075_v44 = vpop.permute.xlu0 %5074  ;;  %v2638_v38 = vpack.c.bf16 %v2622_v59, %v2621_v57  ;;  %v2542_v11 = vsel %vm2538_vm6, %v6589_v19, %v5082_v23  ;;  %v2541_v6 = vsel %vm2538_vm6, %v6587_v5, %v5081_v22 }
 0x226   : > { %v5090_v16 = vpop.permute.xlu1 %5089  ;;  %v5077_v14 = vunpack.i.h.bf16 %v5075_v44  ;;  %v5076_v34 = vunpack.i.l.bf16 %v5075_v44 }
 0x227   : > { %2825 = vmatprep.mubr.bf16.mxu0 %v2638_v38  ;;  %v5092_v48 = vunpack.i.h.bf16 %v5090_v16  ;;  %v5091_v13 = vunpack.i.l.bf16 %v5090_v16 }
 0x228   : > { %2826 = vmatmul.mubr.bf16.vlgmr.msra.gmra.mrb[0].mxu0 %v2637_v33  ;;  %v2592_v27 = vsel %vm2538_vm6, %v6663_v58, %v5077_v14  ;;  %v2591_v56 = vsel %vm2538_vm6, %v6628_v31, %v5076_v34 }
 0x229   : > { %v5085_v51 = vpop.permute.xlu0 %5084  ;;  %v2558_v50 = vsel %vm2555_vm7, %v2541_v6, %v5091_v13  ;;  %v2559_v19 = vsel %vm2555_vm7, %v2542_v11, %v5092_v48 }
 0x22a   : > { %v5100_v28 = vpop.permute.xlu1 %5099  ;;  %v5087_v39 = vunpack.i.h.bf16 %v5085_v51  ;;  %v5086_v49 = vunpack.i.l.bf16 %v5085_v51 }
 0x22b   : > { %v5102_v36 = vunpack.i.h.bf16 %v5100_v28  ;;  %v5101_v53 = vunpack.i.l.bf16 %v5100_v28 }
 0x22c   : > { %v2607_v30 = vsel %vm2555_vm7, %v2591_v56, %v5086_v49  ;;  %v2608_v3 = vsel %vm2555_vm7, %v2592_v27, %v5087_v39 }
 0x22d   : > { %v5095_v7 = vpop.permute.xlu0 %5094  ;;  %v2575_v8 = vsel %vm2572_vm8, %v2558_v50, %v5101_v53  ;;  %v2576_v46 = vsel %vm2572_vm8, %v2559_v19, %v5102_v36 }
 0x22e   : > { %v5097_v15 = vunpack.i.h.bf16 %v5095_v7  ;;  %v5096_v5 = vunpack.i.l.bf16 %v5095_v7  ;;  %v5110_v40 = vpop.permute.xlu1 %5109  ;;  %v2640_v62 = vpack.c.bf16 %v2576_v46, %v2575_v8 }
 0x22f   : > { %v5112_v60 = vunpack.i.h.bf16 %v5110_v40  ;;  %v5111_v26 = vunpack.i.l.bf16 %v5110_v40 }
 0x230   : > { %v2623_v58 = vsel %vm2572_vm8, %v2607_v30, %v5096_v5  ;;  %v2624_v31 = vsel %vm2572_vm8, %v2608_v3, %v5097_v15 }
 0x231   : > { %v5105_v37 = vpop.permute.xlu0 %5104  ;;  %v2641_v63 = vpack.c.bf16 %v2624_v31, %v2623_v58  ;;  %v2544_v38 = vsel %vm2538_vm6, %v6640_v4, %v5112_v60  ;;  %v2543_v23 = vsel %vm2538_vm6, %v6611_v10, %v5111_v26 }
 0x232   : > { %v5120_v47 = vpop.permute.xlu1 %5119  ;;  %v5107_v57 = vunpack.i.h.bf16 %v5105_v37  ;;  %v5106_v59 = vunpack.i.l.bf16 %v5105_v37 }
 0x233   : > { %2833 = vmatprep.mubr.bf16.mxu0 %v2641_v63  ;;  %v5122_v22 = vunpack.i.h.bf16 %v5120_v47  ;;  %v5121_v16 = vunpack.i.l.bf16 %v5120_v47 }
 0x234   : > { %2834 = vmatmul.mubr.bf16.gmra.mrb[4].mxu0 %v2640_v62  ;;  %v2594_v6 = vsel %vm2538_vm6, %v6713_v29, %v5107_v57  ;;  %v2593_v48 = vsel %vm2538_vm6, %v6666_v20, %v5106_v59 }
 0x235   : > { %v5115_v44 = vpop.permute.xlu0 %5114  ;;  %v2560_v28 = vsel %vm2555_vm7, %v2543_v23, %v5121_v16  ;;  %v2561_v4 = vsel %vm2555_vm7, %v2544_v38, %v5122_v22 }
 0x236   : > { %v5130_v33 = vpop.permute.xlu1 %5129  ;;  %v5117_v14 = vunpack.i.h.bf16 %v5115_v44  ;;  %v5116_v34 = vunpack.i.l.bf16 %v5115_v44 }
 0x237   : > { %v5132_v51 = vunpack.i.h.bf16 %v5130_v33  ;;  %v5131_v11 = vunpack.i.l.bf16 %v5130_v33 }
 0x238   : > { %v2609_v36 = vsel %vm2555_vm7, %v2593_v48, %v5116_v34  ;;  %v2610_v53 = vsel %vm2555_vm7, %v2594_v6, %v5117_v14 }
 0x239   : > { %v5125_v13 = vpop.permute.xlu0 %5124  ;;  %v2577_v27 = vsel %vm2572_vm8, %v2560_v28, %v5131_v11  ;;  %v2578_v56 = vsel %vm2572_vm8, %v2561_v4, %v5132_v51 }
 0x23a   : > { %v5127_v39 = vunpack.i.h.bf16 %v5125_v13  ;;  %v5126_v10 = vunpack.i.l.bf16 %v5125_v13  ;;  %v5140_v49 = vpop.permute.xlu1 %5139  ;;  %v2643_v40 = vpack.c.bf16 %v2578_v56, %v2577_v27 }
 0x23b   : > { %v5142_v19 = vunpack.i.h.bf16 %v5140_v49  ;;  %v5141_v15 = vunpack.i.l.bf16 %v5140_v49 }
 0x23c   : > { %v2625_v29 = vsel %vm2572_vm8, %v2609_v36, %v5126_v10  ;;  %v2626_v20 = vsel %vm2572_vm8, %v2610_v53, %v5127_v39 }
 0x23d   : > { %v5135_v7 = vpop.permute.xlu0 %5134  ;;  %v2644_v50 = vpack.c.bf16 %v2626_v20, %v2625_v29  ;;  %v2546_v46 = vsel %vm2538_vm6, %v6673_v18, %v5142_v19  ;;  %v2545_v58 = vsel %vm2538_vm6, %v6646_v12, %v5141_v15 }
 0x23e   : > { %v5150_v5 = vpop.permute.xlu1 %5149  ;;  %v5137_v30 = vunpack.i.h.bf16 %v5135_v7  ;;  %v5136_v3 = vunpack.i.l.bf16 %v5135_v7 }
 0x23f   : > { %2841 = vmatprep.mubr.bf16.mxu0 %v2644_v50  ;;  %v5152_v31 = vunpack.i.h.bf16 %v5150_v5  ;;  %v5151_v37 = vunpack.i.l.bf16 %v5150_v5 }
 0x240   : > { %2842 = vmatmul.mubr.bf16.gmra.mrb[8].mxu0 %v2643_v40  ;;  %v2596_v57 = vsel %vm2538_vm6, %v6778_v32, %v5137_v30  ;;  %v2595_v59 = vsel %vm2538_vm6, %v6721_v52, %v5136_v3 }
 0x241   : > { %v5145_v8 = vpop.permute.xlu0 %5144  ;;  %v2562_v38 = vsel %vm2555_vm7, %v2545_v58, %v5151_v37  ;;  %v2563_v18 = vsel %vm2555_vm7, %v2546_v46, %v5152_v31 }
 0x242   : > { %v5160_v63 = vpop.permute.xlu1 %5159  ;;  %v5147_v60 = vunpack.i.h.bf16 %v5145_v8  ;;  %v5146_v26 = vunpack.i.l.bf16 %v5145_v8 }
 0x243   : > { %v5162_v47 = vunpack.i.h.bf16 %v5160_v63  ;;  %v5161_v62 = vunpack.i.l.bf16 %v5160_v63 }
 0x244   : > { %v2611_v16 = vsel %vm2555_vm7, %v2595_v59, %v5146_v26  ;;  %v2612_v33 = vsel %vm2555_vm7, %v2596_v57, %v5147_v60 }
 0x245   : > { %v5155_v44 = vpop.permute.xlu0 %5154  ;;  %v2579_v14 = vsel %vm2572_vm8, %v2562_v38, %v5161_v62  ;;  %v2580_v34 = vsel %vm2572_vm8, %v2563_v18, %v5162_v47 }
 0x246   : > { %v5157_v23 = vunpack.i.h.bf16 %v5155_v44  ;;  %v5156_v12 = vunpack.i.l.bf16 %v5155_v44  ;;  %v5170_v22 = vpop.permute.xlu1 %5169  ;;  %v2646_v28 = vpack.c.bf16 %v2580_v34, %v2579_v14 }
 0x247   : > { %v5172_v6 = vunpack.i.h.bf16 %v5170_v22  ;;  %v5171_v48 = vunpack.i.l.bf16 %v5170_v22 }
 0x248   : > { %v2627_v32 = vsel %vm2572_vm8, %v2611_v16, %v5156_v12  ;;  %v2628_v52 = vsel %vm2572_vm8, %v2612_v33, %v5157_v23 }
 0x249   : > { %v5165_v51 = vpop.permute.xlu0 %5164  ;;  %v2647_v11 = vpack.c.bf16 %v2628_v52, %v2627_v32  ;;  %v2548_v49 = vsel %vm2538_vm6, %v6726_v55, %v5172_v6  ;;  %v2547_v36 = vsel %vm2538_vm6, %v6702_v25, %v5171_v48 }
 0x24a   : > { %v5180_v13 = vpop.permute.xlu1 %5179  ;;  %v5167_v4 = vunpack.i.h.bf16 %v5165_v51  ;;  %v5166_v39 = vunpack.i.l.bf16 %v5165_v51 }
 0x24b   : > { %2849 = vmatprep.mubr.bf16.mxu0 %v2647_v11  ;;  %v5182_v53 = vunpack.i.h.bf16 %v5180_v13  ;;  %v5181_v27 = vunpack.i.l.bf16 %v5180_v13 }
 0x24c   : > { %2850 = vmatmul.mubr.bf16.gmra.mrb[12].mxu0 %v2646_v28  ;;  %v2598_v19 = vsel %vm2538_vm6, %v6829_v54, %v5167_v4  ;;  %v2597_v15 = vsel %vm2538_vm6, %v6792_v2, %v5166_v39 }
 0x24d   : > { %v5175_v10 = vpop.permute.xlu0 %5174  ;;  %v2564_v40 = vsel %vm2555_vm7, %v2547_v36, %v5181_v27  ;;  %v2565_v55 = vsel %vm2555_vm7, %v2548_v49, %v5182_v53 }
 0x24e   : > { %v5190_v56 = vpop.permute.xlu1 %5189  ;;  %v5177_v29 = vunpack.i.h.bf16 %v5175_v10  ;;  %v5176_v20 = vunpack.i.l.bf16 %v5175_v10 }
 0x24f   : > { %v5192_v7 = vunpack.i.h.bf16 %v5190_v56  ;;  %v5191_v50 = vunpack.i.l.bf16 %v5190_v56 }
 0x250   : > { %v2613_v8 = vsel %vm2555_vm7, %v2597_v15, %v5176_v20  ;;  %v2614_v46 = vsel %vm2555_vm7, %v2598_v19, %v5177_v29 }
 0x251   : > { %v5185_v5 = vpop.permute.xlu0 %5184  ;;  %v2581_v58 = vsel %vm2572_vm8, %v2564_v40, %v5191_v50  ;;  %v2582_v31 = vsel %vm2572_vm8, %v2565_v55, %v5192_v7 }
 0x252   : > { %v5187_v30 = vunpack.i.h.bf16 %v5185_v5  ;;  %v5186_v25 = vunpack.i.l.bf16 %v5185_v5  ;;  %v5200_v3 = vpop.permute.xlu1 %5199  ;;  %v2649_v62 = vpack.c.bf16 %v2582_v31, %v2581_v58 }
 0x253   : > { %v5202_v60 = vunpack.i.h.bf16 %v5200_v3  ;;  %v5201_v26 = vunpack.i.l.bf16 %v5200_v3 }
 0x254   : > { %v2629_v54 = vsel %vm2572_vm8, %v2613_v8, %v5186_v25  ;;  %v2630_v2 = vsel %vm2572_vm8, %v2614_v46, %v5187_v30 }
 0x255   : > { %v5195_v37 = vpop.permute.xlu0 %5194  ;;  %v2650_v63 = vpack.c.bf16 %v2630_v2, %v2629_v54  ;;  %v2550_v38 = vsel %vm2538_vm6, %v6764_v9, %v5202_v60  ;;  %v2549_v18 = vsel %vm2538_vm6, %v6732_v61, %v5201_v26 }
 0x256   : > { %v5210_v47 = vpop.permute.xlu1 %5209  ;;  %v5197_v57 = vunpack.i.h.bf16 %v5195_v37  ;;  %v5196_v59 = vunpack.i.l.bf16 %v5195_v37 }
 0x257   : > { %2857 = vmatprep.mubr.bf16.mxu0 %v2650_v63  ;;  %v5212_v23 = vunpack.i.h.bf16 %v5210_v47  ;;  %v5211_v12 = vunpack.i.l.bf16 %v5210_v47 }
 0x258   : > { %2858 = vmatmul.mubr.bf16.gmra.mrb[16].mxu0 %v2649_v62  ;;  %v2600_v32 = vsel %vm2538_vm6, %v6856_v43, %v5197_v57  ;;  %v2599_v52 = vsel %vm2538_vm6, %v6832_v1, %v5196_v59 }
 0x259   : > { %v5205_v44 = vpop.permute.xlu0 %5204  ;;  %v2566_v11 = vsel %vm2555_vm7, %v2549_v18, %v5211_v12  ;;  %v2567_v9 = vsel %vm2555_vm7, %v2550_v38, %v5212_v23 }
 0x25a   : > { %v5220_v22 = vpop.permute.xlu1 %5219  ;;  %v5207_v16 = vunpack.i.h.bf16 %v5205_v44  ;;  %v5206_v33 = vunpack.i.l.bf16 %v5205_v44 }
 0x25b   : > { %v5222_v14 = vunpack.i.h.bf16 %v5220_v22  ;;  %v5221_v34 = vunpack.i.l.bf16 %v5220_v22 }
 0x25c   : > { %v2615_v13 = vsel %vm2555_vm7, %v2599_v52, %v5206_v33  ;;  %v2616_v28 = vsel %vm2555_vm7, %v2600_v32, %v5207_v16 }
 0x25d   : > { %v5215_v51 = vpop.permute.xlu0 %5214  ;;  %v2583_v4 = vsel %vm2572_vm8, %v2566_v11, %v5221_v34  ;;  %v2584_v39 = vsel %vm2572_vm8, %v2567_v9, %v5222_v14 }
 0x25e   : > { %v5217_v6 = vunpack.i.h.bf16 %v5215_v51  ;;  %v5216_v61 = vunpack.i.l.bf16 %v5215_v51  ;;  %v5230_v48 = vpop.permute.xlu1 %5229  ;;  %v2652_v56 = vpack.c.bf16 %v2584_v39, %v2583_v4 }
 0x25f   : > { %v5232_v36 = vunpack.i.h.bf16 %v5230_v48  ;;  %v5231_v53 = vunpack.i.l.bf16 %v5230_v48 }
 0x260   : > { %v2631_v43 = vsel %vm2572_vm8, %v2615_v13, %v5216_v61  ;;  %v2632_v1 = vsel %vm2572_vm8, %v2616_v28, %v5217_v6 }
 0x261   : > { %v5225_v10 = vpop.permute.xlu0 %5224  ;;  %v2653_v49 = vpack.c.bf16 %v2632_v1, %v2631_v43  ;;  %v2552_v50 = vsel %vm2538_vm6, %v6817_v41, %v5232_v36  ;;  %v2551_v19 = vsel %vm2538_vm6, %v6807_v21, %v5231_v53 }
 0x262   : > { %v5240_v27 = vpop.permute.xlu1 %5239  ;;  %v5227_v29 = vunpack.i.h.bf16 %v5225_v10  ;;  %v5226_v20 = vunpack.i.l.bf16 %v5225_v10 }
 0x263   : > { %2865 = vmatprep.mubr.bf16.mxu0 %v2653_v49  ;;  %v5242_v15 = vunpack.i.h.bf16 %v5240_v27  ;;  %v5241_v5 = vunpack.i.l.bf16 %v5240_v27  ;;  %v7046_v27 = vld [vmem:[%s5637_s14 + $0x110] sm:$0xff]  }
 0x264   : > { %2866 = vmatmul.mubr.bf16.gmra.mrb[20].mxu0 %v2652_v56  ;;  %v2602_v8 = vsel %vm2538_vm6, %v6888_v35, %v5227_v29  ;;  %v2601_v46 = vsel %vm2538_vm6, %v6861_v17, %v5226_v20  ;;  %4917 = vmatprep.subr.bf16.mxu0 %v7046_v27  ;;  %v7051_v29 = vld [vmem:[%s5637_s14 + $0x118] sm:$0xff]  }
 0x265   : > { %v5235_v7 = vpop.permute.xlu0 %5234  ;;  %v2568_v31 = vsel %vm2555_vm7, %v2551_v19, %v5241_v5  ;;  %v2569_v41 = vsel %vm2555_vm7, %v2552_v50, %v5242_v15  ;;  %4918 = vmatpush3.bf16.msra.mxu0 %v7046_v27 }
 0x266   : > { %v5250_v40 = vpop.permute.xlu1 %5249  ;;  %v5237_v55 = vunpack.i.h.bf16 %v5235_v7  ;;  %v5236_v30 = vunpack.i.l.bf16 %v5235_v7  ;;  %4919 = vmatprep.subr.bf16.mxu0 %v7051_v29 }
 0x267   : > { %v5252_v25 = vunpack.i.h.bf16 %v5250_v40  ;;  %v5251_v3 = vunpack.i.l.bf16 %v5250_v40 }
 0x268   : > { %v2617_v37 = vsel %vm2555_vm7, %v2601_v46, %v5236_v30  ;;  %v2618_v63 = vsel %vm2555_vm7, %v2602_v8, %v5237_v55  ;;  %v2987_v46 = vlaneseq }
 0x269   : > { %v5245_v58 = vpop.permute.xlu0 %5244  ;;  %v2585_v60 = vsel %vm2572_vm8, %v2568_v31, %v5251_v3  ;;  %v2586_v26 = vsel %vm2572_vm8, %v2569_v41, %v5252_v25  ;;  %4920 = vmatpush3.bf16.msra.mxu0 %v7051_v29  ;;  %v5543_v31 = vld [vmem:[%s5637_s14 + $0xd0] sm:$0xff]  }
 0x26a   : > { %v5247_v54 = vunpack.i.h.bf16 %v5245_v58  ;;  %v5246_v21 = vunpack.i.l.bf16 %v5245_v58  ;;  %v5260_v2 = vpop.permute.xlu1 %5259  ;;  %v2655_v38 = vpack.c.bf16 %v2586_v26, %v2585_v60  ;;  %v7079_v58 = vshrl.u32 %v2987_v46, 7  ;;  %v5544_v41 = vld [vmem:[%s5637_s14 + $0x90] sm:$0xff]   ;;  %4791 = vmatprep.subr.bf16.mxu1 %v5543_v31 }
 0x26b   : > { %v5262_v57 = vunpack.i.h.bf16 %v5260_v2  ;;  %v5261_v59 = vunpack.i.l.bf16 %v5260_v2  ;;  %4792 = vmatpush3.bf16.msra.mxu1 %v5544_v41  ;;  %v5546_v2 = vld [vmem:[%s5637_s14 + $0x98] sm:$0xff]  }
 0x26c   : > { %v2633_v35 = vsel %vm2572_vm8, %v2617_v37, %v5246_v21  ;;  %v2634_v17 = vsel %vm2572_vm8, %v2618_v63, %v5247_v54  ;;  %v5545_v54 = vld [vmem:[%s5637_s14 + $0xd8] sm:$0xff]   ;;  %v2989_v21 = vsub.s32 0, %v7079_v58  ;;  %v1961_v37 = vld [vmem:[%s5627_s8] sm:$0x3] }
 0x26d   : > { %v5255_v47 = vpop.permute.xlu0 %5254  ;;  %v2656_v62 = vpack.c.bf16 %v2634_v17, %v2633_v35  ;;  %v2554_v22 = vsel %vm2538_vm6, %v6863_v24, %v5262_v57  ;;  %v2553_v16 = vsel %vm2538_vm6, %v6846_v45, %v5261_v59  ;;  %4793 = vmatprep.subr.bf16.mxu1 %v5545_v54  ;;  %v5547_v63 = vld [vmem:[%s5637_s14 + $0xe0] sm:$0xff]   ;;  %v5553_v41 = vld [vmem:[%s5637_s14 + $0xf8] sm:$0xff]  }
 0x26e   : > { %v5270_v44 = vpop.permute.xlu1 %5269  ;;  %v5257_v18 = vunpack.i.h.bf16 %v5255_v47  ;;  %v5256_v23 = vunpack.i.l.bf16 %v5255_v47  ;;  %v1962_v35 = vld [vmem:[%s5632_s11] sm:$0x3] }
 0x26f   : > { %2873 = vmatprep.mubr.bf16.mxu0 %v2656_v62  ;;  %v5272_v33 = vunpack.i.h.bf16 %v5270_v44  ;;  %v5271_v14 = vunpack.i.l.bf16 %v5270_v44  ;;  %v7089_v62 = vrot.slane %v1961_v37, %v2989_v21  ;;  %4794 = vmatpush3.bf16.msra.mxu1 %v5546_v2  ;;  %v5548_v57 = vld [vmem:[%s5637_s14 + $0xa0] sm:$0xff]   ;;  %v5554_v37 = vld [vmem:[%s5637_s14 + $0xb8] sm:$0xff]  }
 0x270   : > { %2874 = vmatmul.mubr.bf16.gmra.mrb[24].mxu0 %v2655_v38  ;;  %v2604_v9 = vsel %vm2538_vm6, %v6906_v0, %v5257_v18  ;;  %v2603_v6 = vsel %vm2538_vm6, %v6891_v42, %v5256_v23  ;;  %4795 = vmatprep.subr.bf16.mxu1 %v5547_v63  ;;  %v7092_v18 = vrot.slane %v1962_v35, %v2989_v21 }
 0x271   : > { %v5265_v12 = vpop.permute.xlu0 %5264  ;;  %v2570_v48 = vsel %vm2555_vm7, %v2553_v16, %v5271_v14  ;;  %v2571_v24 = vsel %vm2555_vm7, %v2554_v22, %v5272_v33 }
 0x272   : > { %v5280_v34 = vpop.permute.xlu1 %5279  ;;  %v5267_v32 = vunpack.i.h.bf16 %v5265_v12  ;;  %v5266_v52 = vunpack.i.l.bf16 %v5265_v12 }
 0x273   : > { %v5282_v51 = vunpack.i.h.bf16 %v5280_v34  ;;  %v5281_v11 = vunpack.i.l.bf16 %v5280_v34  ;;  %4796 = vmatpush3.bf16.msra.mxu1 %v5548_v57  ;;  %v5549_v34 = vld [vmem:[%s5637_s14 + $0xe8] sm:$0xff]  }
 0x274   : > { %v2619_v28 = vsel %vm2555_vm7, %v2603_v6, %v5266_v52  ;;  %v2620_v4 = vsel %vm2555_vm7, %v2604_v9, %v5267_v32  ;;  %v5550_v32 = vld [vmem:[%s5637_s14 + $0xa8] sm:$0xff]   ;;  %4797 = vmatprep.subr.bf16.mxu1 %v5549_v34 }
 0x275   : > { %v5275_v61 = vpop.permute.xlu0 %5274  ;;  %v2587_v39 = vsel %vm2572_vm8, %v2570_v48, %v5281_v11  ;;  %v2588_v0 = vsel %vm2572_vm8, %v2571_v24, %v5282_v51 }
 0x276   : > { %v5277_v45 = vunpack.i.h.bf16 %v5275_v61  ;;  %v5276_v13 = vunpack.i.l.bf16 %v5275_v61  ;;  %v2658_v10 = vpack.c.bf16 %v2588_v0, %v2587_v39 }
 0x277   : > { %4798 = vmatpush3.bf16.msra.mxu1 %v5550_v32 }
 0x278   : > { %v2635_v43 = vsel %vm2572_vm8, %v2619_v28, %v5276_v13  ;;  %v2636_v42 = vsel %vm2572_vm8, %v2620_v4, %v5277_v45  ;;  %v7103_v45 = vld [vmem:[#allocation3] sm:$0xff]  ;;  %v3098_v13 = vld [vmem:[#allocation3 + $0x8] sm:$0x3]  ;;  %v5551_v28 = vld [vmem:[%s5637_s14 + $0xf0] sm:$0xff]  }
 0x279   : > { %v2659_v1 = vpack.c.bf16 %v2636_v42, %v2635_v43  ;;  %v5552_v4 = vld [vmem:[%s5637_s14 + $0xb0] sm:$0xff]   ;;  %4799 = vmatprep.subr.bf16.mxu1 %v5551_v28  ;;  %v3218_v35 = vrot.slane %v3098_v13, 2 }
 0x27b   : > { %2881 = vmatprep.mubr.bf16.mxu0 %v2659_v1  ;;  %v3169_v1 = vrot.slane %v7103_v45, 1  ;;  %4800 = vmatpush3.bf16.msra.mxu1 %v5552_v4 }
 0x27c   : > { %2882 = vmatmul.mubr.bf16.gmra.mrb[28].mxu0 %v2658_v10  ;;  %v3170_v10 = vrot.slane %v3098_v13, 1  ;;  %4801 = vmatprep.subr.bf16.mxu1 %v5553_v41 }
 0x27e   : > { %v3171_v57 = vsel %vm2088_vm5, %v3169_v1, %v3170_v10 }
 0x27f   : > { %4802 = vmatpush3.bf16.msra.mxu1 %v5554_v37 }
 0x29a   : > { %v7041_v49 = vpop.f32.mrb[0].mxu1 }
 0x29b   : > { %v2924_v36 = vpop.f32.mrb[1].mxu1 }
 0x29c   : > { %v7043_v53 = vpop.f32.mrb[2].mxu1 }
 0x29d   : > { %v2927_v56 = vpop.f32.mrb[3].mxu1 }
 0x2a2   : > { %v7053_v20 = vpop.f32.mrb[4].mxu1 }
 0x2a3   : > { %v7056_v7 = vpop.f32.mrb[5].mxu1 }
 0x2a4   : > { %v7059_v50 = vpop.f32.mrb[6].mxu1 }
 0x2a5   : > { %v7061_v19 = vpop.f32.mrb[7].mxu1 }
 0x2aa   : > { %v7063_v15 = vpop.f32.mrb[8].mxu1 }
 0x2ab   : > { %v7065_v5 = vpop.f32.mrb[9].mxu1 }
 0x2ac   : > { %v7067_v40 = vpop.f32.mrb[10].mxu1 }
 0x2ad   : > { %v7069_v55 = vpop.f32.mrb[11].mxu1 }
 0x2b2   : > { %v7071_v30 = vpop.f32.mrb[12].mxu1 }
 0x2b3   : > { %v7073_v25 = vpop.f32.mrb[13].mxu1 }
 0x2b4   : > { %v7075_v3 = vpop.f32.mrb[14].mxu1 }
 0x2b5   : > { %v7077_v8 = vpop.f32.mrb[15].mxu1 }
 0x2fb   : > { %v4733_v60 = vpop.f32.mrb[0].mxu0 }
 0x2fc   : > { %v4734_v26 = vpop.f32.mrb[1].mxu0 }
 0x2fd   : > { %v4735_v17 = vadd.f32 %v4734_v26, %v4733_v60  ;;  %v4736_v47 = vpop.f32.mrb[2].mxu0 }
 0x2fe   : > { %v4737_v59 = vpop.f32.mrb[3].mxu0 }
 0x2ff   : > { %v4738_v44 = vadd.f32 %v4737_v59, %v4736_v47  ;;  %v2925_v38 = vadd.f32 %v4735_v17, %v2924_v36 }
 0x301   : > { %v2991_v23 = vmul.f32 %v7089_v62, %v2925_v38  ;;  %v2928_v12 = vadd.f32 %v4738_v44, %v2927_v56 }
 0x303   : > { %v3011_v22 = vadd.f32 %v7092_v18, %v2991_v23  ;;  %v2992_v16 = vmul.f32 %v7089_v62, %v2928_v12  ;;  %v5555_v23 = vld [vmem:[%s5637_s14 + $0x100] sm:$0xff]  }
 0x304   : > { %v5556_v12 = vld [vmem:[%s5637_s14 + $0xc0] sm:$0xff]   ;;  %4803 = vmatprep.subr.bf16.mxu1 %v5555_v23 }
 0x305   : > { %v3027_v33 = vmax.f32 %v3011_v22, 0.0  ;;  %v3012_v14 = vadd.f32 %v7092_v18, %v2992_v16  ;;  %4804 = vmatpush3.bf16.msra.mxu1 %v5556_v12 }
 0x307   : > { %3044 = vst.msk [vmem:[#allocation3 + $0x11] sm:$0xff] %vm2538_vm6, %v3027_v33  ;;  %v3028_v52 = vmax.f32 %v3012_v14, 0.0  ;;  %v4739_v51 = vpop.f32.mrb[4].mxu0 }
 0x308   : > { %v4740_v11 = vpop.f32.mrb[5].mxu0 }
 0x309   : > { %3045 = vst.msk [vmem:[#allocation3 + $0x21] sm:$0xff] %vm2538_vm6, %v3028_v52  ;;  %v4741_v9 = vadd.f32 %v4740_v11, %v4739_v51  ;;  %v4742_v6 = vpop.f32.mrb[6].mxu0 }
 0x30a   : > { %v4743_v61 = vpop.f32.mrb[7].mxu0 }
 0x30b   : > { %v2933_v48 = vadd.f32 %v7041_v49, %v4741_v9  ;;  %v4744_v24 = vadd.f32 %v4743_v61, %v4742_v6  ;;  %v3217_v49 = vrot.slane %v7103_v45, 2  ;;  %v5557_v61 = vld [vmem:[%s5637_s14 + $0x108] sm:$0xff]  }
 0x30c   : > { %4805 = vmatprep.subr.bf16.mxu1 %v5557_v61 }
 0x30d   : > { %v2993_v39 = vmul.f32 %v7089_v62, %v2933_v48  ;;  %v2936_v0 = vadd.f32 %v7043_v53, %v4744_v24  ;;  %v3219_v11 = vsel %vm2137_vm4, %v3217_v49, %v3218_v35  ;;  %v5558_v48 = vld [vmem:[%s5637_s14 + $0xc8] sm:$0xff]  }
 0x30e   : > { %v7109_v43 = vld [vmem:[#allocation3 + $0x10] sm:$0xff]  ;;  %v3100_v42 = vld [vmem:[#allocation3 + $0x18] sm:$0x3]  ;;  %4806 = vmatpush3.bf16.msra.mxu1 %v5558_v48 }
 0x30f   : > { %v3013_v36 = vadd.f32 %v7092_v18, %v2993_v39  ;;  %v2994_v56 = vmul.f32 %v7089_v62, %v2936_v0  ;;  %v3220_v46 = vrot.slane %v7109_v43, 2  ;;  %v3221_v31 = vrot.slane %v3100_v42, 2  ;;  %4953 = vmatprep.subr.bf16.mxu1 %v7046_v27 }
 0x310   : > { %v7117_v53 = vld [vmem:[#allocation3 + $0x20] sm:$0xff]  ;;  %v7119_v54 = vld [vmem:[#allocation3 + $0x28] sm:$0x3]  ;;  %v3172_v21 = vrot.slane %v7109_v43, 1  ;;  %v3173_v2 = vrot.slane %v3100_v42, 1 }
 0x311   : > { %v3029_v63 = vmax.f32 %v3013_v36, 0.0  ;;  %v3014_v60 = vadd.f32 %v7092_v18, %v2994_v56  ;;  %v5283_v26 = vpack.i.bf16 %v7117_v53, %v7109_v43  ;;  %v3223_v17 = vrot.slane %v7117_v53, 2 }
 0x312   : > { %v3224_v47 = vrot.slane %v7119_v54, 2  ;;  %v7130_v59 = vsel %vm2088_vm5, %v3172_v21, %v3173_v2  ;;  %v3222_v16 = vsel %vm2137_vm4, %v3220_v46, %v3221_v31  ;;  %v3175_v0 = vrot.slane %v7117_v53, 1 }
 0x313   : > { %3046 = vst.msk [vmem:[#allocation3 + $0x31] sm:$0xff] %vm2538_vm6, %v3029_v63  ;;  %v3030_v44 = vmax.f32 %v3014_v60, 0.0  ;;  %v4745_v38 = vpop.f32.mrb[8].mxu0  ;;  %5284 = vrot.lane.b32.xlu1 %v5283_v26, %s5572_s17  ;;  %v5288_v52 = vpack.i.bf16 %v7130_v59, %v3171_v57  ;;  %v5293_v28 = vpack.i.bf16 %v3222_v16, %v3219_v11 }
 0x314   : > { %v4746_v22 = vpop.f32.mrb[9].mxu0  ;;  %v7138_v33 = vsel %vm2137_vm4, %v3223_v17, %v3224_v47 }
 0x315   : > { %3047 = vst.msk [vmem:[#allocation3 + $0x41] sm:$0xff] %vm2538_vm6, %v3030_v44  ;;  %v4747_v14 = vadd.f32 %v4746_v22, %v4745_v38  ;;  %v4748_v34 = vpop.f32.mrb[10].mxu0  ;;  %v5298_v32 = vpack.i.bf16 %v7138_v33, %v3222_v16 }
 0x316   : > { %v4749_v51 = vpop.f32.mrb[11].mxu0 }
 0x317   : > { %v2941_v9 = vadd.f32 %v4747_v14, %v7056_v7  ;;  %v4750_v6 = vadd.f32 %v4749_v51, %v4748_v34  ;;  %5299 = vrot.lane.b32.xlu0 %v5298_v32, %s5571_s16  ;;  %5289 = vrot.lane.b32.xlu1 %v5288_v52, %s5571_s16  ;;  %v3176_v7 = vrot.slane %v7119_v54, 1 }
 0x319   : > { %v2995_v24 = vmul.f32 %v7089_v62, %v2941_v9  ;;  %v2944_v13 = vadd.f32 %v4750_v6, %v7061_v19  ;;  %v7172_v63 = vsel %vm2088_vm5, %v3175_v0, %v3176_v7 }
 0x31a   : > { %v7151_v4 = vld [vmem:[#allocation3 + $0x30] sm:$0xff]  ;;  %v3104_v39 = vld [vmem:[#allocation3 + $0x38] sm:$0x3] }
 0x31b   : > { %v3015_v42 = vadd.f32 %v7092_v18, %v2995_v24  ;;  %v2996_v1 = vmul.f32 %v7089_v62, %v2944_v13  ;;  %5294 = vrot.lane.b32.xlu1 %v5293_v28, %s5570_s15  ;;  %v5303_v10 = vpack.i.bf16 %v7151_v4, %v7117_v53  ;;  %v3226_v19 = vrot.slane %v7151_v4, 2 }
 0x31c   : > { %v7162_v49 = vld [vmem:[#allocation3 + $0x40] sm:$0xff]  ;;  %v3227_v36 = vrot.slane %v3104_v39, 2  ;;  %v3178_v56 = vrot.slane %v7151_v4, 1  ;;  %v3179_v46 = vrot.slane %v3104_v39, 1  ;;  %v3106_v31 = vld [vmem:[#allocation3 + $0x48] sm:$0x3] }
 0x31d   : > { %v3031_v41 = vmax.f32 %v3015_v42, 0.0  ;;  %v3016_v54 = vadd.f32 %v7092_v18, %v2996_v1  ;;  %5304 = vrot.lane.b32.xlu0 %v5303_v10, %s5570_s15  ;;  %v5308_v21 = vpack.i.bf16 %v7162_v49, %v7151_v4  ;;  %v3229_v2 = vrot.slane %v7162_v49, 2 }
 0x31e   : > { %v3228_v37 = vsel %vm2137_vm4, %v3226_v19, %v3227_v36  ;;  %v7175_v60 = vsel %vm2088_vm5, %v3178_v56, %v3179_v46  ;;  %v3230_v26 = vrot.slane %v3106_v31, 2  ;;  %v3181_v32 = vrot.slane %v7162_v49, 1 }
 0x31f   : > { %3048 = vst.msk [vmem:[#allocation3 + $0x51] sm:$0xff] %vm2538_vm6, %v3031_v41  ;;  %v3032_v35 = vmax.f32 %v3016_v54, 0.0  ;;  %v4751_v17 = vpop.f32.mrb[12].mxu0  ;;  %5309 = vrot.lane.b32.xlu1 %v5308_v21, %s5572_s17  ;;  %v3715_v47 = vpack.c.bf16 %v3228_v37, %v7138_v33  ;;  %v5313_v57 = vpack.i.bf16 %v7175_v60, %v7172_v63  ;;  %v3182_v52 = vrot.slane %v3106_v31, 1 }
 0x320   : > { %v4752_v44 = vpop.f32.mrb[13].mxu0  ;;  %v7183_v38 = vsel %vm2137_vm4, %v3229_v2, %v3230_v26  ;;  %v5323_v9 = vpack.i.bf16 %v3228_v37, %v7138_v33 }
 0x321   : > { %3049 = vst.msk [vmem:[#allocation3 + $0x61] sm:$0xff] %vm2538_vm6, %v3032_v35  ;;  %v4753_v23 = vadd.f32 %v4752_v44, %v4751_v17  ;;  %4921 = vmatprep.mubr.msk.bf16.mxu0 %vm2538_vm6, %v3715_v47  ;;  %v4754_v12 = vpop.f32.mrb[14].mxu0  ;;  %5314 = vrot.lane.b32.xlu0 %v5313_v57, %s5572_s17  ;;  %v5328_v34 = vpack.i.bf16 %v7183_v38, %v3228_v37  ;;  %v7233_v47 = vld [vmem:[#allocation3 + $0x90] sm:$0xff] }
 0x322   : > { %v4755_v22 = vpop.f32.mrb[15].mxu0  ;;  %v7207_v39 = vsel %vm2088_vm5, %v3181_v32, %v3182_v52 }
 0x323   : > { %v2949_v16 = vadd.f32 %v7053_v20, %v4753_v23  ;;  %v4756_v14 = vadd.f32 %v4755_v22, %v4754_v12  ;;  %5319 = vrot.lane.b32.xlu1 %v5313_v57, %s5571_s16  ;;  %v7237_v23 = vld [vmem:[#allocation3 + $0x98] sm:$0x3] }
 0x325   : > { %v2997_v51 = vmul.f32 %v7089_v62, %v2949_v16  ;;  %v2952_v11 = vadd.f32 %v7059_v50, %v4756_v14  ;;  %5329 = vrot.lane.b32.xlu0 %v5328_v34, %s5571_s16  ;;  %v3307_v34 = vrot.slane %v7233_v47, 2 }
 0x326   : > { %v7196_v6 = vld [vmem:[#allocation3 + $0x50] sm:$0xff]  ;;  %v3108_v61 = vld [vmem:[#allocation3 + $0x58] sm:$0x3] }
 0x327   : > { %v3017_v20 = vadd.f32 %v7092_v18, %v2997_v51  ;;  %v2998_v48 = vmul.f32 %v7089_v62, %v2952_v11  ;;  %v3232_v24 = vrot.slane %v7196_v6, 2  ;;  %v3233_v13 = vrot.slane %v3108_v61, 2  ;;  %5324 = vrot.lane.b32.xlu1 %v5323_v9, %s5570_s15 }
 0x328   : > { %v5333_v28 = vpack.i.bf16 %v7196_v6, %v7162_v49  ;;  %v7204_v50 = vld [vmem:[#allocation3 + $0x60] sm:$0xff]  ;;  %v3184_v33 = vrot.slane %v7196_v6, 1  ;;  %v3185_v0 = vrot.slane %v3108_v61, 1  ;;  %v7210_v7 = vld [vmem:[#allocation3 + $0x68] sm:$0x3] }
 0x329   : > { %v3033_v42 = vmax.f32 %v3017_v20, 0.0  ;;  %v3018_v1 = vadd.f32 %v7092_v18, %v2998_v48  ;;  %v3234_v10 = vsel %vm2137_vm4, %v3232_v24, %v3233_v13  ;;  %v5338_v19 = vpack.i.bf16 %v7204_v50, %v7196_v6 }
 0x32a   : > { %v3718_v36 = vpack.c.bf16 %v3234_v10, %v7183_v38  ;;  %5334 = vrot.lane.b32.xlu0 %v5333_v28, %s5570_s15  ;;  %v7219_v56 = vsel %vm2088_vm5, %v3184_v33, %v3185_v0  ;;  %v3235_v46 = vrot.slane %v7204_v50, 2  ;;  %v3236_v31 = vrot.slane %v7210_v7, 2 }
 0x32b   : > { %3050 = vst.msk [vmem:[#allocation3 + $0x71] sm:$0xff] %vm2538_vm6, %v3033_v42  ;;  %v3034_v41 = vmax.f32 %v3018_v1, 0.0  ;;  %v4757_v54 = vpop.f32.mrb[16].mxu0  ;;  %5339 = vrot.lane.b32.xlu1 %v5338_v19, %s5572_s17  ;;  %v5343_v21 = vpack.i.bf16 %v7219_v56, %v7207_v39  ;;  %v5353_v14 = vpack.i.bf16 %v3234_v10, %v7183_v38  ;;  %v3187_v51 = vrot.slane %v7204_v50, 1 }
 0x32c   : > { %v4758_v2 = vpop.f32.mrb[17].mxu0  ;;  %4922 = vmatmul.mubr.msk.bf16.vlgmr.msra.gmra.mrb[32].mxu0 %vm2538_vm6, %v3718_v36  ;;  %v7230_v35 = vsel %vm2137_vm4, %v3235_v46, %v3236_v31  ;;  %v3188_v11 = vrot.slane %v7210_v7, 1 }
 0x32d   : > { %3051 = vst.msk [vmem:[#allocation3 + $0x81] sm:$0xff] %vm2538_vm6, %v3034_v41  ;;  %v4759_v37 = vadd.f32 %v4758_v2, %v4757_v54  ;;  %v4760_v26 = vpop.f32.mrb[18].mxu0  ;;  %v5358_v12 = vpack.i.bf16 %v7230_v35, %v3234_v10 }
 0x32e   : > { %5344 = vrot.lane.b32.xlu0 %v5343_v21, %s5572_s17  ;;  %v4761_v17 = vpop.f32.mrb[19].mxu0 }
 0x32f   : > { %v4762_v57 = vadd.f32 %v4761_v17, %v4760_v26  ;;  %v2957_v44 = vadd.f32 %v4759_v37, %v7065_v5  ;;  %5349 = vrot.lane.b32.xlu1 %v5343_v21, %s5571_s16  ;;  %v3308_v5 = vrot.slane %v7237_v23, 2  ;;  %v7271_v37 = vsel %vm2088_vm5, %v3187_v51, %v3188_v11  ;;  %v7273_v26 = vld [vmem:[#allocation3 + $0xa0] sm:$0xff] }
 0x330   : > { %v3193_v51 = vrot.slane %v7273_v26, 1 }
 0x331   : > { %v2999_v22 = vmul.f32 %v7089_v62, %v2957_v44  ;;  %v2960_v16 = vadd.f32 %v4762_v57, %v7069_v55  ;;  %v3309_v19 = vsel %vm2137_vm4, %v3307_v34, %v3308_v5  ;;  %v3302_v34 = vrot.slane %v7237_v23, 1 }
 0x332   : > { %5359 = vrot.lane.b32.xlu0 %v5358_v12, %s5571_s16  ;;  %v7245_v32 = vld [vmem:[#allocation3 + $0x70] sm:$0xff]  ;;  %v3112_v52 = vld [vmem:[#allocation3 + $0x78] sm:$0x3] }
 0x333   : > { %v3019_v9 = vadd.f32 %v7092_v18, %v2999_v22  ;;  %v3000_v61 = vmul.f32 %v7089_v62, %v2960_v16  ;;  %5354 = vrot.lane.b32.xlu1 %v5353_v14, %s5570_s15  ;;  %v5363_v55 = vpack.i.bf16 %v7245_v32, %v7204_v50  ;;  %v3238_v38 = vrot.slane %v7245_v32, 2  ;;  %v3118_v22 = vld [vmem:[#allocation3 + $0xa8] sm:$0x3] }
 0x334   : > { %v3113_v20 = vld [vmem:[#allocation3 + $0x80] sm:$0xff]  ;;  %v3239_v48 = vrot.slane %v3112_v52, 2  ;;  %v3114_v24 = vld [vmem:[#allocation3 + $0x88] sm:$0x3]  ;;  %v3190_v13 = vrot.slane %v7245_v32, 1  ;;  %v3191_v28 = vrot.slane %v3112_v52, 1 }
 0x335   : > { %v3035_v33 = vmax.f32 %v3019_v9, 0.0  ;;  %v3020_v0 = vadd.f32 %v7092_v18, %v3000_v61  ;;  %v3291_v7 = vrot.slane %v3113_v20, 2  ;;  %v5373_v42 = vpack.i.bf16 %v3113_v20, %v7245_v32 }
 0x336   : > { %5364 = vrot.lane.b32.xlu0 %v5363_v55, %s5570_s15  ;;  %v3240_v1 = vsel %vm2137_vm4, %v3238_v38, %v3239_v48  ;;  %v3292_v10 = vrot.slane %v3114_v24, 2  ;;  %v7263_v36 = vsel %vm2088_vm5, %v3190_v13, %v3191_v28  ;;  %v5368_v21 = vpack.i.bf16 %v7233_v47, %v3113_v20 }
 0x337   : > { %3052 = vst.msk [vmem:[#allocation3 + $0xb1] sm:$0xff] %vm2538_vm6, %v3035_v33  ;;  %v3036_v46 = vmax.f32 %v3020_v0, 0.0  ;;  %v4763_v31 = vpop.f32.mrb[20].mxu0  ;;  %5374 = vrot.lane.b32.xlu1 %v5373_v42, %s5572_s17  ;;  %v3721_v41 = vpack.c.bf16 %v3240_v1, %v7230_v35  ;;  %v5383_v12 = vpack.i.bf16 %v7263_v36, %v7271_v37  ;;  %v3301_v16 = vrot.slane %v7233_v47, 1 }
 0x338   : > { %v4764_v54 = vpop.f32.mrb[21].mxu0  ;;  %v3293_v2 = vsel %vm2137_vm4, %v3291_v7, %v3292_v10  ;;  %v3269_v11 = vrot.slane %v3113_v20, 1  ;;  %v3270_v9 = vrot.slane %v3114_v24, 1  ;;  %v3194_v61 = vrot.slane %v3118_v22, 1 }
 0x339   : > { %3053 = vst.msk [vmem:[#allocation3 + $0xc1] sm:$0xff] %vm2538_vm6, %v3036_v46  ;;  %v4765_v17 = vadd.f32 %v4764_v54, %v4763_v31  ;;  %4925 = vmatprep.mubr.msk.bf16.mxu0 %vm2538_vm6, %v3721_v41  ;;  %v4766_v57 = vpop.f32.mrb[22].mxu0  ;;  %v3724_v44 = vpack.c.bf16 %v3309_v19, %v3293_v2  ;;  %v5388_v38 = vpack.i.bf16 %v3240_v1, %v7230_v35  ;;  %v3241_v13 = vrot.slane %v7273_v26, 2 }
 0x33a   : > { %5369 = vrot.lane.b32.xlu0 %v5368_v21, %s5570_s15  ;;  %v4767_v14 = vpop.f32.mrb[23].mxu0  ;;  %v5393_v33 = vpack.i.bf16 %v3293_v2, %v3240_v1  ;;  %v7301_v0 = vsel %vm2088_vm5, %v3269_v11, %v3270_v9  ;;  %v3195_v7 = vsel %vm2088_vm5, %v3193_v51, %v3194_v61  ;;  %v3242_v10 = vrot.slane %v3118_v22, 2 }
 0x33b   : > { %v2965_v52 = vadd.f32 %v7063_v15, %v4765_v17  ;;  %v4768_v5 = vadd.f32 %v4767_v14, %v4766_v57  ;;  %4926 = vmatmul.mubr.msk.bf16.gmra.mrb[36].mxu0 %vm2538_vm6, %v3724_v44  ;;  %5384 = vrot.lane.b32.xlu1 %v5383_v12, %s5571_s16  ;;  %v3303_v15 = vsel %vm2088_vm5, %v3301_v16, %v3302_v34 }
 0x33c   : > { %v3243_v51 = vsel %vm2137_vm4, %v3241_v13, %v3242_v10 }
 0x33d   : > { %v3001_v55 = vmul.f32 %v7089_v62, %v2965_v52  ;;  %v2968_v47 = vadd.f32 %v7067_v40, %v4768_v5 }
 0x33e   : > { %5379 = vrot.lane.b32.xlu0 %v5383_v12, %s5572_s17  ;;  %v7290_v23 = vld [vmem:[#allocation3 + $0xb0] sm:$0xff]  ;;  %v3120_v48 = vld [vmem:[#allocation3 + $0xb8] sm:$0x3]  ;;  %v5398_v12 = vpack.i.bf16 %v3303_v15, %v7301_v0 }
 0x33f   : > { %v3021_v28 = vadd.f32 %v7092_v18, %v3001_v55  ;;  %v3002_v20 = vmul.f32 %v7089_v62, %v2968_v47  ;;  %5389 = vrot.lane.b32.xlu1 %v5388_v38, %s5570_s15  ;;  %v3196_v24 = vrot.slane %v7290_v23, 1  ;;  %v3197_v40 = vrot.slane %v3120_v48, 1 }
 0x340   : > { %v7298_v35 = vld [vmem:[#allocation3 + $0xc0] sm:$0xff]  ;;  %v3122_v42 = vld [vmem:[#allocation3 + $0xc8] sm:$0x3]  ;;  %v3244_v41 = vrot.slane %v7290_v23, 2  ;;  %v3245_v54 = vrot.slane %v3120_v48, 2 }
 0x341   : > { %v3037_v19 = vmax.f32 %v3021_v28, 0.0  ;;  %v3022_v46 = vadd.f32 %v7092_v18, %v3002_v20  ;;  %v5403_v31 = vpack.i.bf16 %v7298_v35, %v7290_v23  ;;  %v7310_v1 = vsel %vm2088_vm5, %v3196_v24, %v3197_v40 }
 0x342   : > { %5394 = vrot.lane.b32.xlu0 %v5393_v33, %s5571_s16  ;;  %v3247_v21 = vrot.slane %v7298_v35, 2  ;;  %v3248_v2 = vrot.slane %v3122_v42, 2  ;;  %v5408_v14 = vpack.i.bf16 %v7310_v1, %v3195_v7  ;;  %v3246_v5 = vsel %vm2137_vm4, %v3244_v41, %v3245_v54 }
 0x343   : > { %3054 = vst.msk [vmem:[#allocation3 + $0xd1] sm:$0xff] %vm2538_vm6, %v3037_v19  ;;  %v3038_v17 = vmax.f32 %v3022_v46, 0.0  ;;  %v4769_v57 = vpop.f32.mrb[24].mxu0  ;;  %5404 = vrot.lane.b32.xlu1 %v5403_v31, %s5572_s17  ;;  %v5413_v38 = vpack.i.bf16 %v3246_v5, %v3243_v51  ;;  %v3199_v28 = vrot.slane %v7298_v35, 1  ;;  %v3200_v13 = vrot.slane %v3122_v42, 1 }
 0x344   : > { %v4770_v44 = vpop.f32.mrb[25].mxu0  ;;  %v7319_v34 = vsel %vm2137_vm4, %v3247_v21, %v3248_v2 }
 0x345   : > { %3055 = vst.msk [vmem:[#allocation3 + $0xe1] sm:$0xff] %vm2538_vm6, %v3038_v17  ;;  %v4771_v22 = vadd.f32 %v4770_v44, %v4769_v57  ;;  %v4772_v16 = vpop.f32.mrb[26].mxu0  ;;  %v5418_v61 = vpack.i.bf16 %v7319_v34, %v3246_v5  ;;  %v7349_v21 = vsel %vm2088_vm5, %v3199_v28, %v3200_v13 }
 0x346   : > { %5399 = vrot.lane.b32.xlu0 %v5398_v12, %s5572_s17  ;;  %v4773_v52 = vpop.f32.mrb[27].mxu0 }
 0x347   : > { %v2973_v11 = vadd.f32 %v4771_v22, %v7073_v25  ;;  %v4774_v9 = vadd.f32 %v4773_v52, %v4772_v16  ;;  %5409 = vrot.lane.b32.xlu1 %v5408_v14, %s5571_s16 }
 0x349   : > { %v3003_v55 = vmul.f32 %v7089_v62, %v2973_v11  ;;  %v2976_v47 = vadd.f32 %v4774_v9, %v7077_v8 }
 0x34a   : > { %5419 = vrot.lane.b32.xlu0 %v5418_v61, %s5571_s16  ;;  %v7330_v15 = vld [vmem:[#allocation3 + $0xd0] sm:$0xff]  ;;  %v3124_v48 = vld [vmem:[#allocation3 + $0xd8] sm:$0x3] }
 0x34b   : > { %v3023_v25 = vadd.f32 %v7092_v18, %v3003_v55  ;;  %v3004_v20 = vmul.f32 %v7089_v62, %v2976_v47  ;;  %5414 = vrot.lane.b32.xlu1 %v5413_v38, %s5570_s15  ;;  %v5423_v24 = vpack.i.bf16 %v7330_v15, %v7298_v35  ;;  %v3250_v8 = vrot.slane %v7330_v15, 2 }
 0x34c   : > { %v7339_v40 = vld [vmem:[#allocation3 + $0xe0] sm:$0xff]  ;;  %v3251_v33 = vrot.slane %v3124_v48, 2  ;;  %v3202_v7 = vrot.slane %v7330_v15, 1  ;;  %v3203_v10 = vrot.slane %v3124_v48, 1  ;;  %v3126_v19 = vld [vmem:[#allocation3 + $0xe8] sm:$0x3] }
 0x34d   : > { %v3039_v46 = vmax.f32 %v3023_v25, 0.0  ;;  %v3024_v42 = vadd.f32 %v7092_v18, %v3004_v20  ;;  %v5428_v31 = vpack.i.bf16 %v7339_v40, %v7330_v15  ;;  %v3253_v41 = vrot.slane %v7339_v40, 2 }
 0x34e   : > { %5424 = vrot.lane.b32.xlu0 %v5423_v24, %s5570_s15  ;;  %v3252_v54 = vsel %vm2137_vm4, %v3250_v8, %v3251_v33  ;;  %v7352_v2 = vsel %vm2088_vm5, %v3202_v7, %v3203_v10  ;;  %v3254_v17 = vrot.slane %v3126_v19, 2  ;;  %v3205_v13 = vrot.slane %v7339_v40, 1 }
 0x34f   : > { %3056 = vst.msk [vmem:[#allocation3 + $0xf1] sm:$0xff] %vm2538_vm6, %v3039_v46  ;;  %v3040_v57 = vmax.f32 %v3024_v42, 0.0  ;;  %v4775_v44 = vpop.f32.mrb[28].mxu0  ;;  %5429 = vrot.lane.b32.xlu1 %v5428_v31, %s5572_s17  ;;  %v3727_v12 = vpack.c.bf16 %v3252_v54, %v7319_v34  ;;  %v5433_v22 = vpack.i.bf16 %v7352_v2, %v7349_v21  ;;  %v5443_v38 = vpack.i.bf16 %v3252_v54, %v7319_v34 }
 0x350   : > { %v4776_v16 = vpop.f32.mrb[29].mxu0  ;;  %v3255_v5 = vsel %vm2137_vm4, %v3253_v41, %v3254_v17  ;;  %v3206_v25 = vrot.slane %v3126_v19, 1 }
 0x351   : > { %3057 = vst.msk [vmem:[#allocation3 + $0x101] sm:$0xff] %vm2538_vm6, %v3040_v57  ;;  %v4777_v14 = vadd.f32 %v4776_v16, %v4775_v44  ;;  %4929 = vmatprep.mubr.msk.bf16.mxu0 %vm2538_vm6, %v3727_v12  ;;  %v4778_v52 = vpop.f32.mrb[30].mxu0  ;;  %v5448_v61 = vpack.i.bf16 %v3255_v5, %v3252_v54  ;;  %v3136_v16 = vld [vmem:[#allocation3 + $0x138] sm:$0x3] }
 0x352   : > { %5434 = vrot.lane.b32.xlu0 %v5433_v22, %s5572_s17  ;;  %v4779_v51 = vpop.f32.mrb[31].mxu0  ;;  %v7388_v41 = vsel %vm2088_vm5, %v3205_v13, %v3206_v25 }
 0x353   : > { %v2981_v11 = vadd.f32 %v7071_v30, %v4777_v14  ;;  %v4780_v9 = vadd.f32 %v4779_v51, %v4778_v52  ;;  %5439 = vrot.lane.b32.xlu1 %v5433_v22, %s5571_s16  ;;  %v3135_v22 = vld [vmem:[#allocation3 + $0x130] sm:$0xff] }
 0x355   : > { %v3005_v55 = vmul.f32 %v7089_v62, %v2981_v11  ;;  %v2984_v47 = vadd.f32 %v7075_v3, %v4780_v9 }
 0x356   : > { %5449 = vrot.lane.b32.xlu0 %v5448_v61, %s5571_s16  ;;  %v7369_v48 = vld [vmem:[#allocation3 + $0xf0] sm:$0xff]  ;;  %v3128_v28 = vld [vmem:[#allocation3 + $0xf8] sm:$0x3] }
 0x357   : > { %v3025_v30 = vadd.f32 %v7092_v18, %v3005_v55  ;;  %v3006_v20 = vmul.f32 %v7089_v62, %v2984_v47  ;;  %5444 = vrot.lane.b32.xlu1 %v5443_v38, %s5570_s15  ;;  %v5453_v24 = vpack.i.bf16 %v7369_v48, %v7339_v40  ;;  %v3256_v3 = vrot.slane %v7369_v48, 2 }
 0x358   : > { %v7378_v34 = vld [vmem:[#allocation3 + $0x100] sm:$0xff]  ;;  %v3257_v8 = vrot.slane %v3128_v28, 2  ;;  %v3208_v33 = vrot.slane %v7369_v48, 1  ;;  %v3209_v7 = vrot.slane %v3128_v28, 1  ;;  %v3130_v10 = vld [vmem:[#allocation3 + $0x108] sm:$0x3] }
 0x359   : > { %v3041_v46 = vmax.f32 %v3025_v30, 0.0  ;;  %v3026_v19 = vadd.f32 %v7092_v18, %v3006_v20  ;;  %v5458_v62 = vpack.i.bf16 %v7378_v34, %v7369_v48  ;;  %v3259_v42 = vrot.slane %v7378_v34, 2 }
 0x35a   : > { %5454 = vrot.lane.b32.xlu0 %v5453_v24, %s5570_s15  ;;  %v3258_v31 = vsel %vm2137_vm4, %v3256_v3, %v3257_v8  ;;  %v7391_v54 = vsel %vm2088_vm5, %v3208_v33, %v3209_v7  ;;  %v3260_v17 = vrot.slane %v3130_v10, 2  ;;  %v3211_v51 = vrot.slane %v7378_v34, 1 }
 0x35b   : > { %3058 = vst.msk [vmem:[#allocation3 + $0x111] sm:$0xff] %vm2538_vm6, %v3041_v46  ;;  %v3042_v57 = vmax.f32 %v3026_v19, 0.0  ;;  %5459 = vrot.lane.b32.xlu1 %v5458_v62, %s5572_s17  ;;  %v3730_v18 = vpack.c.bf16 %v3258_v31, %v3255_v5  ;;  %v5463_v44 = vpack.i.bf16 %v7391_v54, %v7388_v41  ;;  %v5473_v52 = vpack.i.bf16 %v3258_v31, %v3255_v5 }
 0x35c   : > { %v7400_v12 = vsel %vm2137_vm4, %v3259_v42, %v3260_v17  ;;  %v3212_v11 = vrot.slane %v3130_v10, 1  ;;  %v3310_v55 = vrot.slane %v3135_v22, 2  ;;  %v3311_v47 = vrot.slane %v3136_v16, 2 }
 0x35d   : > { %3059 = vst.msk [vmem:[#allocation3 + $0x121] sm:$0xff] %vm2538_vm6, %v3042_v57  ;;  %4930 = vmatmul.mubr.msk.bf16.gmra.mrb[40].mxu0 %vm2538_vm6, %v3730_v18  ;;  %v5478_v14 = vpack.i.bf16 %v7400_v12, %v3258_v31  ;;  %v3304_v57 = vrot.slane %v3135_v22, 1 }
 0x35e   : > { %5464 = vrot.lane.b32.xlu0 %v5463_v44, %s5572_s17  ;;  %v7415_v24 = vsel %vm2088_vm5, %v3211_v51, %v3212_v11  ;;  %v7427_v46 = vsel %vm2137_vm4, %v3310_v55, %v3311_v47 }
 0x35f   : > { %5469 = vrot.lane.b32.xlu1 %v5463_v44, %s5571_s16 }
 0x362   : > { %5479 = vrot.lane.b32.xlu0 %v5478_v14, %s5571_s16  ;;  %v7407_v9 = vld [vmem:[#allocation3 + $0x110] sm:$0xff]  ;;  %v3132_v61 = vld [vmem:[#allocation3 + $0x118] sm:$0x3]  ;;  %v3305_v14 = vrot.slane %v3136_v16, 1 }
 0x363   : > { %5474 = vrot.lane.b32.xlu1 %v5473_v52, %s5570_s15  ;;  %v5483_v38 = vpack.i.bf16 %v7407_v9, %v7378_v34  ;;  %v3214_v28 = vrot.slane %v7407_v9, 1  ;;  %v3215_v13 = vrot.slane %v3132_v61, 1  ;;  %v3262_v5 = vrot.slane %v7407_v9, 2 }
 0x364   : > { %v3133_v25 = vld [vmem:[#allocation3 + $0x120] sm:$0xff]  ;;  %v3263_v30 = vrot.slane %v3132_v61, 2  ;;  %v3134_v20 = vld [vmem:[#allocation3 + $0x128] sm:$0x3]  ;;  %v3306_v61 = vsel %vm2088_vm5, %v3304_v57, %v3305_v14 }
 0x365   : > { %v7418_v3 = vsel %vm2088_vm5, %v3214_v28, %v3215_v13  ;;  %v3294_v8 = vrot.slane %v3133_v25, 2  ;;  %v3295_v10 = vrot.slane %v3134_v20, 2  ;;  %v5488_v62 = vpack.i.bf16 %v3135_v22, %v3133_v25 }
 0x366   : > { %5484 = vrot.lane.b32.xlu0 %v5483_v38, %s5570_s15  ;;  %v5498_v33 = vpack.i.bf16 %v7418_v3, %v7415_v24  ;;  %v7424_v7 = vsel %vm2137_vm4, %v3262_v5, %v3263_v30  ;;  %v3272_v18 = vrot.slane %v3133_v25, 1  ;;  %v3273_v44 = vrot.slane %v3134_v20, 1 }
 0x367   : > { %v3733_v19 = vpack.c.bf16 %v7424_v7, %v7400_v12  ;;  %v7433_v42 = vsel %vm2137_vm4, %v3294_v8, %v3295_v10  ;;  %v5503_v17 = vpack.i.bf16 %v7424_v7, %v7400_v12  ;;  %v5518_v52 = vpack.i.bf16 %v3133_v25, %v7407_v9 }
 0x368   : > { %5499 = vrot.lane.b32.xlu1 %v5498_v33, %s5571_s16  ;;  %v3736_v31 = vpack.c.bf16 %v7427_v46, %v7433_v42  ;;  %v5508_v51 = vpack.i.bf16 %v7433_v42, %v7424_v7  ;;  %v7447_v11 = vsel %vm2088_vm5, %v3272_v18, %v3273_v44  ;;  %v4065_v42 = vsub.s32 1, %v7079_v58 }
 0x369   : > { %v5513_v22 = vpack.i.bf16 %v3306_v61, %v7447_v11 }
 0x36a   : > { %5489 = vrot.lane.b32.xlu0 %v5488_v62, %s5570_s15 }
 0x36c   : > { %5504 = vrot.lane.b32.xlu1 %v5503_v17, %s5570_s15 }
 0x36e   : > { %5494 = vrot.lane.b32.xlu0 %v5498_v33, %s5572_s17 }
 0x370   : > { %5519 = vrot.lane.b32.xlu1 %v5518_v52, %s5572_s17 }
 0x372   : > { %5509 = vrot.lane.b32.xlu0 %v5508_v51, %s5571_s16 }
 0x376   : > { %5514 = vrot.lane.b32.xlu0 %v5513_v22, %s5572_s17 }
 0x385   : > { %v5285_v16 = vpop.permute.xlu1 %5284 }
 0x386   : > { %v5287_v14 = vunpack.i.h.bf16 %v5285_v16  ;;  %v5286_v52 = vunpack.i.l.bf16 %v5285_v16 }
 0x389   : > { %v5290_v55 = vpop.permute.xlu1 %5289  ;;  %v5300_v47 = vpop.permute.xlu0 %5299 }
 0x38a   : > { %v5292_v38 = vunpack.i.h.bf16 %v5290_v55  ;;  %v5291_v28 = vunpack.i.l.bf16 %v5290_v55  ;;  %v5302_v20 = vunpack.i.h.bf16 %v5300_v47  ;;  %v5301_v8 = vunpack.i.l.bf16 %v5300_v47 }
 0x38c   : > { %v3618_v33 = vsel %vm2538_vm6, %v7109_v43, %v5292_v38  ;;  %v3617_v10 = vsel %vm2538_vm6, %v7103_v45, %v5291_v28  ;;  %v3666_v61 = vsel %vm2538_vm6, %v7172_v63, %v5302_v20  ;;  %v3665_v22 = vsel %vm2538_vm6, %v7130_v59, %v5301_v8 }
 0x38d   : > { %v5295_v13 = vpop.permute.xlu1 %5294 }
 0x38e   : > { %v5297_v5 = vunpack.i.h.bf16 %v5295_v13  ;;  %v5296_v25 = vunpack.i.l.bf16 %v5295_v13 }
 0x38f   : > { %v5305_v30 = vpop.permute.xlu0 %5304 }
 0x390   : > { %v5307_v62 = vunpack.i.h.bf16 %v5305_v30  ;;  %v5306_v17 = vunpack.i.l.bf16 %v5305_v30  ;;  %v3633_v18 = vsel %vm2555_vm7, %v3617_v10, %v5296_v25  ;;  %v3634_v44 = vsel %vm2555_vm7, %v3618_v33, %v5297_v5 }
 0x391   : > { %v5310_v57 = vpop.permute.xlu1 %5309  ;;  %v3649_v45 = vsel %vm2572_vm8, %v3633_v18, %v5286_v52  ;;  %v3650_v47 = vsel %vm2572_vm8, %v3634_v44, %v5287_v14 }
 0x392   : > { %v3681_v38 = vsel %vm2555_vm7, %v3665_v22, %v5306_v17  ;;  %v3682_v28 = vsel %vm2555_vm7, %v3666_v61, %v5307_v62  ;;  %v3713_v30 = vpack.c.bf16 %v3650_v47, %v3649_v45 }
 0x393   : > { %v5315_v51 = vpop.permute.xlu0 %5314 }
 0x394   : > { %v5317_v43 = vunpack.i.h.bf16 %v5315_v51  ;;  %v5316_v55 = vunpack.i.l.bf16 %v5315_v51 }
 0x395   : > { %v5320_v13 = vpop.permute.xlu1 %5319 }
 0x396   : > { %v3697_v16 = vsel %vm2572_vm8, %v3681_v38, %v5316_v55  ;;  %v3698_v5 = vsel %vm2572_vm8, %v3682_v28, %v5317_v43  ;;  %v5322_v59 = vunpack.i.h.bf16 %v5320_v13  ;;  %v5321_v8 = vunpack.i.l.bf16 %v5320_v13 }
 0x397   : > { %v5330_v25 = vpop.permute.xlu0 %5329  ;;  %v3714_v63 = vpack.c.bf16 %v3698_v5, %v3697_v16  ;;  %v5311_v55 = vunpack.i.l.bf16 %v5310_v57 }
 0x398   : > { %v5332_v62 = vunpack.i.h.bf16 %v5330_v25  ;;  %v5331_v18 = vunpack.i.l.bf16 %v5330_v25  ;;  %v3620_v14 = vsel %vm2538_vm6, %v7151_v4, %v5322_v59  ;;  %v3619_v52 = vsel %vm2538_vm6, %v7117_v53, %v5321_v8 }
 0x399   : > { %v5325_v20 = vpop.permute.xlu1 %5324  ;;  %3901 = vmatprep.mubr.bf16.mxu1 %v3714_v63 }
 0x39a   : > { %3902 = vmatmul.mubr.bf16.vlgmr.msra.gmra.mrb[16].mxu1 %v3713_v30  ;;  %v5327_v33 = vunpack.i.h.bf16 %v5325_v20  ;;  %v5326_v10 = vunpack.i.l.bf16 %v5325_v20  ;;  %v3668_v47 = vsel %vm2538_vm6, %v7207_v39, %v5332_v62  ;;  %v3667_v4 = vsel %vm2538_vm6, %v7175_v60, %v5331_v18 }
 0x39b   : > { %4955 = vmatpush3.bf16.msra.mxu1 %v7046_v27  ;;  %v5312_v27 = vunpack.i.h.bf16 %v5310_v57 }
 0x39c   : > { %v5335_v17 = vpop.permute.xlu0 %5334  ;;  %4954 = vmatprep.subr.bf16.mxu1 %v7051_v29  ;;  %v3635_v22 = vsel %vm2555_vm7, %v3619_v52, %v5326_v10  ;;  %v3636_v43 = vsel %vm2555_vm7, %v3620_v14, %v5327_v33 }
 0x39d   : > { %v5340_v44 = vpop.permute.xlu1 %5339  ;;  %v5337_v51 = vunpack.i.h.bf16 %v5335_v17  ;;  %v5336_v61 = vunpack.i.l.bf16 %v5335_v17  ;;  %v3651_v5 = vsel %vm2572_vm8, %v3635_v22, %v5311_v55 }
 0x39f   : > { %4956 = vmatpush3.bf16.msra.mxu1 %v7051_v29  ;;  %v3683_v13 = vsel %vm2555_vm7, %v3667_v4, %v5336_v61  ;;  %v3684_v16 = vsel %vm2555_vm7, %v3668_v47, %v5337_v51  ;;  %v3652_v29 = vsel %vm2572_vm8, %v3636_v43, %v5312_v27  ;;  %v5341_v47 = vunpack.i.l.bf16 %v5340_v44 }
 0x3a0   : > { %v5345_v45 = vpop.permute.xlu0 %5344  ;;  %v3716_v20 = vpack.c.bf16 %v3652_v29, %v3651_v5 }
 0x3a1   : > { %v5347_v38 = vunpack.i.h.bf16 %v5345_v45  ;;  %v5346_v28 = vunpack.i.l.bf16 %v5345_v45  ;;  %v5350_v53 = vpop.permute.xlu1 %5349  ;;  %v5342_v45 = vunpack.i.h.bf16 %v5340_v44 }
 0x3a2   : > { %v5352_v59 = vunpack.i.h.bf16 %v5350_v53  ;;  %v5351_v8 = vunpack.i.l.bf16 %v5350_v53 }
 0x3a3   : > { %v3699_v57 = vsel %vm2572_vm8, %v3683_v13, %v5346_v28  ;;  %v3700_v25 = vsel %vm2572_vm8, %v3684_v16, %v5347_v38 }
 0x3a4   : > { %v5360_v63 = vpop.permute.xlu0 %5359  ;;  %v3717_v39 = vpack.c.bf16 %v3700_v25, %v3699_v57  ;;  %v3622_v52 = vsel %vm2538_vm6, %v7196_v6, %v5352_v59  ;;  %v3621_v51 = vsel %vm2538_vm6, %v7162_v49, %v5351_v8 }
 0x3a5   : > { %v5355_v30 = vpop.permute.xlu1 %5354  ;;  %v5362_v62 = vunpack.i.h.bf16 %v5360_v63  ;;  %v5361_v18 = vunpack.i.l.bf16 %v5360_v63 }
 0x3a6   : > { %3909 = vmatprep.mubr.bf16.mxu1 %v3717_v39  ;;  %v5357_v10 = vunpack.i.h.bf16 %v5355_v30  ;;  %v5356_v17 = vunpack.i.l.bf16 %v5355_v30 }
 0x3a7   : > { %3910 = vmatmul.mubr.bf16.gmra.mrb[20].mxu1 %v3716_v20  ;;  %v3670_v4 = vsel %vm2538_vm6, %v7271_v37, %v5362_v62  ;;  %v3669_v38 = vsel %vm2538_vm6, %v7219_v56, %v5361_v18 }
 0x3a8   : > { %v5365_v60 = vpop.permute.xlu0 %5364  ;;  %v3637_v22 = vsel %vm2555_vm7, %v3621_v51, %v5356_v17  ;;  %v3638_v43 = vsel %vm2555_vm7, %v3622_v52, %v5357_v10 }
 0x3a9   : > { %v5375_v33 = vpop.permute.xlu1 %5374  ;;  %v5367_v27 = vunpack.i.h.bf16 %v5365_v60  ;;  %v5366_v55 = vunpack.i.l.bf16 %v5365_v60  ;;  %v3653_v49 = vsel %vm2572_vm8, %v3637_v22, %v5341_v47  ;;  %v3654_v16 = vsel %vm2572_vm8, %v3638_v43, %v5342_v45 }
 0x3aa   : > { %v3719_v8 = vpack.c.bf16 %v3654_v16, %v3653_v49  ;;  %v5376_v22 = vunpack.i.l.bf16 %v5375_v33 }
 0x3ab   : > { %v3685_v5 = vsel %vm2555_vm7, %v3669_v38, %v5366_v55  ;;  %v3686_v29 = vsel %vm2555_vm7, %v3670_v4, %v5367_v27 }
 0x3ac   : > { %v5370_v14 = vpop.permute.xlu0 %5369 }
 0x3ad   : > { %v5385_v61 = vpop.permute.xlu1 %5384  ;;  %v5372_v43 = vunpack.i.h.bf16 %v5370_v14  ;;  %v5371_v27 = vunpack.i.l.bf16 %v5370_v14 }
 0x3ae   : > { %v5387_v57 = vunpack.i.h.bf16 %v5385_v61  ;;  %v5386_v44 = vunpack.i.l.bf16 %v5385_v61  ;;  %v5377_v61 = vunpack.i.h.bf16 %v5375_v33 }
 0x3b0   : > { %v5380_v28 = vpop.permute.xlu0 %5379  ;;  %v3624_v10 = vsel %vm2538_vm6, %v7245_v32, %v5387_v57  ;;  %v3623_v17 = vsel %vm2538_vm6, %v7204_v50, %v5386_v44 }
 0x3b1   : > { %v5382_v6 = vunpack.i.h.bf16 %v5380_v28  ;;  %v5381_v53 = vunpack.i.l.bf16 %v5380_v28  ;;  %v5390_v13 = vpop.permute.xlu1 %5389 }
 0x3b2   : > { %v5392_v25 = vunpack.i.h.bf16 %v5390_v13  ;;  %v5391_v63 = vunpack.i.l.bf16 %v5390_v13 }
 0x3b3   : > { %v3701_v37 = vsel %vm2572_vm8, %v3685_v5, %v5381_v53  ;;  %v3702_v56 = vsel %vm2572_vm8, %v3686_v29, %v5382_v6 }
 0x3b4   : > { %v5395_v39 = vpop.permute.xlu0 %5394  ;;  %v3720_v30 = vpack.c.bf16 %v3702_v56, %v3701_v37  ;;  %v3639_v62 = vsel %vm2555_vm7, %v3623_v17, %v5391_v63  ;;  %v3640_v18 = vsel %vm2555_vm7, %v3624_v10, %v5392_v25 }
 0x3b5   : > { %v5397_v20 = vunpack.i.h.bf16 %v5395_v39  ;;  %v5396_v60 = vunpack.i.l.bf16 %v5395_v39  ;;  %v5405_v59 = vpop.permute.xlu1 %5404  ;;  %v3655_v38 = vsel %vm2572_vm8, %v3639_v62, %v5376_v22 }
 0x3b6   : > { %3917 = vmatprep.mubr.bf16.mxu1 %v3720_v30 }
 0x3b7   : > { %v3672_v52 = vsel %vm2538_vm6, %v7301_v0, %v5397_v20  ;;  %v3671_v51 = vsel %vm2538_vm6, %v7263_v36, %v5396_v60  ;;  %3918 = vmatmul.mubr.bf16.gmra.mrb[24].mxu1 %v3719_v8  ;;  %v3656_v0 = vsel %vm2572_vm8, %v3640_v18, %v5377_v61  ;;  %v5407_v60 = vunpack.i.h.bf16 %v5405_v59 }
 0x3b8   : > { %v5400_v32 = vpop.permute.xlu0 %5399  ;;  %v3687_v47 = vsel %vm2555_vm7, %v3671_v51, %v5371_v27  ;;  %v3688_v4 = vsel %vm2555_vm7, %v3672_v52, %v5372_v43  ;;  %v3722_v14 = vpack.c.bf16 %v3656_v0, %v3655_v38  ;;  %v5406_v8 = vunpack.i.l.bf16 %v5405_v59 }
 0x3b9   : > { %v5402_v55 = vunpack.i.h.bf16 %v5400_v32  ;;  %v5401_v45 = vunpack.i.l.bf16 %v5400_v32  ;;  %v5410_v50 = vpop.permute.xlu1 %5409 }
 0x3ba   : > { %v5412_v13 = vunpack.i.h.bf16 %v5410_v50  ;;  %v5411_v49 = vunpack.i.l.bf16 %v5410_v50 }
 0x3bb   : > { %v3703_v28 = vsel %vm2572_vm8, %v3687_v47, %v5401_v45  ;;  %v3704_v36 = vsel %vm2572_vm8, %v3688_v4, %v5402_v55 }
 0x3bc   : > { %v5420_v6 = vpop.permute.xlu0 %5419  ;;  %v3723_v33 = vpack.c.bf16 %v3704_v36, %v3703_v28  ;;  %v3626_v63 = vsel %vm2538_vm6, %v7290_v23, %v5412_v13  ;;  %v3625_v37 = vsel %vm2538_vm6, %v7273_v26, %v5411_v49 }
 0x3bd   : > { %v5415_v53 = vpop.permute.xlu1 %5414  ;;  %v5422_v57 = vunpack.i.h.bf16 %v5420_v6  ;;  %v5421_v44 = vunpack.i.l.bf16 %v5420_v6 }
 0x3be   : > { %3925 = vmatprep.mubr.bf16.mxu1 %v3723_v33  ;;  %v5417_v16 = vunpack.i.h.bf16 %v5415_v53  ;;  %v5416_v5 = vunpack.i.l.bf16 %v5415_v53 }
 0x3bf   : > { %3926 = vmatmul.mubr.bf16.gmra.mrb[28].mxu1 %v3722_v14  ;;  %v3674_v17 = vsel %vm2538_vm6, %v7349_v21, %v5422_v57  ;;  %v3673_v62 = vsel %vm2538_vm6, %v7310_v1, %v5421_v44 }
 0x3c0   : > { %v5425_v29 = vpop.permute.xlu0 %5424  ;;  %v3641_v30 = vsel %vm2555_vm7, %v3625_v37, %v5416_v5  ;;  %v3642_v20 = vsel %vm2555_vm7, %v3626_v63, %v5417_v16 }
 0x3c1   : > { %v5430_v25 = vpop.permute.xlu1 %5429  ;;  %v5427_v56 = vunpack.i.h.bf16 %v5425_v29  ;;  %v5426_v39 = vunpack.i.l.bf16 %v5425_v29  ;;  %v3657_v61 = vsel %vm2572_vm8, %v3641_v30, %v5406_v8  ;;  %v3658_v22 = vsel %vm2572_vm8, %v3642_v20, %v5407_v60 }
 0x3c2   : > { %v3725_v55 = vpack.c.bf16 %v3658_v22, %v3657_v61  ;;  %v5432_v49 = vunpack.i.h.bf16 %v5430_v25  ;;  %v5431_v16 = vunpack.i.l.bf16 %v5430_v25 }
 0x3c3   : > { %v3689_v26 = vsel %vm2555_vm7, %v3673_v62, %v5426_v39  ;;  %v3690_v51 = vsel %vm2555_vm7, %v3674_v17, %v5427_v56 }
 0x3c4   : > { %v5435_v10 = vpop.permute.xlu0 %5434 }
 0x3c5   : > { %v5437_v18 = vunpack.i.h.bf16 %v5435_v10  ;;  %v5436_v23 = vunpack.i.l.bf16 %v5435_v10  ;;  %v5440_v52 = vpop.permute.xlu1 %5439 }
 0x3c6   : > { %v5442_v1 = vunpack.i.h.bf16 %v5440_v52  ;;  %v5441_v45 = vunpack.i.l.bf16 %v5440_v52 }
 0x3c7   : > { %v3705_v59 = vsel %vm2572_vm8, %v3689_v26, %v5436_v23  ;;  %v3706_v43 = vsel %vm2572_vm8, %v3690_v51, %v5437_v18 }
 0x3c8   : > { %v5450_v27 = vpop.permute.xlu0 %5449  ;;  %v3726_v21 = vpack.c.bf16 %v3706_v43, %v3705_v59  ;;  %v3628_v36 = vsel %vm2538_vm6, %v7330_v15, %v5442_v1  ;;  %v3627_v6 = vsel %vm2538_vm6, %v7298_v35, %v5441_v45 }
 0x3c9   : > { %v5445_v32 = vpop.permute.xlu1 %5444  ;;  %v5452_v38 = vunpack.i.h.bf16 %v5450_v27  ;;  %v5451_v0 = vunpack.i.l.bf16 %v5450_v27 }
 0x3ca   : > { %3933 = vmatprep.mubr.bf16.mxu1 %v3726_v21  ;;  %v5447_v50 = vunpack.i.h.bf16 %v5445_v32  ;;  %v5446_v47 = vunpack.i.l.bf16 %v5445_v32 }
 0x3cb   : > { %3934 = vmatmul.mubr.bf16.gmra.mrb[32].mxu1 %v3725_v55  ;;  %v3676_v29 = vsel %vm2538_vm6, %v7388_v41, %v5452_v38  ;;  %v3675_v57 = vsel %vm2538_vm6, %v7352_v2, %v5451_v0 }
 0x3cc   : > { %v5455_v4 = vpop.permute.xlu0 %5454  ;;  %v3643_v14 = vsel %vm2555_vm7, %v3627_v6, %v5446_v47  ;;  %v3644_v13 = vsel %vm2555_vm7, %v3628_v36, %v5447_v50 }
 0x3cd   : > { %v5460_v28 = vpop.permute.xlu1 %5459  ;;  %v5457_v33 = vunpack.i.h.bf16 %v5455_v4  ;;  %v5456_v53 = vunpack.i.l.bf16 %v5455_v4  ;;  %v3659_v56 = vsel %vm2572_vm8, %v3643_v14, %v5431_v16  ;;  %v3660_v39 = vsel %vm2572_vm8, %v3644_v13, %v5432_v49 }
 0x3ce   : > { %v3728_v8 = vpack.c.bf16 %v3660_v39, %v3659_v56  ;;  %v5462_v55 = vunpack.i.h.bf16 %v5460_v28  ;;  %v5461_v1 = vunpack.i.l.bf16 %v5460_v28 }
 0x3cf   : > { %v3691_v35 = vsel %vm2555_vm7, %v3675_v57, %v5456_v53  ;;  %v3692_v37 = vsel %vm2555_vm7, %v3676_v29, %v5457_v33 }
 0x3d0   : > { %v5465_v5 = vpop.permute.xlu0 %5464 }
 0x3d1   : > { %v5467_v44 = vunpack.i.h.bf16 %v5465_v5  ;;  %v5466_v15 = vunpack.i.l.bf16 %v5465_v5  ;;  %v5470_v63 = vpop.permute.xlu1 %5469 }
 0x3d2   : > { %v5472_v10 = vunpack.i.h.bf16 %v5470_v63  ;;  %v5471_v17 = vunpack.i.l.bf16 %v5470_v63 }
 0x3d3   : > { %v3707_v25 = vsel %vm2572_vm8, %v3691_v35, %v5466_v15  ;;  %v3708_v30 = vsel %vm2572_vm8, %v3692_v37, %v5467_v44 }
 0x3d4   : > { %v5480_v20 = vpop.permute.xlu0 %5479  ;;  %v3729_v41 = vpack.c.bf16 %v3708_v30, %v3707_v25  ;;  %v3630_v61 = vsel %vm2538_vm6, %v7369_v48, %v5472_v10  ;;  %v3629_v22 = vsel %vm2538_vm6, %v7339_v40, %v5471_v17 }
 0x3d5   : > { %v5475_v60 = vpop.permute.xlu1 %5474  ;;  %v5482_v52 = vunpack.i.h.bf16 %v5480_v20  ;;  %v5481_v26 = vunpack.i.l.bf16 %v5480_v20 }
 0x3d6   : > { %3941 = vmatprep.mubr.bf16.mxu1 %v3729_v41  ;;  %v5477_v62 = vunpack.i.h.bf16 %v5475_v60  ;;  %v5476_v18 = vunpack.i.l.bf16 %v5475_v60 }
 0x3d7   : > { %3942 = vmatmul.mubr.bf16.gmra.mrb[36].mxu1 %v3728_v8  ;;  %v3678_v45 = vsel %vm2538_vm6, %v7415_v24, %v5482_v52  ;;  %v3677_v50 = vsel %vm2538_vm6, %v7391_v54, %v5481_v26 }
 0x3d8   : > { %v5485_v2 = vpop.permute.xlu0 %5484  ;;  %v3645_v59 = vsel %vm2555_vm7, %v3629_v22, %v5476_v18  ;;  %v3646_v43 = vsel %vm2555_vm7, %v3630_v61, %v5477_v62 }
 0x3d9   : > { %v5487_v27 = vunpack.i.h.bf16 %v5485_v2  ;;  %v5486_v21 = vunpack.i.l.bf16 %v5485_v2  ;;  %v3661_v40 = vsel %vm2572_vm8, %v3645_v59, %v5461_v1  ;;  %v3662_v38 = vsel %vm2572_vm8, %v3646_v43, %v5462_v55 }
 0x3da   : > { %v5500_v23 = vpop.permute.xlu1 %5499  ;;  %v3731_v13 = vpack.c.bf16 %v3662_v38, %v3661_v40  ;;  %v1964_v40 = vld [vmem:[#allocation2 + $0x11] sm:$0xff] }
 0x3db   : > { %v3693_v0 = vsel %vm2555_vm7, %v3677_v50, %v5486_v21  ;;  %v3694_v36 = vsel %vm2555_vm7, %v3678_v45, %v5487_v27  ;;  %v5502_v24 = vunpack.i.h.bf16 %v5500_v23  ;;  %v5501_v53 = vunpack.i.l.bf16 %v5500_v23  ;;  %v5559_v27 = vld [vmem:[%s5627_s8] sm:$0x3] }
 0x3dc   : > { %v5490_v51 = vpop.permute.xlu0 %5489  ;;  %v7606_v21 = vrot.slane %v5559_v27, %v4065_v42  ;;  %v5560_v45 = vld [vmem:[%s5632_s11] sm:$0x3] }
 0x3dd   : > { %v3632_v35 = vsel %vm2538_vm6, %v7407_v9, %v5502_v24  ;;  %v3631_v37 = vsel %vm2538_vm6, %v7378_v34, %v5501_v53  ;;  %v5492_v56 = vunpack.i.h.bf16 %v5490_v51  ;;  %v5491_v39 = vunpack.i.l.bf16 %v5490_v51 }
 0x3de   : > { %v5505_v32 = vpop.permute.xlu1 %5504  ;;  %v7609_v50 = vrot.slane %v5560_v45, %v4065_v42 }
 0x3df   : > { %v5507_v49 = vunpack.i.h.bf16 %v5505_v32  ;;  %v5506_v16 = vunpack.i.l.bf16 %v5505_v32 }
 0x3e0   : > { %v5495_v47 = vpop.permute.xlu0 %5494 }
 0x3e1   : > { %v5497_v48 = vunpack.i.h.bf16 %v5495_v47  ;;  %v5496_v4 = vunpack.i.l.bf16 %v5495_v47  ;;  %v3647_v30 = vsel %vm2555_vm7, %v3631_v37, %v5506_v16  ;;  %v3648_v20 = vsel %vm2555_vm7, %v3632_v35, %v5507_v49  ;;  %v1967_v35 = vld [vmem:[#allocation2 + $0x41] sm:$0xff] }
 0x3e2   : > { %v5520_v6 = vpop.permute.xlu1 %5519 }
 0x3e3   : > { %v3709_v28 = vsel %vm2572_vm8, %v3693_v0, %v5496_v4  ;;  %v3710_v33 = vsel %vm2572_vm8, %v3694_v36, %v5497_v48  ;;  %v5522_v57 = vunpack.i.h.bf16 %v5520_v6  ;;  %v5521_v44 = vunpack.i.l.bf16 %v5520_v6  ;;  %v1965_v0 = vld [vmem:[#allocation2 + $0x21] sm:$0xff] }
 0x3e4   : > { %v5510_v14 = vpop.permute.xlu0 %5509  ;;  %v3732_v54 = vpack.c.bf16 %v3710_v33, %v3709_v28 }
 0x3e5   : > { %v5512_v5 = vunpack.i.h.bf16 %v5510_v14  ;;  %v5511_v29 = vunpack.i.l.bf16 %v5510_v14  ;;  %v3663_v8 = vsel %vm2572_vm8, %v3647_v30, %v5521_v44  ;;  %v3664_v9 = vsel %vm2572_vm8, %v3648_v20, %v5522_v57  ;;  %v1966_v44 = vld [vmem:[#allocation2 + $0x31] sm:$0xff] }
 0x3e6   : > { %3949 = vmatprep.mubr.bf16.mxu1 %v3732_v54  ;;  %v3734_v17 = vpack.c.bf16 %v3664_v9, %v3663_v8 }
 0x3e7   : > { %v3680_v15 = vsel %vm2538_vm6, %v7447_v11, %v5512_v5  ;;  %v3679_v63 = vsel %vm2538_vm6, %v7418_v3, %v5511_v29  ;;  %3950 = vmatmul.mubr.bf16.gmra.mrb[40].mxu1 %v3731_v13 }
 0x3e8   : > { %v5515_v25 = vpop.permute.xlu0 %5514  ;;  %v3695_v11 = vsel %vm2555_vm7, %v3679_v63, %v5491_v39  ;;  %v3696_v3 = vsel %vm2555_vm7, %v3680_v15, %v5492_v56 }
 0x3e9   : > { %v5517_v41 = vunpack.i.h.bf16 %v5515_v25  ;;  %v5516_v60 = vunpack.i.l.bf16 %v5515_v25 }
 0x3eb   : > { %v3711_v2 = vsel %vm2572_vm8, %v3695_v11, %v5516_v60  ;;  %v3712_v34 = vsel %vm2572_vm8, %v3696_v3, %v5517_v41 }
 0x3ec   : > { %v3735_v10 = vpack.c.bf16 %v3712_v34, %v3711_v2 }
 0x3ee   : > { %3957 = vmatprep.mubr.bf16.mxu1 %v3735_v10  ;;  %v1968_v10 = vld [vmem:[#allocation2 + $0x51] sm:$0xff] }
 0x3ef   : > { %3958 = vmatmul.mubr.bf16.gmra.mrb[44].mxu1 %v3734_v17 }
 0x3f0   : > { %4933 = vmatprep.mubr.msk.bf16.mxu1 %vm2538_vm6, %v3733_v19 }
 0x3f7   : > { %4934 = vmatmul.mubr.msk.bf16.vlgmr.msra.gmra.mrb[48].mxu1 %vm2538_vm6, %v3736_v31 }
 0x3ff   : > { %v4923_v62 = vpop.f32.mrb[32].mxu0 }
 0x400   : > { %v4000_v18 = vpop.f32.mrb[33].mxu0 }
 0x401   : > { %v4924_v23 = vpop.f32.mrb[34].mxu0 }
 0x402   : > { %v4003_v52 = vpop.f32.mrb[35].mxu0 }
 0x40e   : > { %v7592_v26 = vpop.f32.mrb[36].mxu0 }
 0x40f   : > { %v4016_v51 = vpop.f32.mrb[37].mxu0 }
 0x410   : > { %v7594_v61 = vpop.f32.mrb[38].mxu0 }
 0x411   : > { %v4019_v22 = vpop.f32.mrb[39].mxu0 }
 0x430   : > { %v7596_v12 = vpop.f32.mrb[40].mxu0 }
 0x431   : > { %v7598_v7 = vpop.f32.mrb[41].mxu0 }
 0x432   : > { %v7600_v19 = vpop.f32.mrb[42].mxu0 }
 0x433   : > { %v7602_v46 = vpop.f32.mrb[43].mxu0 }
 0x46d   : > { %v4807_v31 = vpop.f32.mrb[16].mxu1 }
 0x46e   : > { %v4808_v59 = vpop.f32.mrb[17].mxu1 }
 0x46f   : > { %v4809_v43 = vadd.f32 %v4808_v59, %v4807_v31  ;;  %v4810_v32 = vpop.f32.mrb[18].mxu1 }
 0x470   : > { %v4811_v55 = vpop.f32.mrb[19].mxu1 }
 0x471   : > { %v4001_v1 = vadd.f32 %v4809_v43, %v4000_v18  ;;  %v4812_v47 = vadd.f32 %v4811_v55, %v4810_v32 }
 0x473   : > { %v4067_v48 = vmul.f32 %v7606_v21, %v4001_v1  ;;  %v4004_v4 = vadd.f32 %v4812_v47, %v4003_v52 }
 0x475   : > { %v4087_v38 = vadd.f32 %v7609_v50, %v4067_v48  ;;  %v4068_v58 = vmul.f32 %v7606_v21, %v4004_v4  ;;  %v1970_v48 = vld [vmem:[#allocation2 + $0x71] sm:$0xff] }
 0x477   : > { %v4103_v36 = vadd.f32 %v4087_v38, %v1964_v40  ;;  %v4088_v6 = vadd.f32 %v7609_v50, %v4068_v58  ;;  %v1971_v38 = vld [vmem:[#allocation2 + $0x81] sm:$0xff] }
 0x479   : > { %v4119_v28 = vmax.f32 %v4103_v36, 0.0  ;;  %v4104_v33 = vadd.f32 %v4088_v6, %v1965_v0 }
 0x47a   : > { %v4813_v24 = vpop.f32.mrb[20].mxu1 }
 0x47b   : > { %4135 = vst.msk [vmem:[#allocation2 + $0x11] sm:$0xff] %vm2538_vm6, %v4119_v28  ;;  %v4120_v53 = vmax.f32 %v4104_v33, 0.0  ;;  %v4814_v14 = vpop.f32.mrb[21].mxu1 }
 0x47c   : > { %v4815_v54 = vadd.f32 %v4814_v14, %v4813_v24  ;;  %v4816_v13 = vpop.f32.mrb[22].mxu1 }
 0x47d   : > { %4136 = vst.msk [vmem:[#allocation2 + $0x21] sm:$0xff] %vm2538_vm6, %v4120_v53  ;;  %v4817_v49 = vpop.f32.mrb[23].mxu1 }
 0x47e   : > { %v4009_v16 = vadd.f32 %v4923_v62, %v4815_v54  ;;  %v4818_v5 = vadd.f32 %v4817_v49, %v4816_v13 }
 0x480   : > { %v4069_v29 = vmul.f32 %v7606_v21, %v4009_v16  ;;  %v4012_v57 = vadd.f32 %v4924_v23, %v4818_v5  ;;  %v1969_v23 = vld [vmem:[#allocation2 + $0x61] sm:$0xff]  ;;  %v1972_v16 = vld [vmem:[#allocation2 + $0xb1] sm:$0xff] }
 0x482   : > { %v4089_v15 = vadd.f32 %v7609_v50, %v4069_v29  ;;  %v4070_v63 = vmul.f32 %v7606_v21, %v4012_v57  ;;  %v1973_v57 = vld [vmem:[#allocation2 + $0xc1] sm:$0xff] }
 0x484   : > { %v4105_v37 = vadd.f32 %v4089_v15, %v1966_v44  ;;  %v4090_v56 = vadd.f32 %v7609_v50, %v4070_v63 }
 0x486   : > { %v4121_v39 = vmax.f32 %v4105_v37, 0.0  ;;  %v4106_v25 = vadd.f32 %v4090_v56, %v1967_v35 }
 0x488   : > { %4137 = vst.msk [vmem:[#allocation2 + $0x31] sm:$0xff] %vm2538_vm6, %v4121_v39  ;;  %v4122_v30 = vmax.f32 %v4106_v25, 0.0 }
 0x48a   : > { %4138 = vst.msk [vmem:[#allocation2 + $0x41] sm:$0xff] %vm2538_vm6, %v4122_v30  ;;  %v4819_v20 = vpop.f32.mrb[24].mxu1 }
 0x48b   : > { %v4820_v41 = vpop.f32.mrb[25].mxu1 }
 0x48c   : > { %v4821_v60 = vadd.f32 %v4820_v41, %v4819_v20  ;;  %v4822_v11 = vpop.f32.mrb[26].mxu1 }
 0x48d   : > { %v4823_v3 = vpop.f32.mrb[27].mxu1 }
 0x48e   : > { %v4017_v8 = vadd.f32 %v4821_v60, %v4016_v51  ;;  %v4824_v9 = vadd.f32 %v4823_v3, %v4822_v11  ;;  %v1974_v11 = vld [vmem:[#allocation2 + $0xd1] sm:$0xff] }
 0x490   : > { %v4071_v2 = vmul.f32 %v7606_v21, %v4017_v8  ;;  %v4020_v34 = vadd.f32 %v4824_v9, %v4019_v22  ;;  %v1975_v9 = vld [vmem:[#allocation2 + $0xe1] sm:$0xff] }
 0x492   : > { %v4091_v17 = vadd.f32 %v7609_v50, %v4071_v2  ;;  %v4072_v62 = vmul.f32 %v7606_v21, %v4020_v34  ;;  %v4825_v18 = vpop.f32.mrb[28].mxu1 }
 0x493   : > { %v4826_v52 = vpop.f32.mrb[29].mxu1 }
 0x494   : > { %v4107_v42 = vadd.f32 %v4091_v17, %v1968_v10  ;;  %v4092_v31 = vadd.f32 %v7609_v50, %v4072_v62  ;;  %v4827_v59 = vadd.f32 %v4826_v52, %v4825_v18  ;;  %v4828_v43 = vpop.f32.mrb[30].mxu1 }
 0x495   : > { %v4829_v27 = vpop.f32.mrb[31].mxu1 }
 0x496   : > { %v4123_v32 = vmax.f32 %v4107_v42, 0.0  ;;  %v4108_v51 = vadd.f32 %v4092_v31, %v1969_v23  ;;  %v4025_v55 = vadd.f32 %v7592_v26, %v4827_v59  ;;  %v4830_v1 = vadd.f32 %v4829_v27, %v4828_v43 }
 0x498   : > { %4139 = vst.msk [vmem:[#allocation2 + $0x51] sm:$0xff] %vm2538_vm6, %v4123_v32  ;;  %v4124_v22 = vmax.f32 %v4108_v51, 0.0  ;;  %v4073_v45 = vmul.f32 %v7606_v21, %v4025_v55  ;;  %v4028_v47 = vadd.f32 %v7594_v61, %v4830_v1 }
 0x49a   : > { %4140 = vst.msk [vmem:[#allocation2 + $0x61] sm:$0xff] %vm2538_vm6, %v4124_v22  ;;  %v4093_v4 = vadd.f32 %v7609_v50, %v4073_v45  ;;  %v4074_v40 = vmul.f32 %v7606_v21, %v4028_v47 }
 0x49c   : > { %v4109_v58 = vadd.f32 %v4093_v4, %v1970_v48  ;;  %v4094_v0 = vadd.f32 %v7609_v50, %v4074_v40 }
 0x49e   : > { %v4125_v26 = vmax.f32 %v4109_v58, 0.0  ;;  %v4110_v36 = vadd.f32 %v4094_v0, %v1971_v38  ;;  %v4831_v6 = vpop.f32.mrb[32].mxu1  ;;  %v1978_v38 = vld [vmem:[#allocation2 + $0x111] sm:$0xff] }
 0x49f   : > { %v4832_v28 = vpop.f32.mrb[33].mxu1 }
 0x4a0   : > { %4141 = vst.msk [vmem:[#allocation2 + $0x71] sm:$0xff] %vm2538_vm6, %v4125_v26  ;;  %v4126_v33 = vmax.f32 %v4110_v36, 0.0  ;;  %v4833_v24 = vadd.f32 %v4832_v28, %v4831_v6  ;;  %v4834_v61 = vpop.f32.mrb[34].mxu1  ;;  %v1976_v36 = vld [vmem:[#allocation2 + $0xf1] sm:$0xff] }
 0x4a1   : > { %v4835_v53 = vpop.f32.mrb[35].mxu1 }
 0x4a2   : > { %4142 = vst.msk [vmem:[#allocation2 + $0x81] sm:$0xff] %vm2538_vm6, %v4126_v33  ;;  %v4033_v14 = vadd.f32 %v4833_v24, %v7598_v7  ;;  %v4836_v54 = vadd.f32 %v4835_v53, %v4834_v61  ;;  %v1979_v33 = vld [vmem:[#allocation2 + $0x121] sm:$0xff] }
 0x4a4   : > { %v4075_v13 = vmul.f32 %v7606_v21, %v4033_v14  ;;  %v4036_v49 = vadd.f32 %v4836_v54, %v7602_v46  ;;  %v1977_v14 = vld [vmem:[#allocation2 + $0x101] sm:$0xff] }
 0x4a6   : > { %v4095_v5 = vadd.f32 %v7609_v50, %v4075_v13  ;;  %v4076_v29 = vmul.f32 %v7606_v21, %v4036_v49 }
 0x4a8   : > { %v4111_v44 = vadd.f32 %v4095_v5, %v1972_v16  ;;  %v4096_v15 = vadd.f32 %v7609_v50, %v4076_v29 }
 0x4aa   : > { %v4127_v63 = vmax.f32 %v4111_v44, 0.0  ;;  %v4112_v35 = vadd.f32 %v4096_v15, %v1973_v57  ;;  %v4837_v37 = vpop.f32.mrb[36].mxu1 }
 0x4ab   : > { %v4838_v56 = vpop.f32.mrb[37].mxu1 }
 0x4ac   : > { %4143 = vst.msk [vmem:[#allocation2 + $0xb1] sm:$0xff] %vm2538_vm6, %v4127_v63  ;;  %v4128_v7 = vmax.f32 %v4112_v35, 0.0  ;;  %v4839_v39 = vadd.f32 %v4838_v56, %v4837_v37  ;;  %v4840_v25 = vpop.f32.mrb[38].mxu1 }
 0x4ad   : > { %v4841_v30 = vpop.f32.mrb[39].mxu1 }
 0x4ae   : > { %4144 = vst.msk [vmem:[#allocation2 + $0xc1] sm:$0xff] %vm2538_vm6, %v4128_v7  ;;  %v4041_v46 = vadd.f32 %v7596_v12, %v4839_v39  ;;  %v4842_v20 = vadd.f32 %v4841_v30, %v4840_v25 }
 0x4b0   : > { %v4077_v41 = vmul.f32 %v7606_v21, %v4041_v46  ;;  %v4044_v60 = vadd.f32 %v7600_v19, %v4842_v20 }
 0x4b2   : > { %v4097_v3 = vadd.f32 %v7609_v50, %v4077_v41  ;;  %v4078_v8 = vmul.f32 %v7606_v21, %v4044_v60 }
 0x4b4   : > { %v4113_v2 = vadd.f32 %v4097_v3, %v1974_v11  ;;  %v4098_v34 = vadd.f32 %v7609_v50, %v4078_v8 }
 0x4b6   : > { %v4129_v10 = vmax.f32 %v4113_v2, 0.0  ;;  %v4114_v17 = vadd.f32 %v4098_v34, %v1975_v9 }
 0x4b8   : > { %4145 = vst.msk [vmem:[#allocation2 + $0xd1] sm:$0xff] %vm2538_vm6, %v4129_v10  ;;  %v4130_v62 = vmax.f32 %v4114_v17, 0.0 }
 0x4ba   : > { %4146 = vst.msk [vmem:[#allocation2 + $0xe1] sm:$0xff] %vm2538_vm6, %v4130_v62  ;;  %v4843_v12 = vpop.f32.mrb[40].mxu1 }
 0x4bb   : > { %v4844_v18 = vpop.f32.mrb[41].mxu1 }
 0x4bc   : > { %v4845_v23 = vadd.f32 %v4844_v18, %v4843_v12  ;;  %v4846_v19 = vpop.f32.mrb[42].mxu1 }
 0x4bd   : > { %v4847_v52 = vpop.f32.mrb[43].mxu1 }
 0x4be   : > { %v4848_v42 = vadd.f32 %v4847_v52, %v4846_v19 }
 0x4c2   : > { %v4849_v31 = vpop.f32.mrb[44].mxu1 }
 0x4c3   : > { %v4850_v59 = vpop.f32.mrb[45].mxu1 }
 0x4c4   : > { %v4851_v43 = vadd.f32 %v4850_v59, %v4849_v31  ;;  %v4852_v27 = vpop.f32.mrb[46].mxu1 }
 0x4c5   : > { %v4853_v32 = vpop.f32.mrb[47].mxu1 }
 0x4c6   : > { %v4854_v51 = vadd.f32 %v4853_v32, %v4852_v27 }
 0x4ca   : > { %v4935_v55 = vpop.f32.mrb[48].mxu1 }
 0x4cb   : > { %v4057_v1 = vadd.f32 %v4935_v55, %v4851_v43  ;;  %v4048_v22 = vpop.f32.mrb[49].mxu1 }
 0x4cc   : > { %v4049_v45 = vadd.f32 %v4845_v23, %v4048_v22  ;;  %v4936_v47 = vpop.f32.mrb[50].mxu1 }
 0x4cd   : > { %v4081_v48 = vmul.f32 %v7606_v21, %v4057_v1  ;;  %v4060_v4 = vadd.f32 %v4936_v47, %v4854_v51  ;;  %v4051_v40 = vpop.f32.mrb[51].mxu1 }
 0x4ce   : > { %v4079_v58 = vmul.f32 %v7606_v21, %v4049_v45  ;;  %v4052_v0 = vadd.f32 %v4848_v42, %v4051_v40 }
 0x4cf   : > { %v4101_v26 = vadd.f32 %v7609_v50, %v4081_v48  ;;  %v4082_v6 = vmul.f32 %v7606_v21, %v4060_v4 }
 0x4d0   : > { %v4099_v28 = vadd.f32 %v7609_v50, %v4079_v58  ;;  %v4080_v24 = vmul.f32 %v7606_v21, %v4052_v0 }
 0x4d1   : > { %v4117_v61 = vadd.f32 %v4101_v26, %v1978_v38  ;;  %v4102_v53 = vadd.f32 %v7609_v50, %v4082_v6 }
 0x4d2   : > { %v4115_v54 = vadd.f32 %v4099_v28, %v1976_v36  ;;  %v4100_v13 = vadd.f32 %v7609_v50, %v4080_v24 }
 0x4d3   : > { %v4133_v49 = vmax.f32 %v4117_v61, 0.0  ;;  %v4118_v16 = vadd.f32 %v4102_v53, %v1979_v33 }
 0x4d4   : > { %v4131_v5 = vmax.f32 %v4115_v54, 0.0  ;;  %v4116_v29 = vadd.f32 %v4100_v13, %v1977_v14 }
 0x4d5   : > { %4149 = vst.msk [vmem:[#allocation2 + $0x111] sm:$0xff] %vm2538_vm6, %v4133_v49  ;;  %v4134_v57 = vmax.f32 %v4118_v16, 0.0 }
 0x4d6   : > { %4147 = vst.msk [vmem:[#allocation2 + $0xf1] sm:$0xff] %vm2538_vm6, %v4131_v5  ;;  %v4132_v44 = vmax.f32 %v4116_v29, 0.0 }
 0x4d7   : > { %4150 = vst.msk [vmem:[#allocation2 + $0x121] sm:$0xff] %vm2538_vm6, %v4134_v57 }
 0x4d8   : > { %4148 = vst.msk [vmem:[#allocation2 + $0x101] sm:$0xff] %vm2538_vm6, %v4132_v44 }
 0x4d9 PF: > { %p4436_p7 = scmp.ne.s32.totalorder %s5619_s25, 3 }
 0x4da   : > { %v4156_v21 = vld [vmem:[#allocation2 + $0x11] sm:$0xff] (!%p4436_p7)  ;;  %vm4172_vm9 = vcmask (!%p4436_p7), 261120   ;;  %v4157_v50 = vld [vmem:[#allocation2 + $0x21] sm:$0xff] (!%p4436_p7) }
 0x4db   : > { %4154 = sbr.rel (%p4436_p7) target bundleno = 1251 (0x4e3), region = 60  ;;  %v4158_v15 = vld [vmem:[#allocation2 + $0x31] sm:$0xff] (!%p4436_p7)  ;;  %4173 = vst.msk [vmem:[%s7740_s7] sm:$0xff] (!%p4436_p7), %vm4172_vm9, %v4156_v21  ;;  %4174 = vst.msk [vmem:[%s7740_s7 + $0x8] sm:$0xff] (!%p4436_p7), %vm4172_vm9, %v4157_v50  ;;  %v4159_v63 = vld [vmem:[#allocation2 + $0x41] sm:$0xff] (!%p4436_p7) }
 0x4dc   : > { %4175 = vst.msk [vmem:[%s7740_s7 + $0x10] sm:$0xff] (!%p4436_p7), %vm4172_vm9, %v4158_v15  ;;  %v4160_v35 = vld [vmem:[#allocation2 + $0x51] sm:$0xff] (!%p4436_p7)  ;;  %v4161_v37 = vld [vmem:[#allocation2 + $0x61] sm:$0xff] (!%p4436_p7)  ;;  %4176 = vst.msk [vmem:[%s7740_s7 + $0x18] sm:$0xff] (!%p4436_p7), %vm4172_vm9, %v4159_v63 }
 0x4dd   : > { %4177 = vst.msk [vmem:[%s7740_s7 + $0x20] sm:$0xff] (!%p4436_p7), %vm4172_vm9, %v4160_v35  ;;  %4178 = vst.msk [vmem:[%s7740_s7 + $0x28] sm:$0xff] (!%p4436_p7), %vm4172_vm9, %v4161_v37  ;;  %v4162_v56 = vld [vmem:[#allocation2 + $0x71] sm:$0xff] (!%p4436_p7)  ;;  %v4163_v7 = vld [vmem:[#allocation2 + $0x81] sm:$0xff] (!%p4436_p7) }
 0x4de   : > { %v4164_v39 = vld [vmem:[#allocation2 + $0xb1] sm:$0xff] (!%p4436_p7)  ;;  %4179 = vst.msk [vmem:[%s7740_s7 + $0x30] sm:$0xff] (!%p4436_p7), %vm4172_vm9, %v4162_v56  ;;  %4180 = vst.msk [vmem:[%s7740_s7 + $0x38] sm:$0xff] (!%p4436_p7), %vm4172_vm9, %v4163_v7  ;;  %v4165_v25 = vld [vmem:[#allocation2 + $0xc1] sm:$0xff] (!%p4436_p7) }
 0x4df   : > { %4181 = vst.msk [vmem:[%s7740_s7 + $0x40] sm:$0xff] (!%p4436_p7), %vm4172_vm9, %v4164_v39  ;;  %v4166_v30 = vld [vmem:[#allocation2 + $0xd1] sm:$0xff] (!%p4436_p7)  ;;  %v4167_v46 = vld [vmem:[#allocation2 + $0xe1] sm:$0xff] (!%p4436_p7)  ;;  %4182 = vst.msk [vmem:[%s7740_s7 + $0x48] sm:$0xff] (!%p4436_p7), %vm4172_vm9, %v4165_v25 }
 0x4e0   : > { %4183 = vst.msk [vmem:[%s7740_s7 + $0x50] sm:$0xff] (!%p4436_p7), %vm4172_vm9, %v4166_v30  ;;  %4184 = vst.msk [vmem:[%s7740_s7 + $0x58] sm:$0xff] (!%p4436_p7), %vm4172_vm9, %v4167_v46  ;;  %v4168_v20 = vld [vmem:[#allocation2 + $0xf1] sm:$0xff] (!%p4436_p7)  ;;  %v4169_v41 = vld [vmem:[#allocation2 + $0x101] sm:$0xff] (!%p4436_p7) }
 0x4e1   : > { %v4170_v60 = vld [vmem:[#allocation2 + $0x111] sm:$0xff] (!%p4436_p7)  ;;  %4185 = vst.msk [vmem:[%s7740_s7 + $0x60] sm:$0xff] (!%p4436_p7), %vm4172_vm9, %v4168_v20  ;;  %4186 = vst.msk [vmem:[%s7740_s7 + $0x68] sm:$0xff] (!%p4436_p7), %vm4172_vm9, %v4169_v41  ;;  %v4171_v11 = vld [vmem:[#allocation2 + $0x121] sm:$0xff] (!%p4436_p7) }
 0x4e2   : > { %4187 = vst.msk [vmem:[%s7740_s7 + $0x70] sm:$0xff] %vm4172_vm9, %v4170_v60  ;;  %4188 = vst.msk [vmem:[%s7740_s7 + $0x78] sm:$0xff] %vm4172_vm9, %v4171_v11 }
 0x4e3 PF: > { %s17_s24 = sadd.s32 1, %s5567_s24  }
 0x4e4   : > { %p14_p8 = scmp.ge.s32.totalorder %s17_s24, 6  }
 0x4e6   :  { %16 = sbr.rel (!%p14_p8) target bundleno = 1 (0x1), region = 98 }

</bundles_post_ra>
